<compile_context>
chip_gen: v5e
topology: v5e:2x2
jax: 0.10.0
libtpu: 0.0.40
codegen_flags: <defaults>
</compile_context>

<pallas_src>
import math
import functools

import jax
import jax.numpy as jnp
from jax.experimental import pallas as pl
from jax.experimental.pallas import tpu as pltpu


def _pick_nodes_per_block(N, T, target_rows=128, max_rows=1024):
  """Largest divisor R of N with R*T <= max_rows, preferring R*T >= target_rows."""
  divisors = [r for r in range(1, N + 1) if N % r == 0]
  best = divisors[0]
  for r in divisors:
    if r * T > max_rows:
      break
    best = r
    if r * T >= target_rows:
      break
  return best


def _mha_temporal_kernel(
    qstk_ref, kstk_ref, v_ref, mbias_ref,
    wq_ref, bq_ref, wk_ref, bk_ref,
    wv_ref, bv_ref, wo_ref, bo_ref,
    out_ref,
    *, R, T, D, n_heads, mm_dtype):
  """One grid step: R (batch,node) rows -> causal conv q/k, linear v, MHA, out linear."""
  d_k = D // n_heads
  RT = R * T
  inv_sqrt_dk = 1.0 / math.sqrt(d_k)

  # ---- node-independent projections as big flattened matmuls (M = R*T) ----
  qs = qstk_ref[0].reshape(RT, -1).astype(mm_dtype)   # (R*T, K*D)
  ks = kstk_ref[0].reshape(RT, -1).astype(mm_dtype)   # (R*T, K*D)
  vs = v_ref[0].reshape(RT, D).astype(mm_dtype)       # (R*T, D)

  q_conv = jnp.dot(qs, wq_ref[...].astype(mm_dtype),
                   preferred_element_type=jnp.float32) + bq_ref[...]
  k_conv = jnp.dot(ks, wk_ref[...].astype(mm_dtype),
                   preferred_element_type=jnp.float32) + bk_ref[...]
  v_lin = jnp.dot(vs, wv_ref[...].astype(mm_dtype),
                  preferred_element_type=jnp.float32) + bv_ref[...]

  q3 = q_conv.reshape(R, T, D)
  k3 = k_conv.reshape(R, T, D)
  v3 = v_lin.reshape(R, T, D)

  # additive mask bias (precomputed in the wrapper), broadcast once and reused
  mbias = jnp.broadcast_to(mbias_ref[0][None, :, :], (R, T, T))

  # ---- per-head attention, batched over the R nodes ----
  head_outs = []
  for h in range(n_heads):
    lo = h * d_k
    q_h = q3[:, :, lo:lo + d_k]                       # (R, T, d_k)
    k_h = k3[:, :, lo:lo + d_k]                       # (R, T, d_k)
    v_h = v3[:, :, lo:lo + d_k]                       # (R, T, d_k)
    s = jnp.einsum('rtd,rsd->rts',
                   q_h.astype(mm_dtype), k_h.astype(mm_dtype),
                   preferred_element_type=jnp.float32)
    s = s * inv_sqrt_dk + mbias                       # (R, T, T), f32
    s = s - jnp.max(s, axis=-1, keepdims=True)
    e = jnp.exp(s)
    p = e * pl.reciprocal(jnp.sum(e, axis=-1, keepdims=True), approx=True)
    head_outs.append(
        jnp.einsum('rts,rsd->rtd',
                   p.astype(mm_dtype), v_h.astype(mm_dtype),
                   preferred_element_type=jnp.float32))
  x = jnp.concatenate(head_outs, axis=-1)             # (R, T, D)

  # ---- output projection (flattened again) ----
  out = jnp.dot(x.reshape(RT, D).astype(mm_dtype), wo_ref[...].astype(mm_dtype),
                preferred_element_type=jnp.float32) + bo_ref[...]
  out_ref[0] = out.reshape(R, T, D).astype(out_ref.dtype)


def mha_temporal_forward(query, key, value, mask, params, *, n_heads, ksize,
                         nodes_per_block=None, mm_dtype=jnp.float32):
  """query/key/value: (B, N, T, d_model); mask: (B, T, T) or None."""
  B, N, T, D = query.shape
  pad = ksize - 1
  KD = ksize * D

  if nodes_per_block is None:
    nodes_per_block = _pick_nodes_per_block(N, T)
  R = nodes_per_block
  assert N % R == 0, "nodes_per_block must divide N"

  # Causal conv realized as ONE matmul: build the shifted-stacked input
  # stk[..., t, j*D:(j+1)*D] = pad[..., t+j, :]  with pad = K-1 left zeros.
  qpad = jnp.pad(query, ((0, 0), (0, 0), (pad, 0), (0, 0)))
  kpad = jnp.pad(key, ((0, 0), (0, 0), (pad, 0), (0, 0)))
  qstk = jnp.concatenate([qpad[:, :, j:j + T, :] for j in range(ksize)], axis=-1)
  kstk = jnp.concatenate([kpad[:, :, j:j + T, :] for j in range(ksize)], axis=-1)

  # Additive mask bias (matches masked_fill(mask == 0, -1e9) after softmax).
  if mask is None:
    mbias = jnp.zeros((B, T, T), jnp.float32)
  else:
    mbias = jnp.where(mask == 0, -1000000000.0, 0.0).astype(jnp.float32)

  # Stacked conv weights: (K, D_in, D_out) -> (K*D_in, D_out), tap-major.
  wq_stack = params["wq"].reshape(KD, D)
  wk_stack = params["wk"].reshape(KD, D)

  kernel = functools.partial(_mha_temporal_kernel, R=R, T=T, D=D,
                             n_heads=n_heads, mm_dtype=mm_dtype)

  return pl.pallas_call(
      kernel,
      out_shape=jax.ShapeDtypeStruct((B, N, T, D), jnp.float32),
      grid=(B, N // R),
      in_specs=[
          pl.BlockSpec((1, R, T, KD), lambda b, n: (b, n, 0, 0)),   # q stacked
          pl.BlockSpec((1, R, T, KD), lambda b, n: (b, n, 0, 0)),   # k stacked
          pl.BlockSpec((1, R, T, D), lambda b, n: (b, n, 0, 0)),    # value
          pl.BlockSpec((1, T, T), lambda b, n: (b, 0, 0)),          # mask bias
          pl.BlockSpec((KD, D), lambda b, n: (0, 0)),               # Wq stacked
          pl.BlockSpec((1, D), lambda b, n: (0, 0)),                # bq
          pl.BlockSpec((KD, D), lambda b, n: (0, 0)),               # Wk stacked
          pl.BlockSpec((1, D), lambda b, n: (0, 0)),                # bk
          pl.BlockSpec((D, D), lambda b, n: (0, 0)),                # Wv^T
          pl.BlockSpec((1, D), lambda b, n: (0, 0)),                # bv
          pl.BlockSpec((D, D), lambda b, n: (0, 0)),                # Wo^T
          pl.BlockSpec((1, D), lambda b, n: (0, 0)),                # bo
      ],
      out_specs=pl.BlockSpec((1, R, T, D), lambda b, n: (b, n, 0, 0)),
      compiler_params=pltpu.CompilerParams(
          dimension_semantics=("parallel", "parallel")),
  )(qstk, kstk, value, mbias,
    wq_stack, params["bq"], wk_stack, params["bk"],
    params["wv_t"], params["bv"], params["wo_t"], params["bo"])


def reference_forward(query, key, value, mask, params, *, n_heads, ksize):
  """Pure-JAX reference matching the PyTorch forward (non-multi-segment path)."""
  B, N, T, D = query.shape
  d_k = D // n_heads
  pad = ksize - 1
  qpad = jnp.pad(query, ((0, 0), (0, 0), (pad, 0), (0, 0)))
  kpad = jnp.pad(key, ((0, 0), (0, 0), (pad, 0), (0, 0)))

  def causal_conv(xpad, w, b):
    res = jnp.zeros((B, N, T, D), jnp.float32)
    for j in range(ksize):
      res = res + jnp.einsum('bntd,de->bnte', xpad[:, :, j:j + T, :], w[j])
    return res + b

  q = causal_conv(qpad, params["wq"], params["bq"])
  k = causal_conv(kpad, params["wk"], params["bk"])
  v = value @ params["wv_t"] + params["bv"]

  def to_heads(x):
    return x.reshape(B, N, T, n_heads, d_k).transpose(0, 1, 3, 2, 4)

  qh, kh, vh = to_heads(q), to_heads(k), to_heads(v)
  scores = jnp.einsum('bnhtd,bnhsd->bnhts', qh, kh) / math.sqrt(d_k)
  if mask is not None:
    scores = jnp.where(mask[:, None, None, :, :] == 0, -1000000000.0, scores)
  p = jax.nn.softmax(scores, axis=-1)
  xo = jnp.einsum('bnhts,bnhsd->bnhtd', p, vh)
  xo = xo.transpose(0, 1, 3, 2, 4).reshape(B, N, T, D)
  return xo @ params["wo_t"] + params["bo"]


def init_params(key, d_model, ksize):
  """Deterministic synthetic parameters (PyTorch layouts converted to matmul layouts)."""
  ks = jax.random.split(key, 8)
  scale = 0.1
  # Conv2d weight in PyTorch is (out, in, 1, K); we store as (K, in, out).
  wq_t = jax.random.normal(ks[0], (d_model, d_model, 1, ksize), jnp.float32) * scale
  wk_t = jax.random.normal(ks[1], (d_model, d_model, 1, ksize), jnp.float32) * scale
  wq = jnp.transpose(wq_t[:, :, 0, :], (2, 1, 0))   # (K, in, out)
  wk = jnp.transpose(wk_t[:, :, 0, :], (2, 1, 0))
  # Linear weight in PyTorch is (out, in); we store transposed (in, out).
  wv = jax.random.normal(ks[2], (d_model, d_model), jnp.float32) * scale
  wo = jax.random.normal(ks[3], (d_model, d_model), jnp.float32) * scale
  return dict(
      wq=wq, bq=jax.random.normal(ks[4], (1, d_model), jnp.float32) * scale,
      wk=wk, bk=jax.random.normal(ks[5], (1, d_model), jnp.float32) * scale,
      wv_t=wv.T, bv=jax.random.normal(ks[6], (1, d_model), jnp.float32) * scale,
      wo_t=wo.T, bo=jax.random.normal(ks[7], (1, d_model), jnp.float32) * scale,
  )


if __name__ == "__main__":
  # Small shapes consistent with the module (d_model % nb_head == 0).
  B, N, T, d_model = 2, 16, 8, 32
  n_heads, ksize = 4, 3
  # num_of_mhalf / points_per_mhalf only affect the multi-segment branch,
  # which is not exercised here (query_multi_segment=key_multi_segment=False).

  root = jax.random.PRNGKey(0)
  kq, kk, kv, kp = jax.random.split(root, 4)
  query = jax.random.normal(kq, (B, N, T, d_model), jnp.float32)
  key_ = jax.random.normal(kk, (B, N, T, d_model), jnp.float32)
  value = jax.random.normal(kv, (B, N, T, d_model), jnp.float32)
  # (batch, T, T) causal mask, broadcast over N and heads inside attention.
  mask = jnp.broadcast_to(jnp.tril(jnp.ones((T, T), jnp.float32)), (B, T, T))

  params = init_params(kp, d_model, ksize)

  out = mha_temporal_forward(query, key_, value, mask, params,
                             n_heads=n_heads, ksize=ksize)
  out = jax.block_until_ready(out)

  ref = reference_forward(query, key_, value, mask, params,
                          n_heads=n_heads, ksize=ksize)
  ref = jax.block_until_ready(ref)

  err = float(jnp.max(jnp.abs(out - ref)))
  assert out.shape == (B, N, T, d_model)
  # Tolerance accounts for pl.reciprocal(approx=True) in the softmax denominator.
  assert err < 1e-2, f"max abs error {err}"
  print("KERNEL_OK")
</pallas_src>

<mosaic_0001>
module attributes {stable_mosaic.version = 11 : i64} {
  func.func @_mha_temporal_kernel(%arg0: i32, %arg1: i32, %arg2: memref<1x16x8x96xf32, #tpu.memory_space<vmem>>, %arg3: memref<1x16x8x96xf32, #tpu.memory_space<vmem>>, %arg4: memref<1x16x8x32xf32, #tpu.memory_space<vmem>>, %arg5: memref<1x8x8xf32, #tpu.memory_space<vmem>>, %arg6: memref<96x32xf32, #tpu.memory_space<vmem>>, %arg7: memref<1x32xf32, #tpu.memory_space<vmem>>, %arg8: memref<96x32xf32, #tpu.memory_space<vmem>>, %arg9: memref<1x32xf32, #tpu.memory_space<vmem>>, %arg10: memref<32x32xf32, #tpu.memory_space<vmem>>, %arg11: memref<1x32xf32, #tpu.memory_space<vmem>>, %arg12: memref<32x32xf32, #tpu.memory_space<vmem>>, %arg13: memref<1x32xf32, #tpu.memory_space<vmem>>, %arg14: memref<1x16x8x32xf32, #tpu.memory_space<vmem>>) attributes {dimension_semantics = [#tpu.dimension_semantics<parallel>, #tpu.dimension_semantics<parallel>], iteration_bounds = array<i64: 2, 1>, scalar_prefetch = 0 : i64, scratch_operands = 0 : i64, tpu.core_type = #tpu.core_type<tc>, window_params = [{transform_indices = @transform_0, window_bounds = array<i64: 1, 16, 8, 96>}, {transform_indices = @transform_1, window_bounds = array<i64: 1, 16, 8, 96>}, {transform_indices = @transform_2, window_bounds = array<i64: 1, 16, 8, 32>}, {transform_indices = @transform_3, window_bounds = array<i64: 1, 8, 8>}, {pipeline_mode = #tpu.pipeline_mode<synchronous>, transform_indices = @transform_4, window_bounds = array<i64: 96, 32>}, {pipeline_mode = #tpu.pipeline_mode<synchronous>, transform_indices = @transform_5, window_bounds = array<i64: 1, 32>}, {pipeline_mode = #tpu.pipeline_mode<synchronous>, transform_indices = @transform_6, window_bounds = array<i64: 96, 32>}, {pipeline_mode = #tpu.pipeline_mode<synchronous>, transform_indices = @transform_7, window_bounds = array<i64: 1, 32>}, {pipeline_mode = #tpu.pipeline_mode<synchronous>, transform_indices = @transform_8, window_bounds = array<i64: 32, 32>}, {pipeline_mode = #tpu.pipeline_mode<synchronous>, transform_indices = @transform_9, window_bounds = array<i64: 1, 32>}, {pipeline_mode = #tpu.pipeline_mode<synchronous>, transform_indices = @transform_10, window_bounds = array<i64: 32, 32>}, {pipeline_mode = #tpu.pipeline_mode<synchronous>, transform_indices = @transform_11, window_bounds = array<i64: 1, 32>}, {transform_indices = @transform_12, window_bounds = array<i64: 1, 16, 8, 32>}]} {
    %c0 = arith.constant 0 : index
    %c0_0 = arith.constant 0 : index
    %c0_1 = arith.constant 0 : index
    %c0_2 = arith.constant 0 : index
    %0 = vector.load %arg2[%c0, %c0_0, %c0_1, %c0_2] : memref<1x16x8x96xf32, #tpu.memory_space<vmem>>, vector<1x16x8x96xf32>
    %1 = vector.shape_cast %0 : vector<1x16x8x96xf32> to vector<16x8x96xf32>
    %2 = vector.shape_cast %1 : vector<16x8x96xf32> to vector<128x96xf32>
    %c0_3 = arith.constant 0 : index
    %c0_4 = arith.constant 0 : index
    %c0_5 = arith.constant 0 : index
    %c0_6 = arith.constant 0 : index
    %3 = vector.load %arg3[%c0_3, %c0_4, %c0_5, %c0_6] : memref<1x16x8x96xf32, #tpu.memory_space<vmem>>, vector<1x16x8x96xf32>
    %4 = vector.shape_cast %3 : vector<1x16x8x96xf32> to vector<16x8x96xf32>
    %5 = vector.shape_cast %4 : vector<16x8x96xf32> to vector<128x96xf32>
    %c0_7 = arith.constant 0 : index
    %c0_8 = arith.constant 0 : index
    %c0_9 = arith.constant 0 : index
    %c0_10 = arith.constant 0 : index
    %6 = vector.load %arg4[%c0_7, %c0_8, %c0_9, %c0_10] : memref<1x16x8x32xf32, #tpu.memory_space<vmem>>, vector<1x16x8x32xf32>
    %7 = vector.shape_cast %6 : vector<1x16x8x32xf32> to vector<16x8x32xf32>
    %8 = vector.shape_cast %7 : vector<16x8x32xf32> to vector<128x32xf32>
    %c0_11 = arith.constant 0 : index
    %c0_12 = arith.constant 0 : index
    %9 = vector.load %arg6[%c0_11, %c0_12] : memref<96x32xf32, #tpu.memory_space<vmem>>, vector<96x32xf32>
    %cst = arith.constant dense<0.000000e+00> : vector<128x32xf32>
    %10 = tpu.matmul %2, %9, %cst {dimension_numbers = #tpu.dot_dimension_numbers<[1], [0], [0], [1], [0, 0, 1, 1], [], []>} : vector<128x96xf32>, vector<96x32xf32>, vector<128x32xf32> -> vector<128x32xf32>
    %c0_13 = arith.constant 0 : index
    %c0_14 = arith.constant 0 : index
    %11 = vector.load %arg7[%c0_13, %c0_14] : memref<1x32xf32, #tpu.memory_space<vmem>>, vector<1x32xf32>
    %12 = vector.broadcast %11 : vector<1x32xf32> to vector<128x32xf32>
    %13 = arith.addf %10, %12 : vector<128x32xf32>
    %c0_15 = arith.constant 0 : index
    %c0_16 = arith.constant 0 : index
    %14 = vector.load %arg8[%c0_15, %c0_16] : memref<96x32xf32, #tpu.memory_space<vmem>>, vector<96x32xf32>
    %cst_17 = arith.constant dense<0.000000e+00> : vector<128x32xf32>
    %15 = tpu.matmul %5, %14, %cst_17 {dimension_numbers = #tpu.dot_dimension_numbers<[1], [0], [0], [1], [0, 0, 1, 1], [], []>} : vector<128x96xf32>, vector<96x32xf32>, vector<128x32xf32> -> vector<128x32xf32>
    %c0_18 = arith.constant 0 : index
    %c0_19 = arith.constant 0 : index
    %16 = vector.load %arg9[%c0_18, %c0_19] : memref<1x32xf32, #tpu.memory_space<vmem>>, vector<1x32xf32>
    %17 = vector.broadcast %16 : vector<1x32xf32> to vector<128x32xf32>
    %18 = arith.addf %15, %17 : vector<128x32xf32>
    %c0_20 = arith.constant 0 : index
    %c0_21 = arith.constant 0 : index
    %19 = vector.load %arg10[%c0_20, %c0_21] : memref<32x32xf32, #tpu.memory_space<vmem>>, vector<32x32xf32>
    %cst_22 = arith.constant dense<0.000000e+00> : vector<128x32xf32>
    %20 = tpu.matmul %8, %19, %cst_22 {dimension_numbers = #tpu.dot_dimension_numbers<[1], [0], [0], [1], [0, 0, 1, 1], [], []>} : vector<128x32xf32>, vector<32x32xf32>, vector<128x32xf32> -> vector<128x32xf32>
    %c0_23 = arith.constant 0 : index
    %c0_24 = arith.constant 0 : index
    %21 = vector.load %arg11[%c0_23, %c0_24] : memref<1x32xf32, #tpu.memory_space<vmem>>, vector<1x32xf32>
    %22 = vector.broadcast %21 : vector<1x32xf32> to vector<128x32xf32>
    %23 = arith.addf %20, %22 : vector<128x32xf32>
    %24 = vector.shape_cast %13 : vector<128x32xf32> to vector<16x8x32xf32>
    %25 = vector.shape_cast %18 : vector<128x32xf32> to vector<16x8x32xf32>
    %26 = vector.shape_cast %23 : vector<128x32xf32> to vector<16x8x32xf32>
    %c0_25 = arith.constant 0 : index
    %c0_26 = arith.constant 0 : index
    %c0_27 = arith.constant 0 : index
    %27 = vector.load %arg5[%c0_25, %c0_26, %c0_27] : memref<1x8x8xf32, #tpu.memory_space<vmem>>, vector<1x8x8xf32>
    %28 = vector.shape_cast %27 : vector<1x8x8xf32> to vector<8x8xf32>
    %29 = vector.shape_cast %28 : vector<8x8xf32> to vector<1x8x8xf32>
    %30 = vector.shape_cast %29 : vector<1x8x8xf32> to vector<1x8x8xf32>
    %31 = vector.broadcast %30 : vector<1x8x8xf32> to vector<16x8x8xf32>
    %32 = vector.extract_strided_slice %24 {offsets = [0, 0, 0], sizes = [16, 8, 8], strides = [1, 1, 1]} : vector<16x8x32xf32> to vector<16x8x8xf32>
    %33 = vector.extract_strided_slice %25 {offsets = [0, 0, 0], sizes = [16, 8, 8], strides = [1, 1, 1]} : vector<16x8x32xf32> to vector<16x8x8xf32>
    %34 = vector.extract_strided_slice %26 {offsets = [0, 0, 0], sizes = [16, 8, 8], strides = [1, 1, 1]} : vector<16x8x32xf32> to vector<16x8x8xf32>
    "tpu.trace_start"() <{level = 10 : i32, message = "rtd,rsd->rts"}> : () -> ()
    %cst_28 = arith.constant dense<0.000000e+00> : vector<16x8x8xf32>
    %35 = tpu.matmul %32, %33, %cst_28 {dimension_numbers = #tpu.dot_dimension_numbers<[2], [2], [1], [1], [0, 0, 0, 1, 1, 1], [0], [0]>} : vector<16x8x8xf32>, vector<16x8x8xf32>, vector<16x8x8xf32> -> vector<16x8x8xf32>
    "tpu.trace_stop"() : () -> ()
    %cst_29 = arith.constant 0.353553385 : f32
    %36 = vector.broadcast %cst_29 : f32 to vector<16x8x8xf32>
    %37 = arith.mulf %35, %36 : vector<16x8x8xf32>
    %38 = arith.addf %37, %31 : vector<16x8x8xf32>
    %cst_30 = arith.constant dense<0xFF800000> : vector<16x8xf32>
    %39 = vector.multi_reduction <maximumf>, %38, %cst_30 [2] : vector<16x8x8xf32> to vector<16x8xf32>
    %40 = vector.shape_cast %39 : vector<16x8xf32> to vector<16x8x1xf32>
    %41 = vector.broadcast %40 : vector<16x8x1xf32> to vector<16x8x8xf32>
    %42 = arith.subf %38, %41 : vector<16x8x8xf32>
    %43 = math.exp %42 : vector<16x8x8xf32>
    %cst_31 = arith.constant dense<0.000000e+00> : vector<16x8xf32>
    %44 = vector.multi_reduction <add>, %43, %cst_31 [2] : vector<16x8x8xf32> to vector<16x8xf32>
    %45 = vector.shape_cast %44 : vector<16x8xf32> to vector<16x8x1xf32>
    %46 = tpu.reciprocal %45 {approx = true} : vector<16x8x1xf32> -> vector<16x8x1xf32>
    %47 = vector.broadcast %46 : vector<16x8x1xf32> to vector<16x8x8xf32>
    %48 = arith.mulf %43, %47 : vector<16x8x8xf32>
    "tpu.trace_start"() <{level = 10 : i32, message = "rts,rsd->rtd"}> : () -> ()
    %cst_32 = arith.constant dense<0.000000e+00> : vector<16x8x8xf32>
    %49 = tpu.matmul %48, %34, %cst_32 {dimension_numbers = #tpu.dot_dimension_numbers<[2], [1], [1], [2], [0, 0, 0, 1, 1, 2], [0], [0]>} : vector<16x8x8xf32>, vector<16x8x8xf32>, vector<16x8x8xf32> -> vector<16x8x8xf32>
    "tpu.trace_stop"() : () -> ()
    %50 = vector.extract_strided_slice %24 {offsets = [0, 0, 8], sizes = [16, 8, 8], strides = [1, 1, 1]} : vector<16x8x32xf32> to vector<16x8x8xf32>
    %51 = vector.extract_strided_slice %25 {offsets = [0, 0, 8], sizes = [16, 8, 8], strides = [1, 1, 1]} : vector<16x8x32xf32> to vector<16x8x8xf32>
    %52 = vector.extract_strided_slice %26 {offsets = [0, 0, 8], sizes = [16, 8, 8], strides = [1, 1, 1]} : vector<16x8x32xf32> to vector<16x8x8xf32>
    "tpu.trace_start"() <{level = 10 : i32, message = "rtd,rsd->rts"}> : () -> ()
    %cst_33 = arith.constant dense<0.000000e+00> : vector<16x8x8xf32>
    %53 = tpu.matmul %50, %51, %cst_33 {dimension_numbers = #tpu.dot_dimension_numbers<[2], [2], [1], [1], [0, 0, 0, 1, 1, 1], [0], [0]>} : vector<16x8x8xf32>, vector<16x8x8xf32>, vector<16x8x8xf32> -> vector<16x8x8xf32>
    "tpu.trace_stop"() : () -> ()
    %cst_34 = arith.constant 0.353553385 : f32
    %54 = vector.broadcast %cst_34 : f32 to vector<16x8x8xf32>
    %55 = arith.mulf %53, %54 : vector<16x8x8xf32>
    %56 = arith.addf %55, %31 : vector<16x8x8xf32>
    %cst_35 = arith.constant dense<0xFF800000> : vector<16x8xf32>
    %57 = vector.multi_reduction <maximumf>, %56, %cst_35 [2] : vector<16x8x8xf32> to vector<16x8xf32>
    %58 = vector.shape_cast %57 : vector<16x8xf32> to vector<16x8x1xf32>
    %59 = vector.broadcast %58 : vector<16x8x1xf32> to vector<16x8x8xf32>
    %60 = arith.subf %56, %59 : vector<16x8x8xf32>
    %61 = math.exp %60 : vector<16x8x8xf32>
    %cst_36 = arith.constant dense<0.000000e+00> : vector<16x8xf32>
    %62 = vector.multi_reduction <add>, %61, %cst_36 [2] : vector<16x8x8xf32> to vector<16x8xf32>
    %63 = vector.shape_cast %62 : vector<16x8xf32> to vector<16x8x1xf32>
    %64 = tpu.reciprocal %63 {approx = true} : vector<16x8x1xf32> -> vector<16x8x1xf32>
    %65 = vector.broadcast %64 : vector<16x8x1xf32> to vector<16x8x8xf32>
    %66 = arith.mulf %61, %65 : vector<16x8x8xf32>
    "tpu.trace_start"() <{level = 10 : i32, message = "rts,rsd->rtd"}> : () -> ()
    %cst_37 = arith.constant dense<0.000000e+00> : vector<16x8x8xf32>
    %67 = tpu.matmul %66, %52, %cst_37 {dimension_numbers = #tpu.dot_dimension_numbers<[2], [1], [1], [2], [0, 0, 0, 1, 1, 2], [0], [0]>} : vector<16x8x8xf32>, vector<16x8x8xf32>, vector<16x8x8xf32> -> vector<16x8x8xf32>
    "tpu.trace_stop"() : () -> ()
    %68 = vector.extract_strided_slice %24 {offsets = [0, 0, 16], sizes = [16, 8, 8], strides = [1, 1, 1]} : vector<16x8x32xf32> to vector<16x8x8xf32>
    %69 = vector.extract_strided_slice %25 {offsets = [0, 0, 16], sizes = [16, 8, 8], strides = [1, 1, 1]} : vector<16x8x32xf32> to vector<16x8x8xf32>
    %70 = vector.extract_strided_slice %26 {offsets = [0, 0, 16], sizes = [16, 8, 8], strides = [1, 1, 1]} : vector<16x8x32xf32> to vector<16x8x8xf32>
    "tpu.trace_start"() <{level = 10 : i32, message = "rtd,rsd->rts"}> : () -> ()
    %cst_38 = arith.constant dense<0.000000e+00> : vector<16x8x8xf32>
    %71 = tpu.matmul %68, %69, %cst_38 {dimension_numbers = #tpu.dot_dimension_numbers<[2], [2], [1], [1], [0, 0, 0, 1, 1, 1], [0], [0]>} : vector<16x8x8xf32>, vector<16x8x8xf32>, vector<16x8x8xf32> -> vector<16x8x8xf32>
    "tpu.trace_stop"() : () -> ()
    %cst_39 = arith.constant 0.353553385 : f32
    %72 = vector.broadcast %cst_39 : f32 to vector<16x8x8xf32>
    %73 = arith.mulf %71, %72 : vector<16x8x8xf32>
    %74 = arith.addf %73, %31 : vector<16x8x8xf32>
    %cst_40 = arith.constant dense<0xFF800000> : vector<16x8xf32>
    %75 = vector.multi_reduction <maximumf>, %74, %cst_40 [2] : vector<16x8x8xf32> to vector<16x8xf32>
    %76 = vector.shape_cast %75 : vector<16x8xf32> to vector<16x8x1xf32>
    %77 = vector.broadcast %76 : vector<16x8x1xf32> to vector<16x8x8xf32>
    %78 = arith.subf %74, %77 : vector<16x8x8xf32>
    %79 = math.exp %78 : vector<16x8x8xf32>
    %cst_41 = arith.constant dense<0.000000e+00> : vector<16x8xf32>
    %80 = vector.multi_reduction <add>, %79, %cst_41 [2] : vector<16x8x8xf32> to vector<16x8xf32>
    %81 = vector.shape_cast %80 : vector<16x8xf32> to vector<16x8x1xf32>
    %82 = tpu.reciprocal %81 {approx = true} : vector<16x8x1xf32> -> vector<16x8x1xf32>
    %83 = vector.broadcast %82 : vector<16x8x1xf32> to vector<16x8x8xf32>
    %84 = arith.mulf %79, %83 : vector<16x8x8xf32>
    "tpu.trace_start"() <{level = 10 : i32, message = "rts,rsd->rtd"}> : () -> ()
    %cst_42 = arith.constant dense<0.000000e+00> : vector<16x8x8xf32>
    %85 = tpu.matmul %84, %70, %cst_42 {dimension_numbers = #tpu.dot_dimension_numbers<[2], [1], [1], [2], [0, 0, 0, 1, 1, 2], [0], [0]>} : vector<16x8x8xf32>, vector<16x8x8xf32>, vector<16x8x8xf32> -> vector<16x8x8xf32>
    "tpu.trace_stop"() : () -> ()
    %86 = vector.extract_strided_slice %24 {offsets = [0, 0, 24], sizes = [16, 8, 8], strides = [1, 1, 1]} : vector<16x8x32xf32> to vector<16x8x8xf32>
    %87 = vector.extract_strided_slice %25 {offsets = [0, 0, 24], sizes = [16, 8, 8], strides = [1, 1, 1]} : vector<16x8x32xf32> to vector<16x8x8xf32>
    %88 = vector.extract_strided_slice %26 {offsets = [0, 0, 24], sizes = [16, 8, 8], strides = [1, 1, 1]} : vector<16x8x32xf32> to vector<16x8x8xf32>
    "tpu.trace_start"() <{level = 10 : i32, message = "rtd,rsd->rts"}> : () -> ()
    %cst_43 = arith.constant dense<0.000000e+00> : vector<16x8x8xf32>
    %89 = tpu.matmul %86, %87, %cst_43 {dimension_numbers = #tpu.dot_dimension_numbers<[2], [2], [1], [1], [0, 0, 0, 1, 1, 1], [0], [0]>} : vector<16x8x8xf32>, vector<16x8x8xf32>, vector<16x8x8xf32> -> vector<16x8x8xf32>
    "tpu.trace_stop"() : () -> ()
    %cst_44 = arith.constant 0.353553385 : f32
    %90 = vector.broadcast %cst_44 : f32 to vector<16x8x8xf32>
    %91 = arith.mulf %89, %90 : vector<16x8x8xf32>
    %92 = arith.addf %91, %31 : vector<16x8x8xf32>
    %cst_45 = arith.constant dense<0xFF800000> : vector<16x8xf32>
    %93 = vector.multi_reduction <maximumf>, %92, %cst_45 [2] : vector<16x8x8xf32> to vector<16x8xf32>
    %94 = vector.shape_cast %93 : vector<16x8xf32> to vector<16x8x1xf32>
    %95 = vector.broadcast %94 : vector<16x8x1xf32> to vector<16x8x8xf32>
    %96 = arith.subf %92, %95 : vector<16x8x8xf32>
    %97 = math.exp %96 : vector<16x8x8xf32>
    %cst_46 = arith.constant dense<0.000000e+00> : vector<16x8xf32>
    %98 = vector.multi_reduction <add>, %97, %cst_46 [2] : vector<16x8x8xf32> to vector<16x8xf32>
    %99 = vector.shape_cast %98 : vector<16x8xf32> to vector<16x8x1xf32>
    %100 = tpu.reciprocal %99 {approx = true} : vector<16x8x1xf32> -> vector<16x8x1xf32>
    %101 = vector.broadcast %100 : vector<16x8x1xf32> to vector<16x8x8xf32>
    %102 = arith.mulf %97, %101 : vector<16x8x8xf32>
    "tpu.trace_start"() <{level = 10 : i32, message = "rts,rsd->rtd"}> : () -> ()
    %cst_47 = arith.constant dense<0.000000e+00> : vector<16x8x8xf32>
    %103 = tpu.matmul %102, %88, %cst_47 {dimension_numbers = #tpu.dot_dimension_numbers<[2], [1], [1], [2], [0, 0, 0, 1, 1, 2], [0], [0]>} : vector<16x8x8xf32>, vector<16x8x8xf32>, vector<16x8x8xf32> -> vector<16x8x8xf32>
    "tpu.trace_stop"() : () -> ()
    %104 = tpu.concatenate %49, %67, %85, %103 in 2 : vector<16x8x8xf32>, vector<16x8x8xf32>, vector<16x8x8xf32>, vector<16x8x8xf32> -> vector<16x8x32xf32>
    %105 = vector.shape_cast %104 : vector<16x8x32xf32> to vector<128x32xf32>
    %c0_48 = arith.constant 0 : index
    %c0_49 = arith.constant 0 : index
    %106 = vector.load %arg12[%c0_48, %c0_49] : memref<32x32xf32, #tpu.memory_space<vmem>>, vector<32x32xf32>
    %cst_50 = arith.constant dense<0.000000e+00> : vector<128x32xf32>
    %107 = tpu.matmul %105, %106, %cst_50 {dimension_numbers = #tpu.dot_dimension_numbers<[1], [0], [0], [1], [0, 0, 1, 1], [], []>} : vector<128x32xf32>, vector<32x32xf32>, vector<128x32xf32> -> vector<128x32xf32>
    %c0_51 = arith.constant 0 : index
    %c0_52 = arith.constant 0 : index
    %108 = vector.load %arg13[%c0_51, %c0_52] : memref<1x32xf32, #tpu.memory_space<vmem>>, vector<1x32xf32>
    %109 = vector.broadcast %108 : vector<1x32xf32> to vector<128x32xf32>
    %110 = arith.addf %107, %109 : vector<128x32xf32>
    %111 = vector.shape_cast %110 : vector<128x32xf32> to vector<16x8x32xf32>
    %c0_53 = arith.constant 0 : index
    %c0_54 = arith.constant 0 : index
    %c0_55 = arith.constant 0 : index
    %c0_56 = arith.constant 0 : index
    %112 = vector.load %arg14[%c0_53, %c0_54, %c0_55, %c0_56] : memref<1x16x8x32xf32, #tpu.memory_space<vmem>>, vector<1x16x8x32xf32>
    %113 = vector.shape_cast %112 : vector<1x16x8x32xf32> to vector<16x8x32xf32>
    %114 = vector.shape_cast %111 : vector<16x8x32xf32> to vector<1x16x8x32xf32>
    tpu.vector_store %arg14[%c0_53, %c0_54, %c0_55, %c0_56], %114 {strides = array<i32>} : memref<1x16x8x32xf32, #tpu.memory_space<vmem>>, vector<1x16x8x32xf32>,
    return
  }
  func.func @transform_0(%arg0: i32, %arg1: i32) -> (i32, i32, i32, i32) {
    %c0_i32 = arith.constant 0 : i32
    %c0_i32_0 = arith.constant 0 : i32
    %c0_i32_1 = arith.constant 0 : i32
    return %arg0, %arg1, %c0_i32, %c0_i32_0 : i32, i32, i32, i32
  }
  func.func @transform_1(%arg0: i32, %arg1: i32) -> (i32, i32, i32, i32) {
    %c0_i32 = arith.constant 0 : i32
    %c0_i32_0 = arith.constant 0 : i32
    %c0_i32_1 = arith.constant 0 : i32
    return %arg0, %arg1, %c0_i32, %c0_i32_0 : i32, i32, i32, i32
  }
  func.func @transform_2(%arg0: i32, %arg1: i32) -> (i32, i32, i32, i32) {
    %c0_i32 = arith.constant 0 : i32
    %c0_i32_0 = arith.constant 0 : i32
    %c0_i32_1 = arith.constant 0 : i32
    return %arg0, %arg1, %c0_i32, %c0_i32_0 : i32, i32, i32, i32
  }
  func.func @transform_3(%arg0: i32, %arg1: i32) -> (i32, i32, i32) {
    %c0_i32 = arith.constant 0 : i32
    %c0_i32_0 = arith.constant 0 : i32
    %c0_i32_1 = arith.constant 0 : i32
    return %arg0, %c0_i32, %c0_i32_0 : i32, i32, i32
  }
  func.func @transform_4(%arg0: i32, %arg1: i32) -> (i32, i32) {
    %c0_i32 = arith.constant 0 : i32
    %c0_i32_0 = arith.constant 0 : i32
    %c0_i32_1 = arith.constant 0 : i32
    return %c0_i32, %c0_i32_0 : i32, i32
  }
  func.func @transform_5(%arg0: i32, %arg1: i32) -> (i32, i32) {
    %c0_i32 = arith.constant 0 : i32
    %c0_i32_0 = arith.constant 0 : i32
    %c0_i32_1 = arith.constant 0 : i32
    return %c0_i32, %c0_i32_0 : i32, i32
  }
  func.func @transform_6(%arg0: i32, %arg1: i32) -> (i32, i32) {
    %c0_i32 = arith.constant 0 : i32
    %c0_i32_0 = arith.constant 0 : i32
    %c0_i32_1 = arith.constant 0 : i32
    return %c0_i32, %c0_i32_0 : i32, i32
  }
  func.func @transform_7(%arg0: i32, %arg1: i32) -> (i32, i32) {
    %c0_i32 = arith.constant 0 : i32
    %c0_i32_0 = arith.constant 0 : i32
    %c0_i32_1 = arith.constant 0 : i32
    return %c0_i32, %c0_i32_0 : i32, i32
  }
  func.func @transform_8(%arg0: i32, %arg1: i32) -> (i32, i32) {
    %c0_i32 = arith.constant 0 : i32
    %c0_i32_0 = arith.constant 0 : i32
    %c0_i32_1 = arith.constant 0 : i32
    return %c0_i32, %c0_i32_0 : i32, i32
  }
  func.func @transform_9(%arg0: i32, %arg1: i32) -> (i32, i32) {
    %c0_i32 = arith.constant 0 : i32
    %c0_i32_0 = arith.constant 0 : i32
    %c0_i32_1 = arith.constant 0 : i32
    return %c0_i32, %c0_i32_0 : i32, i32
  }
  func.func @transform_10(%arg0: i32, %arg1: i32) -> (i32, i32) {
    %c0_i32 = arith.constant 0 : i32
    %c0_i32_0 = arith.constant 0 : i32
    %c0_i32_1 = arith.constant 0 : i32
    return %c0_i32, %c0_i32_0 : i32, i32
  }
  func.func @transform_11(%arg0: i32, %arg1: i32) -> (i32, i32) {
    %c0_i32 = arith.constant 0 : i32
    %c0_i32_0 = arith.constant 0 : i32
    %c0_i32_1 = arith.constant 0 : i32
    return %c0_i32, %c0_i32_0 : i32, i32
  }
  func.func @transform_12(%arg0: i32, %arg1: i32) -> (i32, i32, i32, i32) {
    %c0_i32 = arith.constant 0 : i32
    %c0_i32_0 = arith.constant 0 : i32
    %c0_i32_1 = arith.constant 0 : i32
    return %arg0, %arg1, %c0_i32, %c0_i32_0 : i32, i32, i32, i32
  }
}

</mosaic_0001>

<bundles_post_ra>
// kernel: tpu_custom_call.1
= control target key start
LH: loop header
LB: loop body
LE: loop exit
PB: predicated region body
PF: predicated region fallthrough
CT: control target
= control target key end

     0   :  { %s9150_s0 = inlined_call_operand.hbm [shape: f32[2,16,8,96], index: 0, kind: input, shape index: {}]   ;;  %s9151_s1 = inlined_call_operand.hbm [shape: f32[2,16,8,96], index: 1, kind: input, shape index: {}]   ;;  %s9152_s2 = inlined_call_operand.hbm [shape: f32[2,16,8,32], index: 2, kind: input, shape index: {}]   ;;  %s9153_s3 = inlined_call_operand.vmem [shape: f32[2,8,8], index: 3, kind: input, shape index: {}]   ;;  %s9154_s4 = inlined_call_operand.vmem [shape: f32[96,32], index: 4, kind: input, shape index: {}]   ;;  %s9155_s5 = inlined_call_operand.vmem [shape: f32[1,32], index: 5, kind: input, shape index: {}]   ;;  %s9156_s6 = inlined_call_operand.vmem [shape: f32[96,32], index: 6, kind: input, shape index: {}]   ;;  %s9157_s7 = inlined_call_operand.vmem [shape: f32[1,32], index: 7, kind: input, shape index: {}]   ;;  %s9158_s8 = inlined_call_operand.vmem [shape: f32[32,32], index: 8, kind: input, shape index: {}]   ;;  %s9159_s9 = inlined_call_operand.vmem [shape: f32[1,32], index: 9, kind: input, shape index: {}]   ;;  %s9160_s10 = inlined_call_operand.vmem [shape: f32[32,32], index: 10, kind: input, shape index: {}]   ;;  %s9161_s11 = inlined_call_operand.vmem [shape: f32[1,32], index: 11, kind: input, shape index: {}]   ;;  %s9162_s12 = inlined_call_operand.hbm [shape: f32[2,16,8,32], index: 12, kind: output, shape index: {}]  }
   0x1   :  { %9223 = sst [smem:[#allocation84_spill]] %s9151_s1 }
   0x2   :  { %9224 = sst [smem:[#allocation85_spill]] %s9153_s3 }
   0x3   :  { %9225 = sst [smem:[#allocation86_spill]] %s9159_s9 }
   0x4   :  { %9226 = sst [smem:[#allocation87_spill]] %s9160_s10 }
   0x5   :  { %9227 = sst [smem:[#allocation88_spill]] %s9161_s11 }
   0x6   :  { %9228 = sst [smem:[#allocation89_spill]] %s9162_s12 }
   0x7   :  { %17 = vsyncpa [#allocation3], 0 }
   0x8   :  { %19 = vsyncpa [#allocation3 + $0x1], 0 }
   0x9   :  { %20 = vsyncpa [#allocation6], 0 }
   0xa   :  { %22 = vsyncpa [#allocation6 + $0x1], 0 }
   0xb   :  { %23 = vsyncpa [#allocation4], 0 }
   0xc   :  { %25 = vsyncpa [#allocation4 + $0x1], 0  ;;  %s6789_s21 = smov 0   ;;  %s6791_s22 = smov 0  }
   0xd   :  { %s6793_s23 = smov 0   ;;  %s6795_s24 = smov 0  }
   0xe   :  { %s6797_s25 = smov 0   ;;  %s6799_s26 = smov 0  }
   0xf LB: > { %9229 = sst [smem:[#allocation12_spill]] %s6693_s21  ;;  %s6820_s27 = sadd.s32 4294967295, %s6713_s26   ;;  %s6713_s26 = sphi %s6799_s26, %s31_s26   ;;  %s6709_s25 = sphi %s6797_s25, %s9476_s25   ;;  %s6705_s24 = sphi %s6795_s24, %s9475_s24   ;;  %s6701_s23 = sphi %s6793_s23, %s9474_s23   ;;  %s6697_s22 = sphi %s6791_s22, %s9478_s22   ;;  %s6693_s21 = sphi %s6789_s21, %s9477_s21  }
  0x10   : > { %9230 = sst [smem:[#allocation13_spill]] %s6701_s23  ;;  %s5763_s28 = sadd.s32 4294967294, %s6713_s26  }
  0x11   : > { %9231 = sst [smem:[#allocation14_spill]] %s6705_s24  ;;  %s43_s29 = sadd.s32 1, %s6709_s25 }
  0x12   : > { %9232 = sst [smem:[#allocation15_spill]] %s6709_s25  ;;  %s52_s30 = sadd.s32 1, %s6701_s23 }
  0x13   : > { %9233 = sst [smem:[#allocation16_spill]] %s6713_s26  ;;  %p45_p0 = scmp.ge.s32.totalorder %s43_s29, 2 }
  0x14   : > { %p59_p1 = scmp.ne.s32.totalorder %s6701_s23, %s6697_s22  ;;  %p60_p2 = scmp.eq.s32.totalorder %s6713_s26, 0 }
  0x15   : > { %p65_p3 = scmp.ne.s32.totalorder %s6697_s22, %s6693_s21  ;;  %s9480_s29 = smov (%p45_p0, %s43_s29), 0 }
  0x16   : > { %9234 = sst [smem:[#allocation17_spill]] %s9480_s29  ;;  %p6832_p4 = por %p60_p2, %p59_p1 }
  0x17   : > { %p66_p5 = scmp.eq.s32.totalorder %s6820_s27, 0  ;;  %s47_s14 = ssub.s32 %s6709_s25, %s9480_s29 }
  0x18   : > { %p341_p6 = scmp.eq.s32.totalorder %s6820_s27, 1  ;;  %p50_p7 = scmp.eq.s32.totalorder %s47_s14, 0 }
  0x19   : > { %p6840_p8 = por %p66_p5, %p65_p3  ;;  %p347_p10 = scmp.eq.s32.totalorder %s5763_s28, 1 }
  0x1a   : > { %p6844_p9 = por %p341_p6, %p59_p1  ;;  %p5765_p12 = scmp.ge.s32.totalorder %s6713_s26, 2 }
  0x1b   : > { %s6849_s17 = scalar_select %p50_p7, %s6701_s23, %s52_s30  }
  0x1c   : > { %s9237_s16 = scalar_select %p6844_p9, 1, 0 }
  0x1d   : > { %9239 = sst [smem:[#allocation19_spill]] %s6849_s17  ;;  %p6851_p11 = por %p347_p10, %p65_p3 }
  0x1e   : > { %9238 = sst [smem:[#allocation18_spill]] %s9237_s16  ;;  %p6096_p13 = scmp.lt.s32.totalorder %s6713_s26, 2 }
  0x1f   : > { %s9240_s18 = scalar_select %p6851_p11, 1, 0 }
  0x20   : > { %s391_s19 = sand.u32 1, %s6701_s23   ;;  %s6042_s14 = sshll.u32 %s6709_s25, 7 }
  0x21   : > { %9241 = sst [smem:[#allocation20_spill]] %s9240_s18  ;;  %s6858_s20 = sshll.u32 %s391_s19, 7 }
  0x22   : > { %p6863_p0 = pnand %p6096_p13, %p6832_p4  ;;  %s415_s28 = sand.u32 1, %s6713_s26  }
  0x23   : > { %s9243_s1 = sld [smem:[#allocation84_spill]]  ;;  %s419_s16 = scalar_lea.vmem [#allocation5], %s6858_s20 }
  0x24   : > { %s429_s23 = sshll.u32 %s419_s16, 4  ;;  %s416_s12 = scalar_lea.sflag [#allocation6], %s415_s28  ;;  %s430_s23 = int_to_ptr.vmem [resolvable:$true] %s429_s23 }
  0x25   : > { %s6715_s25 = smov 128   ;;  %s6716_s13 = smov 8  }
  0x26   : > { %p5775_p1 = scmp.ge.s32.totalorder %s6713_s26, 1  ;;  %p468_p2 = scmp.lt.s32.totalorder %s6713_s26, 3 }
  0x27   : > { %s402_s16 = scalar_lea.hbm %s9150_s0, %s6042_s14  ;;  %s392_s28 = scalar_lea.sflag [#allocation3], %s391_s19 }
  0x28   : > { %p6876_p3 = pnand %p5775_p1, %p468_p2  ;;  %s403_s30 = sshll.u32 %s402_s16, 4  ;;  %s404_s30 = int_to_ptr.hbm [resolvable:$true] %s403_s30 }
  0x29   : > { %s426_s18 = scalar_lea.hbm %s9243_s1, %s6042_s14  ;;  %s395_s1 = scalar_lea.vmem [#allocation2], %s6858_s20 }
  0x2a   : > { %s427_s21 = sshll.u32 %s426_s18, 4  ;;  %s405_s10 = sshll.u32 %s395_s1, 4  ;;  %s428_s21 = int_to_ptr.hbm [resolvable:$true] %s427_s21  ;;  %s406_s10 = int_to_ptr.vmem [resolvable:$true] %s405_s10 }
  0x2b   : > { %6088 = dma.hbm_to_vmem [thread:$0]  (!%p6863_p0), %s428_s21, 2048, %s430_s23, %s416_s12, %s6715_s25, %s6715_s25, %s6716_s13  }
  0x2c   : > { %6085 = dma.hbm_to_vmem [thread:$0]  (!%p6863_p0), %s404_s30, 2048, %s406_s10, %s392_s28, %s6715_s25, %s6715_s25, %s6716_s13  }
  0x2d   : > { %s450_s26 = scalar_lea.hbm %s9152_s2, %s6042_s14  ;;  %s443_s3 = scalar_lea.vmem [#allocation7], %s6858_s20 }
  0x2e   : > { %s451_s9 = sshll.u32 %s450_s26, 4  ;;  %s453_s24 = sshll.u32 %s443_s3, 4  ;;  %s452_s9 = int_to_ptr.hbm [resolvable:$true] %s451_s9  ;;  %s454_s24 = int_to_ptr.vmem [resolvable:$true] %s453_s24 }
  0x2f   : > { %6091 = dma.hbm_to_vmem [thread:$0]  (!%p6863_p0), %s452_s9, 2048, %s454_s24, %s416_s12, %s6715_s25, %s6715_s25, %s6716_s13  }
  0x30   : > { %472 = sbr.rel (%p6876_p3) target bundleno = 2735 (0xaaf), region = 68 }
  0x35   : > { %s6895_s1 = sand.u32 1, %s6697_s22  }
  0x36   : > { %s6898_s10 = sshll.u32 %s6895_s1, 7  ;;  %s475_s19 = scalar_lea.sflag [#allocation3], %s6895_s1 }
  0x37   : > { %s6902_s26 = scalar_lea.vmem [#allocation2], %s6898_s10 }
  0x38   : > { %6680 = dma.done.wait (%p6840_p8), %s475_s19, 2048  }
  0x39   : > { %6682 = vsyncadd (%p6840_p8), %s475_s19, 4294965248  ;;  %s484_s3 = sand.u32 1, %s6820_s27   ;;  %s6910_s11 = scalar_lea.vmem [#allocation5], %s6898_s10 }
  0x3a   : > { %s485_s9 = scalar_lea.sflag [#allocation6], %s484_s3 }
  0x3b   : > { %6684 = dma.done.wait (%p6840_p8), %s485_s9, 4096  }
  0x3c   : > { %6686 = vsyncadd (%p6840_p8), %s485_s9, 4294963200  ;;  %v621_v0 = vld [vmem:[%s9154_s4 + $0x58] sm:$0xff]  ;;  %v620_v1 = vld [vmem:[%s9154_s4 + $0x50] sm:$0xff]  ;;  %vm626_vm0 = vcmask 785408   ;;  %s6717_s16 = smov 120   ;;  %vm992_vm1 = vcmask 64512  }
  0x3d   : > { %679 = vmatpush.msra.mxu0 %v621_v0  ;;  %6046 = vmatpush.msra.mxu1 %v621_v0  ;;  %v619_v2 = vld [vmem:[%s9154_s4 + $0x48] sm:$0xff]  ;;  %v618_v3 = vld [vmem:[%s9154_s4 + $0x40] sm:$0xff]  ;;  %v617_v4 = vld [vmem:[%s9154_s4 + $0x38] sm:$0xff]  ;;  %s7242_s25 = scalar_lea.vmem [#allocation7], %s6898_s10  ;;  %vm877_vm2 = vcmask 261120   ;;  %s9267_s29 = sld [smem:[#allocation14_spill]] }
  0x3e   : > { %6047 = vmatpush.msra.mxu2 %v621_v0  ;;  %v616_v5 = vld [vmem:[%s9154_s4 + $0x30] sm:$0xff]  ;;  %v615_v6 = vld [vmem:[%s9154_s4 + $0x28] sm:$0xff]  ;;  %v614_v7 = vld [vmem:[%s9154_s4 + $0x20] sm:$0xff]  ;;  %s9272_s13 = sld [smem:[#allocation85_spill]]  ;;  %s6718_s28 = smov 112   ;;  %vm5425_vm3 = vcmask 130048  }
  0x3f   : > { %680 = vmatpush.msra.mxu0 %v620_v1  ;;  %6048 = vmatpush.msra.mxu1 %v620_v1  ;;  %v613_v8 = vld [vmem:[%s9154_s4 + $0x18] sm:$0xff]  ;;  %v612_v9 = vld [vmem:[%s9154_s4 + $0x10] sm:$0xff]  ;;  %v611_v10 = vld [vmem:[%s9154_s4 + $0x8] sm:$0xff]  ;;  %s9283_s30 = sld [smem:[#allocation86_spill]]  ;;  %s6721_s21 = smov 16   ;;  %vm5442_vm4 = vcmask 195584  }
  0x40   : > { %6049 = vmatpush.msra.mxu2 %v620_v1  ;;  %v610_v11 = vld [vmem:[%s9154_s4] sm:$0xff]  ;;  %v571_v13 = vld [vmem:[%s6902_s26 + $0x48] sm:$0xff]  ;;  %v751_v14 = vld [vmem:[%s9156_s6 + $0x58] sm:$0xff]  ;;  %s6722_s23 = smov 24   ;;  %s9443_s9 = sld [smem:[#allocation87_spill]] }
  0x41   : > { %681 = vmatpush.msra.mxu0 %v619_v2  ;;  %6050 = vmatpush.msra.mxu1 %v619_v2  ;;  %v562_v12 = vld [vmem:[%s6902_s26] sm:$0xff]  ;;  %v750_v15 = vld [vmem:[%s9156_s6 + $0x50] sm:$0xff]  ;;  %v749_v16 = vld [vmem:[%s9156_s6 + $0x48] sm:$0xff] }
  0x42   : > { %6051 = vmatpush.msra.mxu2 %v619_v2  ;;  %v748_v17 = vld [vmem:[%s9156_s6 + $0x40] sm:$0xff]  ;;  %v563_v18 = vld [vmem:[%s6902_s26 + $0x8] sm:$0xff]  ;;  %v572_v19 = vld [vmem:[%s6902_s26 + $0x50] sm:$0xff] }
  0x43   : > { %682 = vmatpush.msra.mxu0 %v618_v3  ;;  %6052 = vmatpush.msra.mxu1 %v618_v3  ;;  %v747_v20 = vld [vmem:[%s9156_s6 + $0x38] sm:$0xff]  ;;  %v746_v21 = vld [vmem:[%s9156_s6 + $0x30] sm:$0xff]  ;;  %v745_v22 = vld [vmem:[%s9156_s6 + $0x28] sm:$0xff]  ;;  %p557_p4 = scmp.lt.s32.totalorder %s9267_s29, 1 }
  0x44   : > { %6053 = vmatpush.msra.mxu2 %v618_v3  ;;  %v744_v23 = vld [vmem:[%s9156_s6 + $0x20] sm:$0xff]  ;;  %v564_v24 = vld [vmem:[%s6902_s26 + $0x10] sm:$0xff]  ;;  %v573_v25 = vld [vmem:[%s6902_s26 + $0x58] sm:$0xff] }
  0x45   : > { %683 = vmatpush.msra.mxu0 %v617_v4  ;;  %6054 = vmatpush.msra.mxu1 %v617_v4  ;;  %v743_v26 = vld [vmem:[%s9156_s6 + $0x18] sm:$0xff]  ;;  %v742_v27 = vld [vmem:[%s9156_s6 + $0x10] sm:$0xff]  ;;  %v741_v29 = vld [vmem:[%s9156_s6 + $0x8] sm:$0xff]  ;;  %s558_s20 = scalar_select %p557_p4, %s9267_s29, 1 }
  0x46   : > { %6055 = vmatpush.msra.mxu2 %v617_v4  ;;  %v576_v28 = vld [vmem:[%s6902_s26 + $0x70] sm:$0xff]  ;;  %v740_v30 = vld [vmem:[%s9156_s6] sm:$0xff]  ;;  %v565_v31 = vld [vmem:[%s6902_s26 + $0x18] sm:$0xff] }
  0x47   : > { %684 = vmatpush.msra.mxu0 %v616_v5  ;;  %6056 = vmatpush.msra.mxu1 %v616_v5  ;;  %v574_v32 = vld [vmem:[%s6902_s26 + $0x60] sm:$0xff]  ;;  %v577_v33 = vld [vmem:[%s6902_s26 + $0x78] sm:$0xff]  ;;  %v575_v35 = vld [vmem:[%s6902_s26 + $0x68] sm:$0xff]  ;;  %s5780_s27 = sshll.u32 %s558_s20, 3 }
  0x48   : > { %6057 = vmatpush.msra.mxu2 %v616_v5  ;;  %v566_v34 = vld [vmem:[%s6902_s26 + $0x20] sm:$0xff]  ;;  %v567_v37 = vld [vmem:[%s6902_s26 + $0x28] sm:$0xff]  ;;  %v568_v39 = vld [vmem:[%s6902_s26 + $0x30] sm:$0xff]  ;;  %s7320_s17 = scalar_lea.vmem %s9272_s13, %s5780_s27 }
  0x49   : > { %685 = vmatpush.msra.mxu0 %v615_v6  ;;  %6058 = vmatpush.msra.mxu1 %v615_v6  ;;  %v578_v36 = vld [vmem:[%s6910_s11] sm:$0xff]  ;;  %v579_v38 = vld [vmem:[%s6910_s11 + $0x8] sm:$0xff]  ;;  %v580_v40 = vld [vmem:[%s6910_s11 + $0x10] sm:$0xff] }
  0x4a   : > { %6059 = vmatpush.msra.mxu2 %v615_v6  ;;  %v569_v41 = vld [vmem:[%s6902_s26 + $0x38] sm:$0xff]  ;;  %v570_v43 = vld [vmem:[%s6902_s26 + $0x40] sm:$0xff]  ;;  %v583_v45 = vld [vmem:[%s6910_s11 + $0x28] sm:$0xff]  ;;  %s8998_s26 = scalar_lea.vmem [#allocation8], %s6898_s10  ;;  %s6045_s10 = sshll.u32 %s9267_s29, 7 }
  0x4b   : > { %686 = vmatpush.msra.mxu0 %v614_v7  ;;  %6060 = vmatpush.msra.mxu1 %v614_v7  ;;  %v581_v42 = vld [vmem:[%s6910_s11 + $0x18] sm:$0xff]  ;;  %v582_v44 = vld [vmem:[%s6910_s11 + $0x20] sm:$0xff]  ;;  %v584_v46 = vld [vmem:[%s6910_s11 + $0x30] sm:$0xff]  ;;  %s5597_s29 = scalar_lea.sflag [#allocation4], %s6895_s1 }
  0x4c   : > { %6061 = vmatpush.msra.mxu2 %v614_v7  ;;  %v585_v47 = vld [vmem:[%s6910_s11 + $0x38] sm:$0xff]  ;;  %v586_v48 = vld [vmem:[%s6910_s11 + $0x40] sm:$0xff]  ;;  %v587_v49 = vld [vmem:[%s6910_s11 + $0x48] sm:$0xff] }
  0x4d   : > { %687 = vmatpush.msra.mxu0 %v613_v8  ;;  %6062 = vmatpush.msra.mxu1 %v613_v8  ;;  %v588_v50 = vld [vmem:[%s6910_s11 + $0x50] sm:$0xff]  ;;  %v7045_v51 = vld [vmem:[%s9155_s5] ss:$0 sm:$0xff]  ;;  %v589_v54 = vld [vmem:[%s6910_s11 + $0x58] sm:$0xff] }
  0x4e   : > { %6063 = vmatpush.msra.mxu2 %v613_v8  ;;  %v590_v59 = vld [vmem:[%s6910_s11 + $0x60] sm:$0xff]  ;;  %v591_v0 = vld [vmem:[%s6910_s11 + $0x68] sm:$0xff]  ;;  %v592_v5 = vld [vmem:[%s6910_s11 + $0x70] sm:$0xff] }
  0x4f   : > { %688 = vmatpush.msra.mxu0 %v612_v9  ;;  %6064 = vmatpush.msra.mxu1 %v612_v9 }
  0x50   : > { %6065 = vmatpush.msra.mxu2 %v612_v9 }
  0x51   : > { %689 = vmatpush.msra.mxu0 %v611_v10  ;;  %6066 = vmatpush.msra.mxu1 %v611_v10 }
  0x52   : > { %6067 = vmatpush.msra.mxu2 %v611_v10 }
  0x53   : > { %690 = vmatpush.msra.mxu0 %v610_v11  ;;  %6068 = vmatpush.msra.mxu1 %v610_v11 }
  0x54   : > { %5781 = vmatmul.msk.f32.vlgmr.msra.gmra.mxu0 %vm626_vm0, %v562_v12  ;;  %5790 = vmatmul.msk.f32.vlgmr.msra.gmra.mxu1 %vm626_vm0, %v571_v13 }
  0x55   : > { %808 = vmatpush.msrb.mxu1 %v751_v14  ;;  %6069 = vmatpush.msra.mxu2 %v610_v11  ;;  %v593_v11 = vld [vmem:[%s6910_s11 + $0x78] sm:$0xff]  ;;  %v7109_v14 = vld [vmem:[%s9157_s7] ss:$0 sm:$0xff]  ;;  %s6720_s11 = smov 8  }
  0x56   : > { %5795 = vmatmul.msk.f32.vlgmr.msra.gmra.mxu2 %vm626_vm0, %v576_v28 }
  0x57   : > { %809 = vmatpush.msrb.mxu1 %v750_v15 }
  0x59   : > { %810 = vmatpush.msrb.mxu1 %v749_v16 }
  0x5b   : > { %811 = vmatpush.msrb.mxu1 %v748_v17 }
  0x5c   : > { %5782 = vmatmul.msk.f32.gmra.mxu0 %vm626_vm0, %v563_v18  ;;  %5791 = vmatmul.msk.f32.gmra.mxu1 %vm626_vm0, %v572_v19 }
  0x5d   : > { %812 = vmatpush.msrb.mxu1 %v747_v20 }
  0x5e   : > { %5796 = vmatmul.msk.f32.gmra.mxu2 %vm626_vm0, %v577_v33 }
  0x5f   : > { %813 = vmatpush.msrb.mxu1 %v746_v21 }
  0x61   : > { %814 = vmatpush.msrb.mxu1 %v745_v22 }
  0x63   : > { %815 = vmatpush.msrb.mxu1 %v744_v23 }
  0x64   : > { %5783 = vmatmul.msk.f32.gmra.mxu0 %vm626_vm0, %v564_v24  ;;  %5792 = vmatmul.msk.f32.gmra.mxu1 %vm626_vm0, %v573_v25 }
  0x65   : > { %816 = vmatpush.msrb.mxu1 %v743_v26 }
  0x67   : > { %817 = vmatpush.msrb.mxu1 %v742_v27 }
  0x69   : > { %818 = vmatpush.msrb.mxu1 %v741_v29 }
  0x6b   : > { %819 = vmatpush.msrb.mxu1 %v740_v30 }
  0x6c   : > { %5784 = vmatmul.msk.f32.gmra.mxu0 %vm626_vm0, %v565_v31  ;;  %5793 = vmatmul.msk.f32.gmra.mxu1 %vm626_vm0, %v574_v32 }
  0x74   : > { %5785 = vmatmul.msk.f32.gmra.mxu0 %vm626_vm0, %v566_v34  ;;  %5794 = vmatmul.msk.f32.gmra.mxu1 %vm626_vm0, %v575_v35 }
  0x7c   : > { %5797 = vmatmul.msk.f32.vlgmr.msrb.gmra.mxu1 %vm626_vm0, %v578_v36  ;;  %5786 = vmatmul.msk.f32.gmra.mxu0 %vm626_vm0, %v567_v37 }
  0x84   : > { %5798 = vmatmul.msk.f32.gmra.mxu1 %vm626_vm0, %v579_v38  ;;  %5787 = vmatmul.msk.f32.gmra.mxu0 %vm626_vm0, %v568_v39 }
  0x8c   : > { %5799 = vmatmul.msk.f32.gmra.mxu1 %vm626_vm0, %v580_v40  ;;  %5788 = vmatmul.msk.f32.gmra.mxu0 %vm626_vm0, %v569_v41 }
  0x94   : > { %5800 = vmatmul.msk.f32.gmra.mxu1 %vm626_vm0, %v581_v42  ;;  %5789 = vmatmul.msk.f32.gmra.mxu0 %vm626_vm0, %v570_v43 }
  0x9c   : > { %5801 = vmatmul.msk.f32.gmra.mxu1 %vm626_vm0, %v582_v44  ;;  %v872_v44 = vld [vmem:[%s9158_s8 + $0x18] sm:$0xff] }
  0x9d   : > { %938 = vmatpush.msrb.mxu2 %v872_v44 }
  0xa4   : > { %5802 = vmatmul.msk.f32.gmra.mxu1 %vm626_vm0, %v583_v45  ;;  %v871_v45 = vld [vmem:[%s9158_s8 + $0x10] sm:$0xff] }
  0xa5   : > { %939 = vmatpush.msrb.mxu2 %v871_v45  ;;  %v604_v45 = vld [vmem:[%s7242_s25 + $0x50] sm:$0xff] }
  0xac   : > { %5803 = vmatmul.msk.f32.gmra.mxu1 %vm626_vm0, %v584_v46  ;;  %v870_v46 = vld [vmem:[%s9158_s8 + $0x8] sm:$0xff] }
  0xad   : > { %940 = vmatpush.msrb.mxu2 %v870_v46 }
  0xb4   : > { %5804 = vmatmul.msk.f32.gmra.mxu1 %vm626_vm0, %v585_v47 }
  0xbc   : > { %5805 = vmatmul.msk.f32.gmra.mxu1 %vm626_vm0, %v586_v48  ;;  %v869_v48 = vld [vmem:[%s9158_s8] sm:$0xff] }
  0xbd   : > { %941 = vmatpush.msrb.mxu2 %v869_v48 }
  0xc4   : > { %5806 = vmatmul.msk.f32.gmra.mxu1 %vm626_vm0, %v587_v49 }
  0xcc   : > { %5807 = vmatmul.msk.f32.gmra.mxu1 %vm626_vm0, %v588_v50  ;;  %v594_v50 = vld [vmem:[%s7242_s25] sm:$0xff] }
  0xcd   : > { %5813 = vmatmul.msk.f32.vlgmr.msrb.gmra.mxu2 %vm877_vm2, %v594_v50 }
  0xd1   : > { %v692_v52 = vpop.f32.mrf.mxu0  ;;  %v719_v53 = vpop.f32.mrf.mxu1 }
  0xd2   : > { %v7049_v55 = vadd.f32 %v7045_v51, %v692_v52  ;;  %v7052_v56 = vadd.f32 %v7045_v51, %v719_v53 }
  0xd4   : > { %9245 = vst [vmem:[#allocation21_spill] sm:$0xff] %v7052_v56  ;;  %5808 = vmatmul.msk.f32.gmra.mxu1 %vm626_vm0, %v589_v54  ;;  %2237 = vrot.lane.b32.xlu2 %v7052_v56, %s6717_s16  ;;  %v595_v54 = vld [vmem:[%s7242_s25 + $0x8] sm:$0xff] }
  0xd5   : > { %1985 = vrot.lane.b32.xlu1 %v7049_v55, %s6717_s16  ;;  %5814 = vmatmul.msk.f32.gmra.mxu2 %vm877_vm2, %v595_v54 }
  0xd9   : > { %v695_v57 = vpop.f32.mrf.mxu0  ;;  %v722_v58 = vpop.f32.mrf.mxu1 }
  0xda   : > { %v7061_v60 = vadd.f32 %v7045_v51, %v695_v57  ;;  %v7064_v61 = vadd.f32 %v7045_v51, %v722_v58  ;;  %v7078_v2 = vpop.f32.mrf.mxu2  ;;  %v596_v57 = vld [vmem:[%s7242_s25 + $0x10] sm:$0xff] }
  0xdc   : > { %9246 = vst [vmem:[#allocation22_spill] sm:$0xff] %v7064_v61  ;;  %5809 = vmatmul.msk.f32.gmra.mxu1 %vm626_vm0, %v590_v59  ;;  %2013 = vrot.lane.b32.xlu2 %v7061_v60, %s6717_s16 }
  0xdd   : > { %2265 = vrot.lane.b32.xlu1 %v7064_v61, %s6717_s16  ;;  %5815 = vmatmul.msk.f32.gmra.mxu2 %vm877_vm2, %v596_v57  ;;  %v605_v57 = vld [vmem:[%s7242_s25 + $0x58] sm:$0xff] }
  0xe1   : > { %v698_v62 = vpop.f32.mrf.mxu0  ;;  %v725_v63 = vpop.f32.mrf.mxu1 }
  0xe2   : > { %v7073_v1 = vadd.f32 %v7045_v51, %v698_v62  ;;  %v7082_v6 = vadd.f32 %v7045_v51, %v725_v63  ;;  %v737_v7 = vpop.f32.mrf.mxu2  ;;  %v597_v62 = vld [vmem:[%s7242_s25 + $0x18] sm:$0xff] }
  0xe3   : > { %v7094_v12 = vadd.f32 %v7045_v51, %v737_v7 }
  0xe4   : > { %9247 = vst [vmem:[#allocation23_spill] sm:$0xff] %v7073_v1  ;;  %5810 = vmatmul.msk.f32.gmra.mxu1 %vm626_vm0, %v591_v0  ;;  %2041 = vrot.lane.b32.xlu2 %v7073_v1, %s6717_s16 }
  0xe5   : > { %9248 = vst [vmem:[#allocation24_spill] sm:$0xff] %v7082_v6  ;;  %2405 = vrot.lane.b32.xlu1 %v7094_v12, %s6717_s16  ;;  %5816 = vmatmul.msk.f32.gmra.mxu2 %vm877_vm2, %v597_v62 }
  0xe6   : > { %9250 = vst [vmem:[#allocation26_spill] sm:$0xff] %v7094_v12 }
  0xe9   : > { %v701_v3 = vpop.f32.mrf.mxu0  ;;  %v728_v4 = vpop.f32.mrf.mxu1 }
  0xea   : > { %v7088_v8 = vadd.f32 %v7045_v51, %v701_v3  ;;  %v7115_v18 = vadd.f32 %v7045_v51, %v728_v4  ;;  %v598_v4 = vld [vmem:[%s7242_s25 + $0x20] sm:$0xff] }
  0xec   : > { %5811 = vmatmul.msk.f32.gmra.mxu1 %vm626_vm0, %v592_v5  ;;  %2293 = vrot.lane.b32.xlu2 %v7082_v6, %s6717_s16  ;;  %9249 = vst [vmem:[#allocation25_spill] sm:$0xff] %v7088_v8 }
  0xed   : > { %9252 = vst [vmem:[#allocation28_spill] sm:$0xff] %v7115_v18  ;;  %5817 = vmatmul.msk.f32.gmra.mxu2 %vm877_vm2, %v598_v4 }
  0xf1   : > { %v704_v9 = vpop.f32.mrf.mxu0  ;;  %v7090_v10 = vpop.f32.mrf.mxu1 }
  0xf2   : > { %v7097_v13 = vadd.f32 %v7045_v51, %v704_v9  ;;  %v7285_v3 = vadd.f32 %v7045_v51, %v7090_v10  ;;  %v7298_v9 = vadd.f32 %v7045_v51, %v7078_v2  ;;  %v599_v10 = vld [vmem:[%s7242_s25 + $0x28] sm:$0xff]  ;;  %v601_v2 = vld [vmem:[%s7242_s25 + $0x38] sm:$0xff] }
  0xf4   : > { %9251 = vst [vmem:[#allocation27_spill] sm:$0xff] %v7097_v13  ;;  %5812 = vmatmul.msk.f32.gmra.mxu1 %vm626_vm0, %v593_v11  ;;  %2097 = vrot.lane.b32.xlu0 %v7097_v13, %s6717_s16 }
  0xf5   : > { %2069 = vrot.lane.b32.xlu2 %v7088_v8, %s6717_s16  ;;  %9268 = vst [vmem:[#allocation43_spill] sm:$0xff] %v7285_v3  ;;  %5818 = vmatmul.msk.f32.gmra.mxu2 %vm877_vm2, %v599_v10 }
  0xf6   : > { %9270 = vst [vmem:[#allocation45_spill] sm:$0xff] %v7298_v9 }
  0xf9   : > { %v821_v15 = vpop.f32.mrf.mxu1  ;;  %v707_v16 = vpop.f32.mrf.mxu0 }
  0xfa   : > { %v7112_v17 = vadd.f32 %v7109_v14, %v821_v15  ;;  %v7126_v19 = vadd.f32 %v7045_v51, %v707_v16  ;;  %v7324_v16 = vld [vmem:[%s7320_s17] sm:$0xff] }
  0xfb   : > { %9273 = vst [vmem:[#allocation47_spill] sm:$0xff] %v7324_v16 }
  0xfc   : > { %5829 = vmatpush.xpose.msk.msra.mxu3 %vm992_vm1, %v7112_v17  ;;  %1987 = vrot.lane.b32.xlu0 %v7112_v17, %s6717_s16  ;;  %9253 = vst [vmem:[#allocation29_spill] sm:$0xff] %v7126_v19 }
  0xfd   : > { %2321 = vrot.lane.b32.xlu2 %v7115_v18, %s6717_s16 }
  0xff   : > { %5830 = vmatmul.msk.f32.vlgmr.msra.gmra.mxu3 %vm992_vm1, %v7049_v55 }
 0x101   : > { %v824_v20 = vpop.f32.mrf.mxu1  ;;  %v710_v21 = vpop.f32.mrf.mxu0 }
 0x102   : > { %v7129_v22 = vadd.f32 %v7109_v14, %v824_v20  ;;  %v7149_v26 = vadd.f32 %v7045_v51, %v710_v21 }
 0x104   : > { %5831 = vmatpush.xpose.msk.msrb.mxu3 %vm992_vm1, %v7129_v22  ;;  %2125 = vrot.lane.b32.xlu0 %v7126_v19, %s6717_s16  ;;  %9254 = vst [vmem:[#allocation30_spill] sm:$0xff] %v7149_v26 }
 0x107   : > { %5832 = vmatmul.msk.f32.vlgmr.msrb.gmra.mxu3 %vm992_vm1, %v7061_v60 }
 0x109   : > { %v827_v23 = vpop.f32.mrf.mxu1  ;;  %v713_v24 = vpop.f32.mrf.mxu0 }
 0x10a   : > { %v7138_v25 = vadd.f32 %v7109_v14, %v827_v23  ;;  %v7168_v31 = vadd.f32 %v7045_v51, %v713_v24  ;;  %v602_v24 = vld [vmem:[%s7242_s25 + $0x40] sm:$0xff] }
 0x10c   : > { %2015 = vrot.lane.b32.xlu0 %v7129_v22, %s6717_s16  ;;  %2043 = vrot.lane.b32.xlu2 %v7138_v25, %s6717_s16  ;;  %9256 = vst [vmem:[#allocation32_spill] sm:$0xff] %v7168_v31 }
 0x10d   : > { %5833 = vmatpush.xpose.msk.msra.mxu3 %vm992_vm1, %v7138_v25 }
 0x110   : > { %5834 = vmatmul.msk.f32.vlgmr.msra.gmra.mxu3 %vm992_vm1, %v7073_v1 }
 0x111   : > { %v830_v27 = vpop.f32.mrf.mxu1  ;;  %v716_v28 = vpop.f32.mrf.mxu0 }
 0x112   : > { %v7152_v29 = vadd.f32 %v7109_v14, %v830_v27  ;;  %v7155_v30 = vadd.f32 %v7045_v51, %v716_v28  ;;  %v600_v51 = vld [vmem:[%s7242_s25 + $0x30] sm:$0xff] }
 0x113   : > { %5819 = vmatmul.msk.f32.gmra.mxu2 %vm877_vm2, %v600_v51 }
 0x114   : > { %9255 = vst [vmem:[#allocation31_spill] sm:$0xff] %v7155_v30  ;;  %2071 = vrot.lane.b32.xlu2 %v7152_v29, %s6717_s16  ;;  %5835 = vmatpush.xpose.msk.msrb.mxu3 %vm992_vm1, %v7152_v29 }
 0x115   : > { %2153 = vrot.lane.b32.xlu0 %v7149_v26, %s6717_s16  ;;  %2209 = vrot.lane.b32.xlu1 %v7155_v30, %s6717_s16 }
 0x118   : > { %5836 = vmatmul.msk.f32.vlgmr.msrb.gmra.mxu3 %vm992_vm1, %v7088_v8 }
 0x119   : > { %v833_v32 = vpop.f32.mrf.mxu1 }
 0x11a   : > { %v7171_v33 = vadd.f32 %v7109_v14, %v833_v32  ;;  %v603_v32 = vld [vmem:[%s7242_s25 + $0x48] sm:$0xff] }
 0x11b   : > { %5820 = vmatmul.msk.f32.gmra.mxu2 %vm877_vm2, %v601_v2 }
 0x11c   : > { %9257 = vst [vmem:[#allocation33_spill] sm:$0xff] %v7171_v33  ;;  %2099 = vrot.lane.b32.xlu2 %v7171_v33, %s6717_s16  ;;  %5837 = vmatpush.xpose.msk.msra.mxu3 %vm992_vm1, %v7171_v33 }
 0x11d   : > { %2181 = vrot.lane.b32.xlu0 %v7168_v31, %s6717_s16 }
 0x120   : > { %5838 = vmatmul.msk.f32.vlgmr.msra.gmra.mxu3 %vm992_vm1, %v7097_v13 }
 0x121   : > { %v836_v34 = vpop.f32.mrf.mxu1 }
 0x122   : > { %v7182_v35 = vadd.f32 %v7109_v14, %v836_v34 }
 0x123   : > { %5821 = vmatmul.msk.f32.gmra.mxu2 %vm877_vm2, %v602_v24 }
 0x124   : > { %9258 = vst [vmem:[#allocation34_spill] sm:$0xff] %v7182_v35  ;;  %2127 = vrot.lane.b32.xlu1 %v7182_v35, %s6717_s16  ;;  %5839 = vmatpush.xpose.msk.msrb.mxu3 %vm992_vm1, %v7182_v35 }
 0x128   : > { %5840 = vmatmul.msk.f32.vlgmr.msrb.gmra.mxu3 %vm992_vm1, %v7126_v19 }
 0x129   : > { %v839_v36 = vpop.f32.mrf.mxu1 }
 0x12a   : > { %v7191_v37 = vadd.f32 %v7109_v14, %v839_v36 }
 0x12b   : > { %5822 = vmatmul.msk.f32.gmra.mxu2 %vm877_vm2, %v603_v32 }
 0x12c   : > { %9259 = vst [vmem:[#allocation35_spill] sm:$0xff] %v7191_v37  ;;  %2155 = vrot.lane.b32.xlu0 %v7191_v37, %s6717_s16  ;;  %5841 = vmatpush.xpose.msk.msra.mxu3 %vm992_vm1, %v7191_v37 }
 0x12e   : > { %v7334_v28 = vpop.permute.xlu2 %2237 }
 0x12f   : > { %9274 = vst [vmem:[#allocation48_spill] sm:$0xff] %v7334_v28 }
 0x130   : > { %5842 = vmatmul.msk.f32.vlgmr.msra.gmra.mxu3 %vm992_vm1, %v7149_v26 }
 0x131   : > { %v842_v38 = vpop.f32.mrf.mxu1 }
 0x132   : > { %v7200_v39 = vadd.f32 %v7109_v14, %v842_v38 }
 0x133   : > { %5823 = vmatmul.msk.f32.gmra.mxu2 %vm877_vm2, %v604_v45 }
 0x134   : > { %9260 = vst [vmem:[#allocation36_spill] sm:$0xff] %v7200_v39  ;;  %2183 = vrot.lane.b32.xlu2 %v7200_v39, %s6717_s16  ;;  %5843 = vmatpush.xpose.msk.msrb.mxu3 %vm992_vm1, %v7200_v39 }
 0x136   : > { %v7347_v46 = vpop.permute.xlu2 %2013 }
 0x137   : > { %9275 = vst [vmem:[#allocation49_spill] sm:$0xff] %v7347_v46 }
 0x138   : > { %5844 = vmatmul.msk.f32.vlgmr.msrb.gmra.mxu3 %vm992_vm1, %v7168_v31 }
 0x139   : > { %v845_v40 = vpop.f32.mrf.mxu1 }
 0x13a   : > { %v7209_v41 = vadd.f32 %v7109_v14, %v845_v40 }
 0x13b   : > { %5824 = vmatmul.msk.f32.gmra.mxu2 %vm877_vm2, %v605_v57 }
 0x13c   : > { %9261 = vst [vmem:[#allocation37_spill] sm:$0xff] %v7209_v41  ;;  %2211 = vrot.lane.b32.xlu2 %v7209_v41, %s6717_s16  ;;  %5845 = vmatpush.xpose.msk.msra.mxu3 %vm992_vm1, %v7209_v41 }
 0x13e   : > { %v7359_v62 = vpop.permute.xlu2 %2041 }
 0x13f   : > { %9276 = vst [vmem:[#allocation50_spill] sm:$0xff] %v7359_v62 }
 0x140   : > { %5846 = vmatmul.msk.f32.vlgmr.msra.gmra.mxu3 %vm992_vm1, %v7155_v30 }
 0x141   : > { %v848_v42 = vpop.f32.mrf.mxu1 }
 0x142   : > { %v7218_v43 = vadd.f32 %v7109_v14, %v848_v42 }
 0x144   : > { %9262 = vst [vmem:[#allocation38_spill] sm:$0xff] %v7218_v43  ;;  %2239 = vrot.lane.b32.xlu2 %v7218_v43, %s6717_s16  ;;  %5847 = vmatpush.xpose.msk.msrb.mxu3 %vm992_vm1, %v7218_v43 }
 0x148   : > { %5848 = vmatmul.msk.f32.vlgmr.msrb.gmra.mxu3 %vm992_vm1, %v7052_v56 }
 0x149   : > { %v851_v47 = vpop.f32.mrf.mxu1 }
 0x14a   : > { %v7239_v49 = vadd.f32 %v7109_v14, %v851_v47 }
 0x14c   : > { %9263 = vst [vmem:[#allocation39_spill] sm:$0xff] %v7239_v49  ;;  %2267 = vrot.lane.b32.xlu0 %v7239_v49, %s6717_s16  ;;  %5849 = vmatpush.xpose.msk.msra.mxu3 %vm992_vm1, %v7239_v49 }
 0x150   : > { %5850 = vmatmul.msk.f32.vlgmr.msra.gmra.mxu3 %vm992_vm1, %v7064_v61 }
 0x151   : > { %v854_v52 = vpop.f32.mrf.mxu1 }
 0x152   : > { %v7253_v53 = vadd.f32 %v7109_v14, %v854_v52 }
 0x154   : > { %9264 = vst [vmem:[#allocation40_spill] sm:$0xff] %v7253_v53  ;;  %2295 = vrot.lane.b32.xlu0 %v7253_v53, %s6717_s16  ;;  %5851 = vmatpush.xpose.msk.msrb.mxu3 %vm992_vm1, %v7253_v53 }
 0x158   : > { %5852 = vmatmul.msk.f32.vlgmr.msrb.gmra.mxu3 %vm992_vm1, %v7082_v6 }
 0x159   : > { %v857_v58 = vpop.f32.mrf.mxu1 }
 0x15a   : > { %v7265_v59 = vadd.f32 %v7109_v14, %v857_v58 }
 0x15c   : > { %9265 = vst [vmem:[#allocation41_spill] sm:$0xff] %v7265_v59  ;;  %2323 = vrot.lane.b32.xlu2 %v7265_v59, %s6717_s16  ;;  %5853 = vmatpush.xpose.msk.msra.mxu3 %vm992_vm1, %v7265_v59 }
 0x160   : > { %5854 = vmatmul.msk.f32.vlgmr.msra.gmra.mxu3 %vm992_vm1, %v7115_v18 }
 0x161   : > { %v860_v63 = vpop.f32.mrf.mxu1 }
 0x162   : > { %v7276_v0 = vadd.f32 %v7109_v14, %v860_v63 }
 0x164   : > { %9266 = vst [vmem:[#allocation42_spill] sm:$0xff] %v7276_v0  ;;  %2351 = vrot.lane.b32.xlu2 %v7276_v0, %s6717_s16  ;;  %5855 = vmatpush.xpose.msk.msrb.mxu3 %vm992_vm1, %v7276_v0 }
 0x168   : > { %5856 = vmatmul.msk.f32.vlgmr.msrb.gmra.mxu3 %vm992_vm1, %v7285_v3 }
 0x169   : > { %v863_v5 = vpop.f32.mrf.mxu1 }
 0x16a   : > { %v7291_v7 = vadd.f32 %v7109_v14, %v863_v5  ;;  %v7364_v5 = vpop.permute.xlu0 %2097 }
 0x16b   : > { %9277 = vst [vmem:[#allocation51_spill] sm:$0xff] %v7364_v5 }
 0x16c   : > { %9269 = vst [vmem:[#allocation44_spill] sm:$0xff] %v7291_v7  ;;  %5857 = vmatpush.xpose.msk.msra.mxu3 %vm992_vm1, %v7291_v7 }
 0x170   : > { %5858 = vmatmul.msk.f32.vlgmr.msra.gmra.mxu3 %vm992_vm1, %v7298_v9 }
 0x171   : > { %v866_v11 = vpop.f32.mrf.mxu1 }
 0x172   : > { %v7304_v15 = vadd.f32 %v7109_v14, %v866_v11  ;;  %v606_v11 = vld [vmem:[%s7242_s25 + $0x60] sm:$0xff]  ;;  %v7377_v24 = vpop.permute.xlu0 %1987 }
 0x173   : > { %5825 = vmatmul.msk.f32.gmra.mxu2 %vm877_vm2, %v606_v11 }
 0x174   : > { %9271 = vst [vmem:[#allocation46_spill] sm:$0xff] %v7304_v15  ;;  %2407 = vrot.lane.b32.xlu1 %v7304_v15, %s6717_s16  ;;  %5859 = vmatpush.xpose.msk.msrb.mxu3 %vm992_vm1, %v7304_v15 }
 0x178   : > { %5860 = vmatmul.msk.f32.vlgmr.msrb.gmra.mxu3 %vm992_vm1, %v7094_v12 }
 0x182   : > { %v1016_v14 = vpop.f32.mrf.mxu3 }
 0x183   : > { %v1409_v20 = vmul.f32 0.35355338, %v1016_v14  ;;  %v7370_v14 = vpop.permute.xlu2 %2293 }
 0x184   : > { %9278 = vst [vmem:[#allocation52_spill] sm:$0xff] %v7370_v14 }
 0x185   : > { %v7328_v21 = vadd.f32 %v1409_v20, %v7324_v16 }
 0x187   : > { %v1441_v23 = vsel %vm992_vm1, %v7328_v21, -inf }
 0x188   : > { %1442 = vmax.xlane.f32.xlu0 %v1441_v23 }
 0x18a   : > { %v1042_v27 = vpop.f32.mrf.mxu3 }
 0x18b   : > { %v1410_v38 = vmul.f32 0.35355338, %v1042_v27 }
 0x18d   : > { %v7344_v44 = vadd.f32 %v1410_v38, %v7324_v16 }
 0x18f   : > { %v1444_v50 = vsel %vm992_vm1, %v7344_v44, -inf }
 0x193   : > { %v1068_v34 = vpop.f32.mrf.mxu3 }
 0x194   : > { %v1411_v36 = vmul.f32 0.35355338, %v1068_v34 }
 0x196   : > { %v7339_v40 = vadd.f32 %v1411_v36, %v7324_v16  ;;  %v7382_v36 = vpop.permute.xlu2 %2069 }
 0x197   : > { %9279 = vst [vmem:[#allocation53_spill] sm:$0xff] %v7382_v36 }
 0x198   : > { %v1447_v42 = vsel %vm992_vm1, %v7339_v40, -inf }
 0x199   : > { %1448 = vmax.xlane.f32.xlu0 %v1447_v42  ;;  %v7386_v42 = vpop.permute.xlu0 %2125 }
 0x19a   : > { %9280 = vst [vmem:[#allocation54_spill] sm:$0xff] %v7386_v42 }
 0x19b   : > { %v1094_v47 = vpop.f32.mrf.mxu3 }
 0x19c   : > { %v1412_v48 = vmul.f32 0.35355338, %v1094_v47 }
 0x19e   : > { %1445 = vmax.xlane.f32.xlu1 %v1444_v50  ;;  %v7353_v52 = vadd.f32 %v1412_v48, %v7324_v16 }
 0x1a0   : > { %v1450_v54 = vsel %vm992_vm1, %v7353_v52, -inf }
 0x1a1   : > { %1451 = vmax.xlane.f32.xlu2 %v1450_v54  ;;  %v7393_v54 = vpop.permute.xlu2 %2321 }
 0x1a2   : > { %9281 = vst [vmem:[#allocation55_spill] sm:$0xff] %v7393_v54 }
 0x1a3   : > { %v1120_v58 = vpop.f32.mrf.mxu3 }
 0x1a4   : > { %v1413_v63 = vmul.f32 0.35355338, %v1120_v58 }
 0x1a6   : > { %v7362_v4 = vadd.f32 %v1413_v63, %v7324_v16  ;;  %v7395_v63 = vpop.permute.xlu0 %2015 }
 0x1a7   : > { %9282 = vst [vmem:[#allocation56_spill] sm:$0xff] %v7395_v63 }
 0x1a8   : > { %v1453_v10 = vsel %vm992_vm1, %v7362_v4, -inf }
 0x1a9   : > { %1454 = vmax.xlane.f32.xlu1 %v1453_v10 }
 0x1ab   : > { %v1146_v51 = vpop.f32.mrf.mxu3 }
 0x1ac   : > { %v1414_v2 = vmul.f32 0.35355338, %v1146_v51  ;;  %v7402_v51 = vpop.permute.xlu2 %2043 }
 0x1ae   : > { %v7373_v20 = vadd.f32 %v1414_v2, %v7324_v16 }
 0x1b0   : > { %v1456_v23 = vsel %vm992_vm1, %v7373_v20, -inf }
 0x1b1   : > { %1457 = vmax.xlane.f32.xlu2 %v1456_v23 }
 0x1b3   : > { %v1172_v27 = vpop.f32.mrf.mxu3 }
 0x1b4   : > { %v1415_v32 = vmul.f32 0.35355338, %v1172_v27  ;;  %v7407_v27 = vld [vmem:[%s9283_s30] ss:$0 sm:$0xff] }
 0x1b6   : > { %v7380_v34 = vadd.f32 %v1415_v32, %v7324_v16  ;;  %v7409_v32 = vpop.permute.xlu0 %2153 }
 0x1b7   : > { %9284 = vst [vmem:[#allocation57_spill] sm:$0xff] %v7409_v32 }
 0x1b8   : > { %v1459_v38 = vsel %vm992_vm1, %v7380_v34, -inf }
 0x1b9   : > { %1460 = vmax.xlane.f32.xlu2 %v1459_v38 }
 0x1bb   : > { %v1198_v45 = vpop.f32.mrf.mxu3 }
 0x1bc   : > { %v1416_v47 = vmul.f32 0.35355338, %v1198_v45  ;;  %v943_v45 = vpop.f32.mrf.mxu2 }
 0x1be   : > { %v7389_v48 = vadd.f32 %v1416_v47, %v7324_v16  ;;  %v7415_v47 = vadd.f32 %v7407_v27, %v943_v45 }
 0x1c0   : > { %v1462_v50 = vsel %vm992_vm1, %v7389_v48, -inf  ;;  %9285 = vst [vmem:[#allocation58_spill] sm:$0xff] %v7415_v47  ;;  %1635 = vmatpush.msra.mxu3 %v7415_v47 }
 0x1c1   : > { %1463 = vmax.xlane.f32.xlu1 %v1462_v50 }
 0x1c3   : > { %v1224_v57 = vpop.f32.mrf.mxu3 }
 0x1c4   : > { %v1417_v58 = vmul.f32 0.35355338, %v1224_v57  ;;  %v946_v12 = vpop.f32.mrf.mxu2 }
 0x1c5   : > { %v7428_v0 = vadd.f32 %v7407_v27, %v946_v12 }
 0x1c6   : > { %v7398_v10 = vadd.f32 %v1417_v58, %v7324_v16  ;;  %v7420_v58 = vpop.permute.xlu2 %2071 }
 0x1c7   : > { %9286 = vst [vmem:[#allocation59_spill] sm:$0xff] %v7420_v58  ;;  %1658 = vmatpush.msra.mxu2 %v7428_v0 }
 0x1c8   : > { %v1465_v11 = vsel %vm992_vm1, %v7398_v10, -inf }
 0x1c9   : > { %1466 = vmax.xlane.f32.xlu2 %v1465_v11 }
 0x1cb   : > { %v1250_v2 = vpop.f32.mrf.mxu3 }
 0x1cc   : > { %v1418_v23 = vmul.f32 0.35355338, %v1250_v2  ;;  %v949_v56 = vpop.f32.mrf.mxu2 }
 0x1cd   : > { %v7443_v49 = vadd.f32 %v7407_v27, %v949_v56 }
 0x1ce   : > { %v7412_v38 = vadd.f32 %v1418_v23, %v7324_v16  ;;  %v7425_v23 = vpop.permute.xlu0 %2181 }
 0x1cf   : > { %9287 = vst [vmem:[#allocation60_spill] sm:$0xff] %v7425_v23  ;;  %1681 = vmatpush.msrb.mxu3 %v7443_v49 }
 0x1d0   : > { %v1468_v50 = vsel %vm992_vm1, %v7412_v38, -inf }
 0x1d1   : > { %1469 = vmax.xlane.f32.xlu0 %v1468_v50  ;;  %v7433_v50 = vpop.permute.xlu1 %1985 }
 0x1d2   : > { %9288 = vst [vmem:[#allocation61_spill] sm:$0xff] %v7433_v50 }
 0x1d3   : > { %v1276_v57 = vpop.f32.mrf.mxu3 }
 0x1d4   : > { %v1419_v11 = vmul.f32 0.35355338, %v1276_v57  ;;  %v7435_v57 = vpop.permute.xlu2 %2099  ;;  %v952_v36 = vpop.f32.mrf.mxu2 }
 0x1d5   : > { %9289 = vst [vmem:[#allocation62_spill] sm:$0xff] %v7435_v57  ;;  %v7456_v62 = vadd.f32 %v7407_v27, %v952_v36 }
 0x1d6   : > { %v7423_v2 = vadd.f32 %v1419_v11, %v7324_v16  ;;  %v7445_v14 = vpop.permute.xlu0 %2155 }
 0x1d7   : > { %9290 = vst [vmem:[#allocation63_spill] sm:$0xff] %v7445_v14  ;;  %1704 = vmatpush.msrb.mxu2 %v7456_v62 }
 0x1d8   : > { %v1471_v45 = vsel %vm992_vm1, %v7423_v2, -inf }
 0x1d9   : > { %1472 = vmax.xlane.f32.xlu0 %v1471_v45 }
 0x1db   : > { %v1302_v61 = vpop.f32.mrf.mxu3 }
 0x1dc   : > { %v1420_v15 = vmul.f32 0.35355338, %v1302_v61  ;;  %v7448_v61 = vpop.permute.xlu1 %2265  ;;  %v7450_v32 = vpop.permute.xlu2 %2183 }
 0x1dd   : > { %9291 = vst [vmem:[#allocation64_spill] sm:$0xff] %v7448_v61 }
 0x1de   : > { %v7438_v11 = vadd.f32 %v1420_v15, %v7324_v16  ;;  %9292 = vst [vmem:[#allocation65_spill] sm:$0xff] %v7450_v32  ;;  %v7460_v14 = vpop.permute.xlu0 %2267 }
 0x1df   : > { %9293 = vst [vmem:[#allocation66_spill] sm:$0xff] %v7460_v14 }
 0x1e0   : > { %v1474_v12 = vsel %vm992_vm1, %v7438_v11, -inf }
 0x1e1   : > { %1475 = vmax.xlane.f32.xlu0 %v1474_v12 }
 0x1e3   : > { %v1328_v45 = vpop.f32.mrf.mxu3 }
 0x1e4   : > { %v1421_v23 = vmul.f32 0.35355338, %v1328_v45  ;;  %v7463_v61 = vpop.permute.xlu1 %2405  ;;  %v7470_v43 = vpop.permute.xlu2 %2211 }
 0x1e5   : > { %9294 = vst [vmem:[#allocation67_spill] sm:$0xff] %v7463_v61 }
 0x1e6   : > { %v7453_v15 = vadd.f32 %v1421_v23, %v7324_v16  ;;  %v7468_v23 = vpop.f32.mrf.mxu2  ;;  %9295 = vst [vmem:[#allocation68_spill] sm:$0xff] %v7470_v43  ;;  %v7474_v19 = vpop.permute.xlu0 %2295 }
 0x1e7   : > { %9296 = vst [vmem:[#allocation69_spill] sm:$0xff] %v7474_v19 }
 0x1e8   : > { %v1477_v56 = vsel %vm992_vm1, %v7453_v15, -inf }
 0x1e9   : > { %1478 = vmax.xlane.f32.xlu0 %v1477_v56 }
 0x1eb   : > { %v1354_v12 = vpop.f32.mrf.mxu3 }
 0x1ec   : > { %v1422_v45 = vmul.f32 0.35355338, %v1354_v12  ;;  %v7479_v61 = vpop.permute.xlu1 %2209  ;;  %v7486_v28 = vpop.permute.xlu2 %2239 }
 0x1ed   : > { %9297 = vst [vmem:[#allocation70_spill] sm:$0xff] %v7479_v61 }
 0x1ee   : > { %v7466_v32 = vadd.f32 %v1422_v45, %v7324_v16  ;;  %v958_v12 = vpop.f32.mrf.mxu2  ;;  %9298 = vst [vmem:[#allocation71_spill] sm:$0xff] %v7486_v28 }
 0x1ef   : > { %v7484_v54 = vadd.f32 %v7407_v27, %v958_v12 }
 0x1f0   : > { %v1480_v36 = vsel %vm992_vm1, %v7466_v32, -inf }
 0x1f1   : > { %1481 = vmax.xlane.f32.xlu1 %v1480_v36  ;;  %1750 = vmatpush.msrb.mxu0 %v7484_v54 }
 0x1f3   : > { %v1380_v56 = vpop.f32.mrf.mxu3 }
 0x1f4   : > { %v1423_v14 = vmul.f32 0.35355338, %v1380_v56  ;;  %v7495_v12 = vpop.permute.xlu1 %2127  ;;  %v7500_v28 = vpop.permute.xlu2 %2323 }
 0x1f5   : > { %9299 = vst [vmem:[#allocation72_spill] sm:$0xff] %v7495_v12 }
 0x1f6   : > { %v7477_v35 = vadd.f32 %v1423_v14, %v7324_v16  ;;  %v961_v61 = vpop.f32.mrf.mxu2  ;;  %9300 = vst [vmem:[#allocation73_spill] sm:$0xff] %v7500_v28 }
 0x1f7   : > { %v7498_v8 = vadd.f32 %v7407_v27, %v961_v61 }
 0x1f8   : > { %v1483_v45 = vsel %vm992_vm1, %v7477_v35, -inf }
 0x1f9   : > { %1484 = vmax.xlane.f32.xlu0 %v1483_v45  ;;  %1773 = vmatpush.msra.mxu1 %v7498_v8 }
 0x1fb   : > { %v1406_v36 = vpop.f32.mrf.mxu3  ;;  %v1443_v39 = vpop.xlane.xlu0 %1442 }
 0x1fc   : > { %v1424_v56 = vmul.f32 0.35355338, %v1406_v36  ;;  %v1489_v14 = vsub.f32 %v7328_v21, %v1443_v39  ;;  %v7509_v36 = vpop.permute.xlu1 %2407 }
 0x1fd   : > { %9301 = vst [vmem:[#allocation74_spill] sm:$0xff] %v7509_v36 }
 0x1fe   : > { %v1505_v19 = vmul.f32 1.442695, %v1489_v14  ;;  %v7491_v42 = vadd.f32 %v1424_v56, %v7324_v16  ;;  %v7505_v21 = vpop.f32.mrf.mxu2  ;;  %v7511_v56 = vpop.permute.xlu2 %2351 }
 0x1ff   : > { %9302 = vst [vmem:[#allocation75_spill] sm:$0xff] %v7511_v56 }
 0x200   : > { %6279 = vpow2.f32 %v1505_v19  ;;  %v1486_v45 = vsel %vm992_vm1, %v7491_v42, -inf }
 0x201   : > { %1487 = vmax.xlane.f32.xlu1 %v1486_v45 }
 0x206   : > { %v7503_v39 = vpop.eup %6279  ;;  %v7514_v45 = vpop.f32.mrf.mxu2 }
 0x207   : > { %v1537_v19 = vsel %vm992_vm1, %v7503_v39, 0.0 }
 0x209   : > { %1538 = vadd.xlane.f32.xlu1 %v1537_v19 }
 0x20c   : > { %v1449_v14 = vpop.xlane.xlu0 %1448 }
 0x20d   : > { %v1491_v61 = vsub.f32 %v7339_v40, %v1449_v14 }
 0x20e   : > { %v970_v12 = vpop.f32.mrf.mxu2 }
 0x20f   : > { %v1509_v16 = vmul.f32 1.442695, %v1491_v61  ;;  %v609_v61 = vld [vmem:[%s7242_s25 + $0x78] sm:$0xff] }
 0x211   : > { %6281 = vpow2.f32 %v1509_v16  ;;  %v1446_v28 = vpop.xlane.xlu1 %1445  ;;  %v7523_v16 = vadd.f32 %v7407_v27, %v970_v12 }
 0x212   : > { %v1490_v5 = vsub.f32 %v7344_v44, %v1446_v28 }
 0x213   : > { %1842 = vmatpush.msra.mxu0 %v7523_v16 }
 0x214   : > { %v1507_v46 = vmul.f32 1.442695, %v1490_v5  ;;  %v1452_v59 = vpop.xlane.xlu2 %1451  ;;  %v608_v5 = vld [vmem:[%s7242_s25 + $0x70] sm:$0xff] }
 0x215   : > { %v1492_v43 = vsub.f32 %v7353_v52, %v1452_v59  ;;  %v607_v52 = vld [vmem:[%s7242_s25 + $0x68] sm:$0xff] }
 0x216   : > { %6283 = vpow2.f32 %v1507_v46  ;;  %v973_v44 = vpop.f32.mrf.mxu2  ;;  %5826 = vmatmul.msk.f32.gmra.mxu2 %vm877_vm2, %v607_v52 }
 0x217   : > { %v7518_v36 = vpop.eup %6281  ;;  %v1511_v19 = vmul.f32 1.442695, %v1492_v43  ;;  %v7535_v46 = vadd.f32 %v7407_v27, %v973_v44 }
 0x218   : > { %v1543_v56 = vsel %vm992_vm1, %v7518_v36, 0.0 }
 0x219   : > { %6285 = vpow2.f32 %v1511_v19  ;;  %1544 = vadd.xlane.f32.xlu2 %v1543_v56  ;;  %1865 = vmatpush.msrb.mxu1 %v7535_v46 }
 0x21c   : > { %v7526_v28 = vpop.eup %6283  ;;  %v1455_v14 = vpop.xlane.xlu1 %1454 }
 0x21d   : > { %v1540_v59 = vsel %vm992_vm1, %v7526_v28, 0.0  ;;  %v1493_v19 = vsub.f32 %v7362_v4, %v1455_v14 }
 0x21e   : > { %1541 = vadd.xlane.f32.xlu1 %v1540_v59  ;;  %5827 = vmatmul.msk.f32.gmra.mxu2 %vm877_vm2, %v608_v5 }
 0x21f   : > { %v7530_v40 = vpop.eup %6285 }
 0x220   : > { %v1546_v43 = vsel %vm992_vm1, %v7530_v40, 0.0 }
 0x221   : > { %1547 = vadd.xlane.f32.xlu0 %v1546_v43  ;;  %v1513_v43 = vmul.f32 1.442695, %v1493_v19 }
 0x223   : > { %6287 = vpow2.f32 %v1513_v43 }
 0x224   : > { %v1458_v12 = vpop.xlane.xlu2 %1457 }
 0x226   : > { %5828 = vmatmul.msk.f32.gmra.mxu2 %vm877_vm2, %v609_v61 }
 0x229   : > { %v7554_v61 = vpop.eup %6287 }
 0x22c   : > { %v1461_v59 = vpop.xlane.xlu2 %1460 }
 0x231   : > { %2379 = vrot.lane.b32.xlu2 %v7291_v7, %s6717_s16  ;;  %v1495_v7 = vsub.f32 %v7380_v34, %v1461_v59 }
 0x233   : > { %v1517_v5 = vmul.f32 1.442695, %v1495_v7 }
 0x234   : > { %v1464_v52 = vpop.xlane.xlu1 %1463 }
 0x235   : > { %2349 = vrot.lane.b32.xlu0 %v7285_v3, %s6717_s16  ;;  %v1494_v3 = vsub.f32 %v7373_v20, %v1458_v12  ;;  %6289 = vpow2.f32 %v1517_v5  ;;  %v1549_v20 = vsel %vm992_vm1, %v7554_v61, 0.0 }
 0x237   : > { %2377 = vrot.lane.b32.xlu1 %v7298_v9, %s6717_s16  ;;  %v1496_v9 = vsub.f32 %v7389_v48, %v1464_v52  ;;  %v1515_v58 = vmul.f32 1.442695, %v1494_v3 }
 0x239   : > { %v1519_v50 = vmul.f32 1.442695, %v1496_v9  ;;  %6291 = vpow2.f32 %v1515_v58 }
 0x23b   : > { %6293 = vpow2.f32 %v1519_v50  ;;  %v7560_v12 = vpop.eup %6289 }
 0x23c   : > { %v1467_v63 = vpop.xlane.xlu2 %1466  ;;  %v1555_v58 = vsel %vm992_vm1, %v7560_v12, 0.0 }
 0x23d   : > { %v1497_v34 = vsub.f32 %v7398_v10, %v1467_v63 }
 0x23f   : > { %v1521_v3 = vmul.f32 1.442695, %v1497_v34  ;;  %v7562_v48 = vpop.eup %6291 }
 0x240   : > { %v1552_v10 = vsel %vm992_vm1, %v7562_v48, 0.0 }
 0x241   : > { %v7564_v14 = vpop.eup %6293 }
 0x242   : > { %v1558_v50 = vsel %vm992_vm1, %v7564_v14, 0.0 }
 0x244   : > { %v1470_v56 = vpop.xlane.xlu0 %1469 }
 0x245   : > { %v1498_v63 = vsub.f32 %v7412_v38, %v1470_v56 }
 0x247   : > { %v1523_v59 = vmul.f32 1.442695, %v1498_v63 }
 0x24c   : > { %v1473_v44 = vpop.xlane.xlu0 %1472 }
 0x24d   : > { %v1499_v4 = vsub.f32 %v7423_v2, %v1473_v44 }
 0x24f   : > { %v1525_v7 = vmul.f32 1.442695, %v1499_v4 }
 0x251   : > { %6295 = vpow2.f32 %v1525_v7 }
 0x252   : > { %6297 = vpow2.f32 %v1521_v3 }
 0x254   : > { %v1476_v57 = vpop.xlane.xlu0 %1475 }
 0x255   : > { %v1500_v38 = vsub.f32 %v7438_v11, %v1476_v57 }
 0x257   : > { %v7574_v44 = vpop.eup %6295  ;;  %v1527_v34 = vmul.f32 1.442695, %v1500_v38 }
 0x258   : > { %v1567_v56 = vsel %vm992_vm1, %v7574_v44, 0.0 }
 0x25a   : > { %1550 = vadd.xlane.f32.xlu2 %v1549_v20 }
 0x25c   : > { %v1479_v9 = vpop.xlane.xlu0 %1478 }
 0x25d   : > { %v1501_v2 = vsub.f32 %v7453_v15, %v1479_v9  ;;  %v7577_v15 = vpop.eup %6297 }
 0x25e   : > { %v1561_v4 = vsel %vm992_vm1, %v7577_v15, 0.0 }
 0x25f   : > { %1556 = vadd.xlane.f32.xlu0 %v1555_v58  ;;  %v1529_v19 = vmul.f32 1.442695, %v1501_v2 }
 0x261   : > { %1553 = vadd.xlane.f32.xlu1 %v1552_v10  ;;  %6299 = vpow2.f32 %v1529_v19  ;;  %v7602_v10 = vadd.f32 %v7407_v27, %v7468_v23 }
 0x262   : > { %1559 = vadd.xlane.f32.xlu2 %v1558_v50  ;;  %6301 = vpow2.f32 %v1523_v59  ;;  %v976_v50 = vpop.f32.mrf.mxu2 }
 0x263   : > { %9303 = vst [vmem:[#allocation76_spill] sm:$0xff] %v7602_v10  ;;  %v7606_v59 = vpack.i.bf16 %v7602_v10, %v7415_v47 }
 0x264   : > { %v1482_v43 = vpop.xlane.xlu1 %1481 }
 0x265   : > { %v1502_v52 = vsub.f32 %v7466_v32, %v1482_v43 }
 0x267   : > { %v1531_v5 = vmul.f32 1.442695, %v1502_v52  ;;  %v7584_v20 = vpop.eup %6299  ;;  %v7613_v52 = vadd.f32 %v7407_v27, %v7514_v45 }
 0x268   : > { %v7586_v32 = vpop.eup %6301  ;;  %v1573_v11 = vsel %vm992_vm1, %v7584_v20, 0.0 }
 0x269   : > { %6303 = vpow2.f32 %v1531_v5  ;;  %1568 = vadd.xlane.f32.xlu1 %v1567_v56  ;;  %v1564_v3 = vsel %vm992_vm1, %v7586_v32, 0.0  ;;  %v6160_v23 = vpack.i.bf16 %v7456_v62, %v7613_v52 }
 0x26a   : > { %1562 = vadd.xlane.f32.xlu2 %v1561_v4  ;;  %6305 = vpow2.f32 %v1527_v34  ;;  %v979_v5 = vpop.f32.mrf.mxu2 }
 0x26b   : > { %v7621_v38 = vadd.f32 %v7407_v27, %v979_v5 }
 0x26c   : > { %v1485_v56 = vpop.xlane.xlu0 %1484 }
 0x26d   : > { %v6165_v45 = vpack.i.bf16 %v7428_v0, %v7621_v38 }
 0x26f   : > { %v7588_v7 = vpop.eup %6303 }
 0x270   : > { %v1576_v57 = vsel %vm992_vm1, %v7588_v7, 0.0  ;;  %v7596_v58 = vpop.eup %6305 }
 0x271   : > { %1577 = vadd.xlane.f32.xlu0 %v1576_v57  ;;  %1574 = vadd.xlane.f32.xlu1 %v1573_v11  ;;  %v1570_v2 = vsel %vm992_vm1, %v7596_v58, 0.0 }
 0x272   : > { %1565 = vadd.xlane.f32.xlu2 %v1564_v3 }
 0x274   : > { %v1488_v9 = vpop.xlane.xlu1 %1487 }
 0x275   : > { %v1504_v5 = vsub.f32 %v7491_v42, %v1488_v9 }
 0x27a   : > { %1571 = vadd.xlane.f32.xlu2 %v1570_v2 }
 0x27c   : > { %v1539_v63 = vpop.xlane.xlu1 %1538 }
 0x27d   : > { %6307 = vrcp.f32 %v1539_v63  ;;  %v7636_v63 = vadd.f32 %v7407_v27, %v7505_v21  ;;  %v7650_v21 = vadd.f32 %v7407_v27, %v976_v50 }
 0x283   : > { %v6308_v19 = vpop.eup %6307 }
 0x284   : > { %v1601_v43 = vmul.f32 %v6308_v19, %v7503_v39 }
 0x285   : > { %6156 = vrot.lane.b32.xlu0 %v7606_v59, %s6717_s16 }
 0x286   : > { %5861 = vmatmul.msk.f32.vlgmr.msra.gmra.mxu3 %vm992_vm1, %v1601_v43  ;;  %v1503_v43 = vsub.f32 %v7477_v35, %v1485_v56  ;;  %v1535_v35 = vmul.f32 1.442695, %v1504_v5 }
 0x287   : > { %1727 = vmatpush.msra.mxu3 %v7602_v10 }
 0x28a   : > { %6161 = vrot.lane.b32.xlu1 %v6160_v23, %s6717_s16  ;;  %v1533_v23 = vmul.f32 1.442695, %v1503_v43 }
 0x28c   : > { %v1545_v39 = vpop.xlane.xlu2 %1544 }
 0x28d   : > { %6309 = vrcp.f32 %v1545_v39  ;;  %3075 = vrot.lane.b32.xlu0 %v7112_v17, %s6718_s28 }
 0x291   : > { %v1542_v4 = vpop.xlane.xlu1 %1541 }
 0x292   : > { %6166 = vrot.lane.b32.xlu2 %v6165_v45, %s6717_s16  ;;  %6311 = vrcp.f32 %v1542_v4 }
 0x293   : > { %v6310_v34 = vpop.eup %6309 }
 0x294   : > { %v1603_v57 = vmul.f32 %v6310_v34, %v7518_v36  ;;  %v1548_v11 = vpop.xlane.xlu0 %1547  ;;  %v7643_v36 = vpack.i.bf16 %v7523_v16, %v7498_v8  ;;  %v7682_v39 = vpop.permute.xlu2 %2379 }
 0x295   : > { %3185 = vrot.lane.b32.xlu0 %v7097_v13, %s6718_s28  ;;  %6313 = vrcp.f32 %v1548_v11 }
 0x296   : > { %5863 = vmatmul.msk.f32.vlgmr.msrb.gmra.mxu3 %vm992_vm1, %v1603_v57  ;;  %9304 = vst [vmem:[#allocation77_spill] sm:$0xff] %v7643_v36  ;;  %6315 = vpow2.f32 %v1533_v23 }
 0x297   : > { %1819 = vmatpush.msrb.mxu3 %v7613_v52  ;;  %6317 = vpow2.f32 %v1535_v35 }
 0x298   : > { %v6312_v3 = vpop.eup %6311 }
 0x299   : > { %v1602_v2 = vmul.f32 %v6312_v3, %v7526_v28  ;;  %v982_v56 = vpop.f32.mrf.mxu2  ;;  %v6170_v3 = vpack.i.bf16 %v7443_v49, %v7636_v63 }
 0x29a   : > { %3073 = vrot.lane.b32.xlu2 %v7049_v55, %s6718_s28 }
 0x29b   : > { %5862 = vmatmul.msk.f32.vlgmr.msra.gmra.mxu2 %vm992_vm1, %v1602_v2  ;;  %v6314_v19 = vpop.eup %6313 }
 0x29c   : > { %1796 = vmatpush.msra.mxu2 %v7636_v63  ;;  %v1604_v28 = vmul.f32 %v6314_v19, %v7530_v40  ;;  %v7664_v40 = vpop.eup %6315 }
 0x29d   : > { %6181 = vrot.lane.b32.xlu0 %v7643_v36, %s6717_s16  ;;  %v1579_v50 = vsel %vm992_vm1, %v7664_v40, 0.0  ;;  %v7672_v42 = vpop.eup %6317 }
 0x29e   : > { %v1582_v9 = vsel %vm992_vm1, %v7672_v42, 0.0 }
 0x2a1   : > { %v985_v57 = vpop.f32.mrf.mxu2 }
 0x2a2   : > { %3297 = vrot.lane.b32.xlu2 %v7155_v30, %s6718_s28  ;;  %v7701_v5 = vadd.f32 %v7407_v27, %v985_v57 }
 0x2a3   : > { %5864 = vmatmul.msk.f32.vlgmr.msrb.gmra.mxu2 %vm992_vm1, %v1604_v28 }
 0x2a4   : > { %1888 = vmatpush.msrb.mxu2 %v7650_v21 }
 0x2a5   : > { %3299 = vrot.lane.b32.xlu0 %v7209_v41, %s6718_s28 }
 0x2a7   : > { %v7686_v45 = vpop.permute.xlu0 %2349 }
 0x2a9   : > { %v7690_v4 = vpop.permute.xlu1 %2377 }
 0x2aa   : > { %3159 = vrot.lane.b32.xlu2 %v7152_v29, %s6718_s28 }
 0x2ad   : > { %3409 = vrot.lane.b32.xlu0 %v7115_v18, %s6718_s28 }
 0x2b2   : > { %3103 = vrot.lane.b32.xlu2 %v7129_v22, %s6718_s28 }
 0x2b4   : > { %1580 = vadd.xlane.f32.xlu1 %v1579_v50 }
 0x2b5   : > { %3129 = vrot.lane.b32.xlu0 %v7073_v1, %s6718_s28 }
 0x2ba   : > { %3101 = vrot.lane.b32.xlu2 %v7061_v60, %s6718_s28 }
 0x2bc   : > { %1583 = vadd.xlane.f32.xlu1 %v1582_v9  ;;  %v6175_v9 = vpack.i.bf16 %v7650_v21, %v7484_v54 }
 0x2bd   : > { %3243 = vrot.lane.b32.xlu0 %v7191_v37, %s6718_s28 }
 0x2c2   : > { %3131 = vrot.lane.b32.xlu2 %v7138_v25, %s6718_s28 }
 0x2c5   : > { %3241 = vrot.lane.b32.xlu0 %v7149_v26, %s6718_s28 }
 0x2ca   : > { %3269 = vrot.lane.b32.xlu2 %v7168_v31, %s6718_s28 }
 0x2cd   : > { %v1551_v34 = vpop.xlane.xlu2 %1550 }
 0x2ce   : > { %6319 = vrcp.f32 %v1551_v34  ;;  %v988_v34 = vpop.f32.mrf.mxu2 }
 0x2d2   : > { %3383 = vrot.lane.b32.xlu2 %v7253_v53, %s6718_s28  ;;  %v1557_v11 = vpop.xlane.xlu0 %1556 }
 0x2d3   : > { %6321 = vrcp.f32 %v1557_v11 }
 0x2d4   : > { %v6320_v2 = vpop.eup %6319  ;;  %v1554_v19 = vpop.xlane.xlu1 %1553 }
 0x2d5   : > { %v1605_v28 = vmul.f32 %v6320_v2, %v7554_v61  ;;  %v1560_v43 = vpop.xlane.xlu2 %1559  ;;  %6323 = vrcp.f32 %v1554_v19  ;;  %6171 = vrot.lane.b32.xlu1 %v6170_v3, %s6717_s16  ;;  %v7707_v61 = vadd.f32 %v7407_v27, %v982_v56  ;;  %v7718_v56 = vadd.f32 %v7407_v27, %v988_v34 }
 0x2d6   : > { %6325 = vrcp.f32 %v1560_v43 }
 0x2d7   : > { %5865 = vmatmul.msk.f32.vlgmr.msra.gmra.mxu3 %vm992_vm1, %v1605_v28 }
 0x2d8   : > { %1911 = vmatpush.msra.mxu3 %v7621_v38 }
 0x2d9   : > { %v6322_v23 = vpop.eup %6321 }
 0x2da   : > { %v1607_v35 = vmul.f32 %v6322_v23, %v7560_v12  ;;  %3381 = vrot.lane.b32.xlu2 %v7082_v6, %s6718_s28 }
 0x2db   : > { %v6324_v50 = vpop.eup %6323 }
 0x2dc   : > { %v6326_v11 = vpop.eup %6325  ;;  %5867 = vmatmul.msk.f32.vlgmr.msra.gmra.mxu1 %vm992_vm1, %v1607_v35  ;;  %v1569_v3 = vpop.xlane.xlu1 %1568  ;;  %v1606_v57 = vmul.f32 %v6324_v50, %v7562_v48 }
 0x2dd   : > { %v1608_v2 = vmul.f32 %v6326_v11, %v7564_v14  ;;  %v1563_v12 = vpop.xlane.xlu2 %1562  ;;  %6327 = vrcp.f32 %v1569_v3  ;;  %6176 = vrot.lane.b32.xlu1 %v6175_v9, %s6717_s16  ;;  %1957 = vmatpush.msra.mxu1 %v7701_v5  ;;  %v6190_v11 = vpack.i.bf16 %v7701_v5, %v7707_v61 }
 0x2de   : > { %6329 = vrcp.f32 %v1563_v12  ;;  %5866 = vmatmul.msk.f32.vlgmr.msrb.gmra.mxu0 %vm992_vm1, %v1606_v57  ;;  %v9308_v12 = vld [vmem:[#allocation59_spill] sm:$0xff] }
 0x2df   : > { %5868 = vmatmul.msk.f32.vlgmr.msra.gmra.mxu2 %vm992_vm1, %v1608_v2  ;;  %1934 = vmatpush.msrb.mxu0 %v7707_v61  ;;  %v9307_v2 = vld [vmem:[#allocation61_spill] sm:$0xff] }
 0x2e0   : > { %1980 = vmatpush.msra.mxu2 %v7718_v56 }
 0x2e3   : > { %v6328_v48 = vpop.eup %6327 }
 0x2e4   : > { %v6330_v14 = vpop.eup %6329  ;;  %v1611_v19 = vmul.f32 %v6328_v48, %v7574_v44  ;;  %v1575_v28 = vpop.xlane.xlu1 %1574  ;;  %v6185_v44 = vpack.i.bf16 %v7535_v46, %v7718_v56  ;;  %v9309_v48 = vld [vmem:[#allocation72_spill] sm:$0xff] }
 0x2e5   : > { %v1609_v43 = vmul.f32 %v6330_v14, %v7577_v15  ;;  %v1566_v23 = vpop.xlane.xlu2 %1565  ;;  %3187 = vrot.lane.b32.xlu1 %v7171_v33, %s6718_s28  ;;  %v1578_v27 = vpop.xlane.xlu0 %1577  ;;  %v9310_v14 = vld [vmem:[#allocation68_spill] sm:$0xff] }
 0x2e6   : > { %6331 = vrcp.f32 %v1566_v23  ;;  %5871 = vmatmul.msk.f32.vlgmr.msrb.gmra.mxu1 %vm992_vm1, %v1611_v19  ;;  %v9313_v19 = vld [vmem:[#allocation51_spill] sm:$0xff] }
 0x2e7   : > { %6333 = vrcp.f32 %v1575_v28  ;;  %5869 = vmatmul.msk.f32.vlgmr.msrb.gmra.mxu3 %vm992_vm1, %v1609_v43  ;;  %5881 = vmatpush.xpose.msk.msrb.mxu1 %vm992_vm1, %v7402_v51  ;;  %v9306_v51 = vld [vmem:[#allocation62_spill] sm:$0xff]  ;;  %v9314_v28 = vld [vmem:[#allocation71_spill] sm:$0xff]  ;;  %v9315_v43 = vld [vmem:[#allocation73_spill] sm:$0xff] }
 0x2e8   : > { %5877 = vmatpush.xpose.msk.msrb.mxu3 %vm992_vm1, %v7377_v24  ;;  %6335 = vrcp.f32 %v1578_v27  ;;  %v9305_v24 = vld [vmem:[#allocation56_spill] sm:$0xff]  ;;  %v9316_v27 = vld [vmem:[#allocation25_spill] sm:$0xff] }
 0x2ec   : > { %v6332_v15 = vpop.eup %6331 }
 0x2ed   : > { %v6334_v35 = vpop.eup %6333  ;;  %v1610_v50 = vmul.f32 %v6332_v15, %v7586_v32  ;;  %v1572_v9 = vpop.xlane.xlu2 %1571  ;;  %6186 = vrot.lane.b32.xlu1 %v6185_v44, %s6717_s16  ;;  %v9317_v15 = vld [vmem:[#allocation54_spill] sm:$0xff] }
 0x2ee   : > { %v1613_v34 = vmul.f32 %v6334_v35, %v7584_v20  ;;  %6337 = vrcp.f32 %v1572_v9  ;;  %v6336_v32 = vpop.eup %6335  ;;  %v9318_v35 = vld [vmem:[#allocation70_spill] sm:$0xff] }
 0x2ef   : > { %5870 = vmatmul.msk.f32.vlgmr.msra.gmra.mxu0 %vm992_vm1, %v1610_v50  ;;  %v1614_v57 = vmul.f32 %v6336_v32, %v7588_v7  ;;  %v9311_v7 = vld [vmem:[#allocation41_spill] sm:$0xff]  ;;  %v9319_v50 = vld [vmem:[#allocation75_spill] sm:$0xff] }
 0x2f0   : > { %5873 = vmatmul.msk.f32.vlgmr.msra.gmra.mxu3 %vm992_vm1, %v1613_v34  ;;  %5879 = vmatpush.xpose.msk.msra.mxu0 %vm992_vm1, %v9305_v24  ;;  %v9320_v34 = vld [vmem:[#allocation36_spill] sm:$0xff]  ;;  %v9322_v32 = vld [vmem:[#allocation55_spill] sm:$0xff] }
 0x2f1   : > { %5885 = vmatpush.xpose.msk.msra.mxu3 %vm992_vm1, %v9306_v51 }
 0x2f4   : > { %v6338_v3 = vpop.eup %6337 }
 0x2f5   : > { %v1612_v20 = vmul.f32 %v6338_v3, %v7596_v58  ;;  %6191 = vrot.lane.b32.xlu1 %v6190_v11, %s6717_s16  ;;  %v9312_v58 = vld [vmem:[#allocation49_spill] sm:$0xff]  ;;  %v7777_v9 = vpop.permute.xlu2 %6166  ;;  %v9321_v11 = vld [vmem:[#allocation48_spill] sm:$0xff]  ;;  %v9323_v3 = vld [vmem:[#allocation34_spill] sm:$0xff]  ;;  %s6719_s16 = smov 104  }
 0x2f6   : > { %v6169_v24 = vunpack.i.h.bf16 %v7777_v9 }
 0x2f7   : > { %5872 = vmatmul.msk.f32.vlgmr.msrb.gmra.mxu2 %vm992_vm1, %v1612_v20  ;;  %5874 = vmatmul.msk.f32.vlgmr.msrb.gmra.mxu0 %vm992_vm1, %v1614_v57  ;;  %v6157_v23 = vpop.permute.xlu0 %6156  ;;  %v9324_v57 = vld [vmem:[#allocation29_spill] sm:$0xff] }
 0x2f8   : > { %5878 = vmatmul.msk.f32.vlgmr.msrb.gmra.mxu3 %vm992_vm1, %v9307_v2  ;;  %5883 = vmatpush.xpose.msk.msrb.mxu2 %vm992_vm1, %v9308_v12  ;;  %v6158_v44 = vunpack.i.l.bf16 %v6157_v23  ;;  %v6159_v51 = vunpack.i.h.bf16 %v6157_v23  ;;  %v9325_v2 = vld [vmem:[#allocation38_spill] sm:$0xff] }
 0x2f9   : > { %5887 = vmatpush.xpose.msk.msrb.mxu0 %vm992_vm1, %v9309_v48  ;;  %5893 = vmatpush.xpose.msk.msrb.mxu3 %vm992_vm1, %v9310_v14  ;;  %v9327_v23 = vld [vmem:[#allocation50_spill] sm:$0xff] }
 0x2fc   : > { %v7792_v20 = vpop.permute.xlu1 %6161 }
 0x2fd   : > { %3411 = vrot.lane.b32.xlu1 %v9311_v7, %s6718_s28 }
 0x2ff   : > { %5880 = vmatmul.msk.f32.vlgmr.msra.gmra.mxu0 %vm992_vm1, %v9312_v58 }
 0x300   : > { %5886 = vmatmul.msk.f32.vlgmr.msra.gmra.mxu3 %vm992_vm1, %v9313_v19  ;;  %5895 = vmatpush.xpose.msk.msra.mxu0 %vm992_vm1, %v9314_v28  ;;  %v9326_v19 = vld [vmem:[#allocation63_spill] sm:$0xff] }
 0x301   : > { %5901 = vmatpush.xpose.msk.msra.mxu3 %vm992_vm1, %v9315_v43  ;;  %v7801_v43 = vpop.permute.xlu0 %3075 }
 0x305   : > { %3157 = vrot.lane.b32.xlu1 %v9316_v27, %s6718_s28 }
 0x307   : > { %5888 = vmatmul.msk.f32.vlgmr.msrb.gmra.mxu0 %vm992_vm1, %v9317_v15  ;;  %v9330_v15 = vld [vmem:[#allocation53_spill] sm:$0xff] }
 0x308   : > { %5894 = vmatmul.msk.f32.vlgmr.msrb.gmra.mxu3 %vm992_vm1, %v9318_v35  ;;  %5903 = vmatpush.xpose.msk.msrb.mxu0 %vm992_vm1, %v9319_v50  ;;  %v9331_v35 = vld [vmem:[#allocation57_spill] sm:$0xff] }
 0x309   : > { %2663 = vmatpush.msrb.mxu3 %v6158_v44  ;;  %v9328_v44 = vld [vmem:[#allocation65_spill] sm:$0xff]  ;;  %v7818_v50 = vpop.permute.xlu0 %3185 }
 0x30a   : > { %9333 = vst [vmem:[#allocation56_spill] sm:$0xff] %v7818_v50 }
 0x30d   : > { %3271 = vrot.lane.b32.xlu1 %v9320_v34, %s6718_s28 }
 0x30f   : > { %5896 = vmatmul.msk.f32.vlgmr.msra.gmra.mxu0 %vm992_vm1, %v9321_v11  ;;  %v9334_v11 = vld [vmem:[#allocation60_spill] sm:$0xff] }
 0x310   : > { %5902 = vmatmul.msk.f32.vlgmr.msra.gmra.mxu3 %vm992_vm1, %v9322_v32  ;;  %2690 = vmatpush.msra.mxu0 %v6169_v24  ;;  %v9335_v32 = vld [vmem:[#allocation64_spill] sm:$0xff] }
 0x311   : > { %2771 = vmatpush.msra.mxu3 %v6159_v51 }
 0x315   : > { %3215 = vrot.lane.b32.xlu1 %v9323_v3, %s6718_s28 }
 0x317   : > { %5904 = vmatmul.msk.f32.vlgmr.msrb.gmra.mxu0 %vm992_vm1, %v7686_v45 }
 0x31d   : > { %3213 = vrot.lane.b32.xlu1 %v9324_v57, %s6718_s28 }
 0x325   : > { %3327 = vrot.lane.b32.xlu1 %v9325_v2, %s6718_s28  ;;  %v7917_v2 = vld [vmem:[%s7320_s17] sm:$0xff] }
 0x326   : > { %9359 = vst [vmem:[#allocation53_spill] sm:$0xff] %v7917_v2 }
 0x327   : > { %v1581_v12 = vpop.xlane.xlu1 %1580 }
 0x328   : > { %6339 = vrcp.f32 %v1581_v12  ;;  %v9336_v12 = vld [vmem:[#allocation74_spill] sm:$0xff] }
 0x32e   : > { %v6340_v48 = vpop.eup %6339 }
 0x32f   : > { %v1615_v14 = vmul.f32 %v6340_v48, %v7664_v40  ;;  %v1584_v58 = vpop.xlane.xlu1 %1583  ;;  %v9329_v40 = vld [vmem:[#allocation66_spill] sm:$0xff]  ;;  %v7826_v48 = vpop.permute.xlu0 %6181 }
 0x330   : > { %6341 = vrcp.f32 %v1584_v58  ;;  %v6183_v58 = vunpack.i.l.bf16 %v7826_v48 }
 0x331   : > { %5875 = vmatmul.msk.f32.vlgmr.msra.gmra.mxu1 %vm992_vm1, %v1615_v14 }
 0x332   : > { %5889 = vmatpush.xpose.msk.msra.mxu1 %vm992_vm1, %v9326_v19 }
 0x336   : > { %v6342_v45 = vpop.eup %6341 }
 0x337   : > { %v1616_v28 = vmul.f32 %v6342_v45, %v7672_v42  ;;  %v9332_v42 = vld [vmem:[#allocation69_spill] sm:$0xff]  ;;  %v9337_v45 = vld [vmem:[#allocation52_spill] sm:$0xff]  ;;  %v7935_v57 = vpop.permute.xlu0 %3299 }
 0x338   : > { %9362 = vst [vmem:[#allocation60_spill] sm:$0xff] %v7935_v57 }
 0x339   : > { %5876 = vmatmul.msk.f32.vlgmr.msra.gmra.mxu2 %vm992_vm1, %v1616_v28  ;;  %5882 = vmatmul.msk.f32.vlgmr.msrb.gmra.mxu1 %vm992_vm1, %v9327_v23  ;;  %v7837_v28 = vpop.f32.mrf.mxu3 }
 0x33a   : > { %5891 = vmatpush.xpose.msk.msra.mxu2 %vm992_vm1, %v9328_v44  ;;  %5897 = vmatpush.xpose.msk.msrb.mxu1 %vm992_vm1, %v9329_v40  ;;  %9338 = vst [vmem:[#allocation62_spill] sm:$0xff] %v7837_v28  ;;  %v9339_v44 = vld [vmem:[#allocation67_spill] sm:$0xff] }
 0x33f   : > { %v7951_v13 = vpop.permute.xlu0 %3409 }
 0x340   : > { %9365 = vst [vmem:[#allocation52_spill] sm:$0xff] %v7951_v13 }
 0x341   : > { %5884 = vmatmul.msk.f32.vlgmr.msrb.gmra.mxu2 %vm992_vm1, %v9330_v15  ;;  %5890 = vmatmul.msk.f32.vlgmr.msra.gmra.mxu1 %vm992_vm1, %v9331_v35  ;;  %v7841_v40 = vpop.f32.mrf.mxu3 }
 0x342   : > { %5899 = vmatpush.xpose.msk.msrb.mxu2 %vm992_vm1, %v9332_v42  ;;  %5905 = vmatpush.xpose.msk.msra.mxu1 %vm992_vm1, %v7682_v39  ;;  %v6164_v39 = vunpack.i.h.bf16 %v7792_v20  ;;  %9340 = vst [vmem:[#allocation61_spill] sm:$0xff] %v7841_v40 }
 0x347   : > { %v6172_v24 = vpop.permute.xlu1 %6171  ;;  %v7973_v13 = vpop.permute.xlu0 %3129 }
 0x348   : > { %v6174_v51 = vunpack.i.h.bf16 %v6172_v24  ;;  %v6173_v23 = vunpack.i.l.bf16 %v6172_v24 }
 0x349   : > { %5892 = vmatmul.msk.f32.vlgmr.msra.gmra.mxu2 %vm992_vm1, %v9334_v11  ;;  %5898 = vmatmul.msk.f32.vlgmr.msrb.gmra.mxu1 %vm992_vm1, %v9335_v32 }
 0x34a   : > { %5907 = vmatpush.xpose.msk.msra.mxu2 %vm992_vm1, %v9336_v12  ;;  %2717 = vmatpush.msrb.mxu1 %v6174_v51 }
 0x34f   : > { %v7828_v14 = vpop.permute.xlu1 %6176  ;;  %v7988_v50 = vpop.permute.xlu0 %3243 }
 0x350   : > { %v6178_v19 = vunpack.i.l.bf16 %v7828_v14 }
 0x351   : > { %5900 = vmatmul.msk.f32.vlgmr.msrb.gmra.mxu2 %vm992_vm1, %v9337_v45  ;;  %5906 = vmatmul.msk.f32.vlgmr.msra.gmra.mxu1 %vm992_vm1, %v7690_v4 }
 0x352   : > { %2744 = vmatpush.msrb.mxu2 %v6164_v39  ;;  %2825 = vmatpush.msra.mxu1 %v6183_v58  ;;  %v9347_v58 = vld [vmem:[#allocation47_spill] sm:$0xff] }
 0x353   : > { %2798 = vmatpush.msrb.mxu0 %v6178_v19 }
 0x357   : > { %v7994_v57 = vpop.permute.xlu0 %3241 }
 0x358   : > { %9371 = vst [vmem:[#allocation81_spill] sm:$0xff] %v7994_v57 }
 0x359   : > { %5908 = vmatmul.msk.f32.vlgmr.msra.gmra.mxu2 %vm992_vm1, %v9339_v44 }
 0x35a   : > { %2852 = vmatpush.msra.mxu2 %v6173_v23  ;;  %v7843_v15 = vpop.f32.mrf.mxu3 }
 0x35b   : > { %9341 = vst [vmem:[#allocation59_spill] sm:$0xff] %v7843_v15  ;;  %v7845_v35 = vpop.f32.mrf.mxu0 }
 0x35c   : > { %9342 = vst [vmem:[#allocation72_spill] sm:$0xff] %v7845_v35 }
 0x36a   : > { %v7847_v42 = vpop.f32.mrf.mxu3 }
 0x36b   : > { %9343 = vst [vmem:[#allocation68_spill] sm:$0xff] %v7847_v42 }
 0x36c   : > { %v7849_v51 = vpop.f32.mrf.mxu0 }
 0x36d   : > { %9344 = vst [vmem:[#allocation49_spill] sm:$0xff] %v7849_v51 }
 0x373   : > { %v7851_v4 = vpop.f32.mrf.mxu3 }
 0x374   : > { %9345 = vst [vmem:[#allocation51_spill] sm:$0xff] %v7851_v4  ;;  %v7853_v11 = vpop.f32.mrf.mxu0 }
 0x375   : > { %9346 = vst [vmem:[#allocation71_spill] sm:$0xff] %v7853_v11 }
 0x37b   : > { %v2010_v32 = vpop.f32.mrf.mxu3 }
 0x37c   : > { %v2433_v24 = vmul.f32 0.35355338, %v2010_v32  ;;  %v2038_v12 = vpop.f32.mrf.mxu0 }
 0x37d   : > { %v2434_v39 = vmul.f32 0.35355338, %v2038_v12 }
 0x37e   : > { %v7856_v19 = vadd.f32 %v2433_v24, %v9347_v58 }
 0x37f   : > { %v7859_v45 = vadd.f32 %v2434_v39, %v9347_v58 }
 0x380   : > { %v2465_v23 = vsel %vm992_vm1, %v7856_v19, -inf }
 0x381   : > { %2466 = vmax.xlane.f32.xlu0 %v2465_v23  ;;  %v2468_v44 = vsel %vm992_vm1, %v7859_v45, -inf }
 0x382   : > { %2469 = vmax.xlane.f32.xlu1 %v2468_v44 }
 0x383   : > { %v2122_v51 = vpop.f32.mrf.mxu3 }
 0x384   : > { %v2437_v42 = vmul.f32 0.35355338, %v2122_v51  ;;  %v2150_v11 = vpop.f32.mrf.mxu0 }
 0x385   : > { %v2438_v32 = vmul.f32 0.35355338, %v2150_v11 }
 0x386   : > { %v7866_v12 = vadd.f32 %v2437_v42, %v9347_v58 }
 0x387   : > { %v7869_v24 = vadd.f32 %v2438_v32, %v9347_v58 }
 0x388   : > { %v2477_v39 = vsel %vm992_vm1, %v7866_v12, -inf }
 0x389   : > { %2478 = vmax.xlane.f32.xlu2 %v2477_v39  ;;  %v2480_v23 = vsel %vm992_vm1, %v7869_v24, -inf }
 0x38a   : > { %2481 = vmax.xlane.f32.xlu1 %v2480_v23  ;;  %v7885_v23 = vpop.f32.mrf.mxu2 }
 0x38b   : > { %v2234_v4 = vpop.f32.mrf.mxu3  ;;  %9348 = vst [vmem:[#allocation73_spill] sm:$0xff] %v7885_v23 }
 0x38c   : > { %v2441_v44 = vmul.f32 0.35355338, %v2234_v4  ;;  %v2262_v35 = vpop.f32.mrf.mxu0  ;;  %v7887_v4 = vpop.permute.xlu1 %3187 }
 0x38d   : > { %v2442_v11 = vmul.f32 0.35355338, %v2262_v35  ;;  %9349 = vst [vmem:[#allocation25_spill] sm:$0xff] %v7887_v4  ;;  %v7892_v35 = vpop.f32.mrf.mxu1 }
 0x38e   : > { %v7876_v51 = vadd.f32 %v2441_v44, %v9347_v58  ;;  %9350 = vst [vmem:[#allocation54_spill] sm:$0xff] %v7892_v35 }
 0x38f   : > { %v7881_v32 = vadd.f32 %v2442_v11, %v9347_v58 }
 0x390   : > { %v2489_v42 = vsel %vm992_vm1, %v7876_v51, -inf }
 0x391   : > { %v2492_v28 = vsel %vm992_vm1, %v7881_v32, -inf }
 0x392   : > { %2490 = vmax.xlane.f32.xlu1 %v2489_v42  ;;  %v7896_v42 = vpop.permute.xlu2 %3073 }
 0x393   : > { %9351 = vst [vmem:[#allocation70_spill] sm:$0xff] %v7896_v42 }
 0x394   : > { %v2374_v40 = vpop.f32.mrf.mxu0  ;;  %v7902_v23 = vpop.permute.xlu1 %6186 }
 0x395   : > { %v2446_v39 = vmul.f32 0.35355338, %v2374_v40  ;;  %v7898_v40 = vpop.f32.mrf.mxu2  ;;  %v7900_v15 = vpop.f32.mrf.mxu1 }
 0x396   : > { %9352 = vst [vmem:[#allocation75_spill] sm:$0xff] %v7898_v40 }
 0x397   : > { %v7890_v44 = vadd.f32 %v2446_v39, %v9347_v58  ;;  %9353 = vst [vmem:[#allocation48_spill] sm:$0xff] %v7900_v15 }
 0x399   : > { %v2504_v11 = vsel %vm992_vm1, %v7890_v44, -inf }
 0x39a   : > { %2493 = vmax.xlane.f32.xlu1 %v2492_v28  ;;  %v7906_v36 = vpop.permute.xlu2 %3297 }
 0x39b   : > { %9355 = vst [vmem:[#allocation63_spill] sm:$0xff] %v7906_v36 }
 0x39c   : > { %v7910_v39 = vpop.permute.xlu1 %6191 }
 0x39d   : > { %v7904_v28 = vpop.f32.mrf.mxu2 }
 0x39e   : > { %9354 = vst [vmem:[#allocation55_spill] sm:$0xff] %v7904_v28 }
 0x3a2   : > { %2505 = vmax.xlane.f32.xlu1 %v2504_v11  ;;  %v7914_v10 = vpop.permute.xlu2 %3159 }
 0x3a3   : > { %9358 = vst [vmem:[#allocation66_spill] sm:$0xff] %v7914_v10  ;;  %v6184_v10 = vunpack.i.h.bf16 %v7826_v48 }
 0x3a4   : > { %v7922_v40 = vpop.permute.xlu1 %3411 }
 0x3a5   : > { %v7912_v35 = vpop.f32.mrf.mxu2  ;;  %9360 = vst [vmem:[#allocation57_spill] sm:$0xff] %v7922_v40 }
 0x3a6   : > { %9357 = vst [vmem:[#allocation65_spill] sm:$0xff] %v7912_v35  ;;  %v2346_v35 = vpop.f32.mrf.mxu3 }
 0x3a7   : > { %v2445_v3 = vmul.f32 0.35355338, %v2346_v35 }
 0x3aa   : > { %v7931_v26 = vpop.permute.xlu2 %3103 }
 0x3ac   : > { %v7937_v7 = vpop.permute.xlu1 %3157 }
 0x3ad   : > { %9363 = vst [vmem:[#allocation64_spill] sm:$0xff] %v7937_v7 }
 0x3ae   : > { %v7908_v58 = vpop.f32.mrf.mxu1 }
 0x3af   : > { %9356 = vst [vmem:[#allocation50_spill] sm:$0xff] %v7908_v58 }
 0x3b6   : > { %v2066_v47 = vpop.f32.mrf.mxu1 }
 0x3b7   : > { %v2435_v11 = vmul.f32 0.35355338, %v2066_v47 }
 0x3b9   : > { %v7920_v15 = vadd.f32 %v7917_v2, %v2435_v11 }
 0x3bb   : > { %v2471_v28 = vsel %vm992_vm1, %v7920_v15, -inf }
 0x3bc   : > { %2472 = vmax.xlane.f32.xlu2 %v2471_v28  ;;  %v7926_v58 = vpop.f32.mrf.mxu2 }
 0x3bd   : > { %9361 = vst [vmem:[#allocation69_spill] sm:$0xff] %v7926_v58 }
 0x3be   : > { %v2178_v37 = vpop.f32.mrf.mxu1 }
 0x3bf   : > { %v2439_v18 = vmul.f32 0.35355338, %v2178_v37 }
 0x3c1   : > { %v7929_v47 = vadd.f32 %v7917_v2, %v2439_v18  ;;  %v7943_v18 = vadd.f32 %v7917_v2, %v2445_v3 }
 0x3c3   : > { %v2483_v11 = vsel %vm992_vm1, %v7929_v47, -inf  ;;  %v2501_v6 = vsel %vm992_vm1, %v7943_v18, -inf }
 0x3c4   : > { %2484 = vmax.xlane.f32.xlu2 %v2483_v11  ;;  %v2094_v30 = vpop.f32.mrf.mxu2  ;;  %v7949_v11 = vpop.permute.xlu2 %3101 }
 0x3c5   : > { %v2436_v28 = vmul.f32 0.35355338, %v2094_v30  ;;  %9364 = vst [vmem:[#allocation74_spill] sm:$0xff] %v7949_v11 }
 0x3c6   : > { %v2290_v58 = vpop.f32.mrf.mxu1 }
 0x3c7   : > { %v7940_v37 = vadd.f32 %v7917_v2, %v2436_v28  ;;  %v2443_v53 = vmul.f32 0.35355338, %v2290_v58  ;;  %v7953_v28 = vpop.permute.xlu1 %3271 }
 0x3c8   : > { %9366 = vst [vmem:[#allocation67_spill] sm:$0xff] %v7953_v28 }
 0x3c9   : > { %v2474_v35 = vsel %vm992_vm1, %v7940_v37, -inf  ;;  %v7959_v1 = vadd.f32 %v7917_v2, %v2443_v53 }
 0x3ca   : > { %2475 = vmax.xlane.f32.xlu0 %v2474_v35 }
 0x3cc   : > { %2502 = vmax.xlane.f32.xlu2 %v2501_v6  ;;  %v2206_v41 = vpop.f32.mrf.mxu2  ;;  %v2495_v6 = vsel %vm992_vm1, %v7959_v1, -inf  ;;  %v7965_v34 = vpop.permute.xlu2 %3131 }
 0x3cd   : > { %v2440_v30 = vmul.f32 0.35355338, %v2206_v41 }
 0x3ce   : > { %v2402_v35 = vpop.f32.mrf.mxu1 }
 0x3cf   : > { %v7956_v3 = vadd.f32 %v7917_v2, %v2440_v30  ;;  %v2447_v33 = vmul.f32 0.35355338, %v2402_v35  ;;  %v7975_v36 = vpop.permute.xlu1 %3215 }
 0x3d0   : > { %9367 = vst [vmem:[#allocation47_spill] sm:$0xff] %v7975_v36 }
 0x3d1   : > { %v2486_v58 = vsel %vm992_vm1, %v7956_v3, -inf  ;;  %v7971_v53 = vadd.f32 %v7917_v2, %v2447_v33 }
 0x3d2   : > { %2487 = vmax.xlane.f32.xlu0 %v2486_v58 }
 0x3d3   : > { %v2507_v58 = vsel %vm992_vm1, %v7971_v53, -inf }
 0x3d4   : > { %2496 = vmax.xlane.f32.xlu2 %v2495_v6  ;;  %v2318_v41 = vpop.f32.mrf.mxu2  ;;  %v7984_v40 = vpop.permute.xlu2 %3269 }
 0x3d5   : > { %v2444_v31 = vmul.f32 0.35355338, %v2318_v41  ;;  %9368 = vst [vmem:[#allocation78_spill] sm:$0xff] %v7984_v40 }
 0x3d7   : > { %v7968_v30 = vadd.f32 %v7917_v2, %v2444_v31  ;;  %v7990_v11 = vpop.permute.xlu1 %3213 }
 0x3d8   : > { %9369 = vst [vmem:[#allocation79_spill] sm:$0xff] %v7990_v11 }
 0x3d9   : > { %v2498_v35 = vsel %vm992_vm1, %v7968_v30, -inf }
 0x3da   : > { %2499 = vmax.xlane.f32.xlu0 %v2498_v35 }
 0x3dc   : > { %2508 = vmax.xlane.f32.xlu2 %v2507_v58  ;;  %v2430_v6 = vpop.f32.mrf.mxu2  ;;  %v7992_v35 = vpop.permute.xlu2 %3383 }
 0x3dd   : > { %v2448_v41 = vmul.f32 0.35355338, %v2430_v6  ;;  %9370 = vst [vmem:[#allocation80_spill] sm:$0xff] %v7992_v35 }
 0x3df   : > { %v7982_v31 = vadd.f32 %v7917_v2, %v2448_v41  ;;  %v7996_v58 = vpop.permute.xlu1 %3327 }
 0x3e0   : > { %9372 = vst [vmem:[#allocation82_spill] sm:$0xff] %v7996_v58 }
 0x3e1   : > { %v2510_v33 = vsel %vm992_vm1, %v7982_v31, -inf }
 0x3e2   : > { %2511 = vmax.xlane.f32.xlu0 %v2510_v33 }
 0x3e4   : > { %v7998_v6 = vpop.permute.xlu2 %3381 }
 0x3e5   : > { %9373 = vst [vmem:[#allocation83_spill] sm:$0xff] %v7998_v6 }
 0x3f4   : > { %v2467_v41 = vpop.xlane.xlu0 %2466 }
 0x3f5   : > { %v2513_v2 = vsub.f32 %v7856_v19, %v2467_v41  ;;  %v2470_v40 = vpop.xlane.xlu1 %2469 }
 0x3f6   : > { %v2514_v36 = vsub.f32 %v7859_v45, %v2470_v40 }
 0x3f7   : > { %v2529_v7 = vmul.f32 1.442695, %v2513_v2 }
 0x3f8   : > { %v2531_v42 = vmul.f32 1.442695, %v2514_v36 }
 0x3f9   : > { %6343 = vpow2.f32 %v2529_v7 }
 0x3fa   : > { %6345 = vpow2.f32 %v2531_v42 }
 0x3fc   : > { %v2479_v33 = vpop.xlane.xlu2 %2478 }
 0x3fd   : > { %v2517_v11 = vsub.f32 %v7866_v12, %v2479_v33  ;;  %v2482_v35 = vpop.xlane.xlu1 %2481 }
 0x3fe   : > { %v2518_v28 = vsub.f32 %v7869_v24, %v2482_v35 }
 0x3ff   : > { %v8004_v4 = vpop.eup %6343  ;;  %v2537_v58 = vmul.f32 1.442695, %v2517_v11 }
 0x400   : > { %v8006_v6 = vpop.eup %6345  ;;  %v2539_v57 = vmul.f32 1.442695, %v2518_v28  ;;  %v2561_v19 = vsel %vm992_vm1, %v8004_v4, 0.0 }
 0x401   : > { %6347 = vpow2.f32 %v2537_v58  ;;  %2562 = vadd.xlane.f32.xlu0 %v2561_v19  ;;  %v2564_v36 = vsel %vm992_vm1, %v8006_v6, 0.0 }
 0x402   : > { %6349 = vpow2.f32 %v2539_v57  ;;  %2565 = vadd.xlane.f32.xlu2 %v2564_v36 }
 0x405   : > { %v2491_v7 = vpop.xlane.xlu1 %2490 }
 0x406   : > { %v2521_v2 = vsub.f32 %v7876_v51, %v2491_v7  ;;  %v9374_v51 = vld [vmem:[#allocation39_spill] sm:$0xff] }
 0x407   : > { %v8013_v45 = vpop.eup %6347 }
 0x408   : > { %v8015_v12 = vpop.eup %6349  ;;  %v2545_v24 = vmul.f32 1.442695, %v2521_v2  ;;  %v2573_v42 = vsel %vm992_vm1, %v8013_v45, 0.0 }
 0x409   : > { %2574 = vadd.xlane.f32.xlu1 %v2573_v42  ;;  %v2576_v40 = vsel %vm992_vm1, %v8015_v12, 0.0 }
 0x40a   : > { %6351 = vpow2.f32 %v2545_v24  ;;  %2577 = vadd.xlane.f32.xlu2 %v2576_v40 }
 0x40d   : > { %v2494_v41 = vpop.xlane.xlu1 %2493 }
 0x40e   : > { %v2522_v36 = vsub.f32 %v7881_v32, %v2494_v41 }
 0x410   : > { %v8021_v11 = vpop.eup %6351  ;;  %v2547_v42 = vmul.f32 1.442695, %v2522_v36 }
 0x411   : > { %v2585_v57 = vsel %vm992_vm1, %v8021_v11, 0.0 }
 0x412   : > { %2586 = vadd.xlane.f32.xlu2 %v2585_v57 }
 0x415   : > { %3355 = vrot.lane.b32.xlu0 %v9374_v51, %s6718_s28 }
 0x42f   : > { %v2473_v28 = vpop.xlane.xlu2 %2472 }
 0x430   : > { %v2515_v35 = vsub.f32 %v7920_v15, %v2473_v28 }
 0x432   : > { %v2533_v58 = vmul.f32 1.442695, %v2515_v35 }
 0x434   : > { %6353 = vpow2.f32 %v2533_v58 }
 0x437   : > { %v2485_v33 = vpop.xlane.xlu2 %2484 }
 0x438   : > { %v2519_v19 = vsub.f32 %v7929_v47, %v2485_v33 }
 0x43a   : > { %v8030_v7 = vpop.eup %6353  ;;  %v2541_v2 = vmul.f32 1.442695, %v2519_v19 }
 0x43b   : > { %v2567_v24 = vsel %vm992_vm1, %v8030_v7, 0.0 }
 0x43c   : > { %6355 = vpow2.f32 %v2541_v2  ;;  %2568 = vadd.xlane.f32.xlu1 %v2567_v24 }
 0x43d   : > { %v2476_v40 = vpop.xlane.xlu0 %2475  ;;  %6357 = vpow2.f32 %v2547_v42 }
 0x43e   : > { %v2516_v15 = vsub.f32 %v7940_v37, %v2476_v40 }
 0x43f   : > { %v2503_v57 = vpop.xlane.xlu2 %2502 }
 0x440   : > { %v2535_v28 = vmul.f32 1.442695, %v2516_v15 }
 0x442   : > { %v8035_v35 = vpop.eup %6355  ;;  %6359 = vpow2.f32 %v2535_v28 }
 0x443   : > { %v2579_v32 = vsel %vm992_vm1, %v8035_v35, 0.0  ;;  %v8039_v47 = vpop.eup %6357 }
 0x444   : > { %2580 = vadd.xlane.f32.xlu2 %v2579_v32  ;;  %v2588_v24 = vsel %vm992_vm1, %v8039_v47, 0.0 }
 0x445   : > { %v2488_v58 = vpop.xlane.xlu0 %2487 }
 0x446   : > { %v2520_v36 = vsub.f32 %v7956_v3, %v2488_v58 }
 0x447   : > { %v2497_v41 = vpop.xlane.xlu2 %2496 }
 0x448   : > { %v8041_v33 = vpop.eup %6359  ;;  %v2523_v19 = vsub.f32 %v7959_v1, %v2497_v41  ;;  %v2543_v42 = vmul.f32 1.442695, %v2520_v36 }
 0x449   : > { %v2570_v37 = vsel %vm992_vm1, %v8041_v33, 0.0 }
 0x44a   : > { %v2549_v2 = vmul.f32 1.442695, %v2523_v19  ;;  %2571 = vadd.xlane.f32.xlu1 %v2570_v37 }
 0x44c   : > { %6361 = vpow2.f32 %v2549_v2  ;;  %2589 = vadd.xlane.f32.xlu2 %v2588_v24  ;;  %v9376_v24 = vld [vmem:[#allocation46_spill] sm:$0xff] }
 0x44d   : > { %6363 = vpow2.f32 %v2543_v42  ;;  %v2500_v3 = vpop.xlane.xlu0 %2499 }
 0x44e   : > { %v2524_v41 = vsub.f32 %v7968_v30, %v2500_v3  ;;  %v2525_v3 = vsub.f32 %v7943_v18, %v2503_v57 }
 0x44f   : > { %v2509_v40 = vpop.xlane.xlu2 %2508 }
 0x450   : > { %v2527_v28 = vsub.f32 %v7971_v53, %v2509_v40  ;;  %v2551_v37 = vmul.f32 1.442695, %v2524_v41  ;;  %v9375_v53 = vld [vmem:[#allocation21_spill] sm:$0xff] }
 0x452   : > { %v8049_v15 = vpop.eup %6361  ;;  %v2557_v32 = vmul.f32 1.442695, %v2527_v28  ;;  %v2506_v28 = vpop.xlane.xlu1 %2505 }
 0x453   : > { %v2591_v1 = vsel %vm992_vm1, %v8049_v15, 0.0  ;;  %v8054_v58 = vpop.eup %6363 }
 0x454   : > { %2592 = vadd.xlane.f32.xlu0 %v2591_v1  ;;  %6365 = vpow2.f32 %v2557_v32  ;;  %v2582_v19 = vsel %vm992_vm1, %v8054_v58, 0.0 }
 0x455   : > { %6367 = vpow2.f32 %v2551_v37  ;;  %v2512_v40 = vpop.xlane.xlu0 %2511 }
 0x45a   : > { %v8059_v36 = vpop.eup %6365 }
 0x45b   : > { %v2603_v2 = vsel %vm992_vm1, %v8059_v36, 0.0  ;;  %v8067_v30 = vpop.eup %6367 }
 0x45c   : > { %2583 = vadd.xlane.f32.xlu0 %v2582_v19  ;;  %v2594_v42 = vsel %vm992_vm1, %v8067_v30, 0.0  ;;  %v2528_v19 = vsub.f32 %v7982_v31, %v2512_v40  ;;  %v2526_v31 = vsub.f32 %v7890_v44, %v2506_v28  ;;  %v9378_v44 = vld [vmem:[#allocation45_spill] sm:$0xff] }
 0x45e   : > { %v2559_v18 = vmul.f32 1.442695, %v2528_v19 }
 0x463   : > { %3325 = vrot.lane.b32.xlu1 %v9375_v53, %s6718_s28 }
 0x464   : > { %2604 = vadd.xlane.f32.xlu0 %v2603_v2  ;;  %3495 = vrot.lane.b32.xlu2 %v9376_v24, %s6718_s28  ;;  %v6163_v24 = vunpack.i.l.bf16 %v7792_v20 }
 0x46c   : > { %2595 = vadd.xlane.f32.xlu0 %v2594_v42 }
 0x474   : > { %v2563_v1 = vpop.xlane.xlu0 %2562 }
 0x475   : > { %6369 = vrcp.f32 %v2563_v1  ;;  %v2566_v32 = vpop.xlane.xlu2 %2565  ;;  %v2553_v1 = vmul.f32 1.442695, %v2525_v3  ;;  %v6205_v3 = vpack.i.bf16 %v7621_v38, %v7456_v62 }
 0x476   : > { %6371 = vrcp.f32 %v2566_v32 }
 0x47b   : > { %v6370_v41 = vpop.eup %6369 }
 0x47c   : > { %v6372_v37 = vpop.eup %6371  ;;  %v2625_v2 = vmul.f32 %v6370_v41, %v8004_v4  ;;  %v2575_v51 = vpop.xlane.xlu1 %2574  ;;  %v9377_v4 = vld [vmem:[#allocation22_spill] sm:$0xff] }
 0x47d   : > { %v2626_v53 = vmul.f32 %v6372_v37, %v8006_v6  ;;  %6373 = vrcp.f32 %v2575_v51  ;;  %v2578_v42 = vpop.xlane.xlu2 %2577  ;;  %v6168_v51 = vunpack.i.l.bf16 %v7777_v9  ;;  %v8114_v37 = vpack.i.bf16 %v7707_v61, %v7535_v46  ;;  %v9382_v46 = vld [vmem:[#allocation44_spill] sm:$0xff] }
 0x47e   : > { %5909 = vmatmul.msk.f32.vlgmr.msrb.gmra.mxu3 %vm992_vm1, %v2625_v2  ;;  %6375 = vrcp.f32 %v2578_v42  ;;  %v9380_v2 = vld [vmem:[#allocation26_spill] sm:$0xff] }
 0x47f   : > { %2879 = vmatpush.msrb.mxu3 %v6163_v24  ;;  %5910 = vmatmul.msk.f32.vlgmr.msra.gmra.mxu0 %vm992_vm1, %v2626_v53  ;;  %6377 = vpow2.f32 %v2553_v1  ;;  %v6193_v24 = vunpack.i.l.bf16 %v7910_v39 }
 0x480   : > { %2906 = vmatpush.msra.mxu0 %v6184_v10  ;;  %3353 = vrot.lane.b32.xlu0 %v9377_v4, %s6718_s28  ;;  %6379 = vpow2.f32 %v2559_v18  ;;  %v2555_v10 = vmul.f32 1.442695, %v2526_v31  ;;  %v6189_v18 = vunpack.i.h.bf16 %v7902_v23 }
 0x483   : > { %v6374_v20 = vpop.eup %6373 }
 0x484   : > { %v6376_v6 = vpop.eup %6375  ;;  %v2629_v48 = vmul.f32 %v6374_v20, %v8013_v45  ;;  %v6210_v20 = vpack.i.bf16 %v7484_v54, %v7443_v49 }
 0x485   : > { %v2630_v57 = vmul.f32 %v6376_v6, %v8015_v12  ;;  %v2587_v40 = vpop.xlane.xlu2 %2586  ;;  %v8088_v53 = vpop.eup %6377 }
 0x486   : > { %6381 = vrcp.f32 %v2587_v40  ;;  %5913 = vmatmul.msk.f32.vlgmr.msra.gmra.mxu3 %vm992_vm1, %v2629_v48  ;;  %v8092_v45 = vpop.eup %6379  ;;  %v2597_v28 = vsel %vm992_vm1, %v8088_v53, 0.0  ;;  %v6194_v48 = vunpack.i.h.bf16 %v7910_v39 }
 0x487   : > { %2987 = vmatpush.msra.mxu3 %v6168_v51  ;;  %5914 = vmatmul.msk.f32.vlgmr.msrb.gmra.mxu0 %vm992_vm1, %v2630_v57  ;;  %6383 = vpow2.f32 %v2555_v10  ;;  %v2606_v12 = vsel %vm992_vm1, %v8092_v45, 0.0  ;;  %v3356_v31 = vpop.permute.xlu0 %3355  ;;  %v6220_v57 = vpack.i.bf16 %v7650_v21, %v7523_v16  ;;  %v6179_v10 = vunpack.i.h.bf16 %v7828_v14 }
 0x488   : > { %3014 = vmatpush.msrb.mxu0 %v6193_v24  ;;  %3465 = vrot.lane.b32.xlu0 %v9378_v44, %s6718_s28 }
 0x48c   : > { %v6382_v9 = vpop.eup %6381 }
 0x48d   : > { %v2633_v32 = vmul.f32 %v6382_v9, %v8021_v11  ;;  %2607 = vadd.xlane.f32.xlu1 %v2606_v12  ;;  %2598 = vadd.xlane.f32.xlu2 %v2597_v28  ;;  %v8105_v41 = vpop.eup %6383  ;;  %v6215_v11 = vpack.i.bf16 %v7498_v8, %v7636_v63  ;;  %v9381_v8 = vld [vmem:[#allocation43_spill] sm:$0xff] }
 0x48e   : > { %v2600_v19 = vsel %vm992_vm1, %v8105_v41, 0.0 }
 0x48f   : > { %5917 = vmatmul.msk.f32.vlgmr.msrb.gmra.mxu3 %vm992_vm1, %v2633_v32 }
 0x490   : > { %5925 = vmatpush.xpose.msk.msrb.mxu3 %vm992_vm1, %v7801_v43  ;;  %6206 = vrot.lane.b32.xlu0 %v6205_v3, %s6718_s28  ;;  %v9379_v43 = vld [vmem:[#allocation42_spill] sm:$0xff] }
 0x495   : > { %2601 = vadd.xlane.f32.xlu2 %v2600_v19 }
 0x498   : > { %6216 = vrot.lane.b32.xlu0 %v6215_v11, %s6718_s28 }
 0x4a0   : > { %6226 = vrot.lane.b32.xlu0 %v8114_v37, %s6718_s28 }
 0x4a6   : > { %3439 = vrot.lane.b32.xlu1 %v9379_v43, %s6718_s28 }
 0x4a8   : > { %4175 = vrot.lane.b32.xlu0 %v7129_v22, %s6719_s16 }
 0x4ad   : > { %3493 = vrot.lane.b32.xlu2 %v9380_v2, %s6718_s28 }
 0x4ae   : > { %3437 = vrot.lane.b32.xlu1 %v9381_v8, %s6718_s28 }
 0x4af   : > { %v2569_v42 = vpop.xlane.xlu1 %2568 }
 0x4b0   : > { %6385 = vrcp.f32 %v2569_v42  ;;  %4231 = vrot.lane.b32.xlu0 %v7152_v29, %s6719_s16  ;;  %v6200_v29 = vpack.i.bf16 %v7428_v0, %v7613_v52 }
 0x4b5   : > { %3467 = vrot.lane.b32.xlu2 %v9382_v46, %s6718_s28 }
 0x4b6   : > { %v6386_v61 = vpop.eup %6385  ;;  %6196 = vrot.lane.b32.xlu1 %v7606_v59, %s6718_s28 }
 0x4b7   : > { %v2627_v22 = vmul.f32 %v6386_v61, %v8030_v7  ;;  %v2581_v1 = vpop.xlane.xlu2 %2580  ;;  %v9385_v61 = vld [vmem:[#allocation25_spill] sm:$0xff] }
 0x4b8   : > { %6387 = vrcp.f32 %v2581_v1  ;;  %4203 = vrot.lane.b32.xlu0 %v7138_v25, %s6719_s16 }
 0x4b9   : > { %5911 = vmatmul.msk.f32.vlgmr.msrb.gmra.mxu1 %vm992_vm1, %v2627_v22  ;;  %v9386_v22 = vld [vmem:[#allocation67_spill] sm:$0xff] }
 0x4ba   : > { %2933 = vmatpush.msrb.mxu1 %v6189_v18 }
 0x4bd   : > { %6201 = vrot.lane.b32.xlu2 %v6200_v29, %s6718_s28  ;;  %v2572_v59 = vpop.xlane.xlu1 %2571 }
 0x4be   : > { %v6388_v7 = vpop.eup %6387  ;;  %6389 = vrcp.f32 %v2572_v59  ;;  %6211 = vrot.lane.b32.xlu1 %v6210_v20, %s6718_s28  ;;  %v9388_v20 = vld [vmem:[#allocation64_spill] sm:$0xff]  ;;  %v9389_v59 = vld [vmem:[#allocation47_spill] sm:$0xff] }
 0x4bf   : > { %v2631_v6 = vmul.f32 %v6388_v7, %v8035_v35  ;;  %v2590_v25 = vpop.xlane.xlu2 %2589  ;;  %v9390_v7 = vld [vmem:[#allocation60_spill] sm:$0xff] }
 0x4c0   : > { %6391 = vrcp.f32 %v2590_v25  ;;  %v9392_v25 = vld [vmem:[#allocation74_spill] sm:$0xff] }
 0x4c1   : > { %5915 = vmatmul.msk.f32.vlgmr.msra.gmra.mxu1 %vm992_vm1, %v2631_v6 }
 0x4c2   : > { %3041 = vmatpush.msra.mxu1 %v6194_v48  ;;  %v9393_v48 = vld [vmem:[#allocation56_spill] sm:$0xff] }
 0x4c4   : > { %v6390_v51 = vpop.eup %6389 }
 0x4c5   : > { %v2628_v40 = vmul.f32 %v6390_v51, %v8041_v33  ;;  %4147 = vrot.lane.b32.xlu2 %v7112_v17, %s6719_s16  ;;  %v9394_v51 = vld [vmem:[#allocation78_spill] sm:$0xff] }
 0x4c6   : > { %v6392_v24 = vpop.eup %6391  ;;  %6221 = vrot.lane.b32.xlu1 %v6220_v57, %s6718_s28  ;;  %v9395_v57 = vld [vmem:[#allocation82_spill] sm:$0xff] }
 0x4c7   : > { %v2634_v39 = vmul.f32 %v6392_v24, %v8039_v47  ;;  %v2593_v35 = vpop.xlane.xlu0 %2592  ;;  %5912 = vmatmul.msk.f32.vlgmr.msrb.gmra.mxu2 %vm992_vm1, %v2628_v40  ;;  %v6230_v47 = vpack.i.bf16 %v7701_v5, %v7718_v56  ;;  %v9396_v40 = vld [vmem:[#allocation57_spill] sm:$0xff] }
 0x4c8   : > { %6393 = vrcp.f32 %v2593_v35  ;;  %2960 = vmatpush.msrb.mxu2 %v6179_v10  ;;  %v9397_v35 = vld [vmem:[#allocation79_spill] sm:$0xff] }
 0x4c9   : > { %5918 = vmatmul.msk.f32.vlgmr.msra.gmra.mxu0 %vm992_vm1, %v2634_v39 }
 0x4ca   : > { %5927 = vmatpush.xpose.msk.msra.mxu0 %vm992_vm1, %v7931_v26 }
 0x4cd   : > { %4145 = vrot.lane.b32.xlu2 %v7049_v55, %s6719_s16  ;;  %v6188_v55 = vunpack.i.l.bf16 %v7902_v23 }
 0x4ce   : > { %v6394_v17 = vpop.eup %6393 }
 0x4cf   : > { %v2635_v16 = vmul.f32 %v6394_v17, %v8049_v15  ;;  %v2584_v14 = vpop.xlane.xlu0 %2583  ;;  %v9398_v17 = vld [vmem:[#allocation63_spill] sm:$0xff] }
 0x4d0   : > { %6395 = vrcp.f32 %v2584_v14 }
 0x4d1   : > { %5919 = vmatmul.msk.f32.vlgmr.msrb.gmra.mxu1 %vm992_vm1, %v2635_v16  ;;  %v9399_v16 = vld [vmem:[#allocation83_spill] sm:$0xff] }
 0x4d2   : > { %5929 = vmatpush.xpose.msk.msrb.mxu1 %vm992_vm1, %v7965_v34 }
 0x4d5   : > { %6231 = vrot.lane.b32.xlu2 %v6230_v47, %s6718_s28  ;;  %v3326_v28 = vpop.permute.xlu1 %3325  ;;  %s9468_s28 = sld [smem:[#allocation89_spill]] }
 0x4d6   : > { %v6396_v33 = vpop.eup %6395 }
 0x4d7   : > { %v2632_v26 = vmul.f32 %v6396_v33, %v8054_v58  ;;  %v2605_v9 = vpop.xlane.xlu0 %2604 }
 0x4d8   : > { %6397 = vrcp.f32 %v2605_v9 }
 0x4d9   : > { %5916 = vmatmul.msk.f32.vlgmr.msra.gmra.mxu2 %vm992_vm1, %v2632_v26 }
 0x4da   : > { %3068 = vmatpush.msra.mxu2 %v6188_v55 }
 0x4db   : > { %s6647_s20 = scalar_lea.hbm %s9468_s28, 256 }
 0x4dd   : > { %4173 = vrot.lane.b32.xlu2 %v7061_v60, %s6719_s16  ;;  %v9383_v60 = vld [vmem:[#allocation66_spill] sm:$0xff] }
 0x4de   : > { %v6398_v15 = vpop.eup %6397 }
 0x4df   : > { %v2639_v34 = vmul.f32 %v6398_v15, %v8059_v36  ;;  %v2596_v12 = vpop.xlane.xlu0 %2595  ;;  %v9384_v36 = vld [vmem:[#allocation81_spill] sm:$0xff] }
 0x4e0   : > { %6399 = vrcp.f32 %v2596_v12 }
 0x4e1   : > { %5923 = vmatmul.msk.f32.vlgmr.msra.gmra.mxu1 %vm992_vm1, %v2639_v34  ;;  %v9400_v34 = vld [vmem:[#allocation52_spill] sm:$0xff] }
 0x4e2   : > { %5937 = vmatpush.xpose.msk.msra.mxu1 %vm992_vm1, %v7988_v50  ;;  %v3496_v50 = vpop.permute.xlu2 %3495 }
 0x4e5   : > { %4229 = vrot.lane.b32.xlu2 %v9316_v27, %s6719_s16 }
 0x4e6   : > { %v6400_v23 = vpop.eup %6399 }
 0x4e7   : > { %v2636_v58 = vmul.f32 %v6400_v23, %v8067_v30 }
 0x4e9   : > { %5920 = vmatmul.msk.f32.vlgmr.msrb.gmra.mxu2 %vm992_vm1, %v2636_v58  ;;  %5930 = vmatmul.msk.f32.vlgmr.msrb.gmra.mxu1 %vm992_vm1, %v7973_v13 }
 0x4ea   : > { %5931 = vmatpush.xpose.msk.msrb.mxu2 %vm992_vm1, %v9383_v60  ;;  %5945 = vmatpush.xpose.msk.msrb.mxu1 %vm992_vm1, %v3356_v31  ;;  %v9391_v31 = vld [vmem:[#allocation80_spill] sm:$0xff] }
 0x4f1   : > { %5938 = vmatmul.msk.f32.vlgmr.msra.gmra.mxu1 %vm992_vm1, %v9384_v36 }
 0x4f2   : > { %v3354_v32 = vpop.permute.xlu0 %3353 }
 0x4f9   : > { %5946 = vmatmul.msk.f32.vlgmr.msrb.gmra.mxu1 %vm992_vm1, %v3354_v32 }
 0x500   : > { %v2599_v27 = vpop.xlane.xlu2 %2598  ;;  %v2608_v30 = vpop.xlane.xlu1 %2607 }
 0x501   : > { %6401 = vrcp.f32 %v2599_v27  ;;  %v8239_v36 = vpop.f32.mrf.mxu3 }
 0x502   : > { %6403 = vrcp.f32 %v2608_v30 }
 0x507   : > { %v6402_v3 = vpop.eup %6401 }
 0x508   : > { %v6404_v19 = vpop.eup %6403  ;;  %v2637_v13 = vmul.f32 %v6402_v3, %v8088_v53  ;;  %v2602_v11 = vpop.xlane.xlu2 %2601  ;;  %v9387_v53 = vld [vmem:[#allocation70_spill] sm:$0xff] }
 0x509   : > { %v2640_v42 = vmul.f32 %v6404_v19, %v8092_v45  ;;  %6405 = vrcp.f32 %v2602_v11  ;;  %v3466_v45 = vpop.permute.xlu0 %3465  ;;  %v8245_v32 = vpop.f32.mrf.mxu3 }
 0x50a   : > { %5921 = vmatmul.msk.f32.vlgmr.msra.gmra.mxu3 %vm992_vm1, %v2637_v13  ;;  %9401 = vst [vmem:[#allocation22_spill] sm:$0xff] %v8245_v32 }
 0x50b   : > { %5924 = vmatmul.msk.f32.vlgmr.msra.gmra.mxu2 %vm992_vm1, %v2640_v42  ;;  %5933 = vmatpush.xpose.msk.msra.mxu3 %vm992_vm1, %v9385_v61 }
 0x50c   : > { %5939 = vmatpush.xpose.msk.msra.mxu2 %vm992_vm1, %v9386_v22 }
 0x50f   : > { %v6406_v1 = vpop.eup %6405 }
 0x510   : > { %v2638_v18 = vmul.f32 %v6406_v1, %v8105_v41  ;;  %v3494_v29 = vpop.permute.xlu2 %3493 }
 0x511   : > { %v8220_v24 = vpop.permute.xlu0 %6206 }
 0x512   : > { %5922 = vmatmul.msk.f32.vlgmr.msrb.gmra.mxu0 %vm992_vm1, %v2638_v18  ;;  %5926 = vmatmul.msk.f32.vlgmr.msrb.gmra.mxu3 %vm992_vm1, %v9387_v53  ;;  %v6208_v39 = vunpack.i.l.bf16 %v8220_v24  ;;  %v8251_v3 = vpop.f32.mrf.mxu3  ;;  %v9411_v53 = vld [vmem:[#allocation53_spill] sm:$0xff] }
 0x513   : > { %5932 = vmatmul.msk.f32.vlgmr.msrb.gmra.mxu2 %vm992_vm1, %v9388_v20  ;;  %5935 = vmatpush.xpose.msk.msrb.mxu0 %vm992_vm1, %v9389_v59  ;;  %9404 = vst [vmem:[#allocation26_spill] sm:$0xff] %v8251_v3 }
 0x514   : > { %5941 = vmatpush.xpose.msk.msrb.mxu3 %vm992_vm1, %v9390_v7  ;;  %5947 = vmatpush.xpose.msk.msrb.mxu2 %vm992_vm1, %v9391_v31 }
 0x518   : > { %v3468_v41 = vpop.permute.xlu2 %3467  ;;  %v3440_v6 = vpop.permute.xlu1 %3439 }
 0x519   : > { %5953 = vmatpush.xpose.msk.msra.mxu1 %vm992_vm1, %v3468_v41  ;;  %v6217_v47 = vpop.permute.xlu0 %6216 }
 0x51a   : > { %5928 = vmatmul.msk.f32.vlgmr.msra.gmra.mxu0 %vm992_vm1, %v9392_v25  ;;  %5934 = vmatmul.msk.f32.vlgmr.msra.gmra.mxu3 %vm992_vm1, %v9393_v48  ;;  %v6218_v15 = vunpack.i.l.bf16 %v6217_v47  ;;  %v6219_v60 = vunpack.i.h.bf16 %v6217_v47 }
 0x51b   : > { %5940 = vmatmul.msk.f32.vlgmr.msra.gmra.mxu2 %vm992_vm1, %v9394_v51  ;;  %5943 = vmatpush.xpose.msk.msra.mxu0 %vm992_vm1, %v9395_v57 }
 0x51c   : > { %5949 = vmatpush.xpose.msk.msra.mxu3 %vm992_vm1, %v9396_v40  ;;  %5955 = vmatpush.xpose.msk.msra.mxu2 %vm992_vm1, %v3496_v50  ;;  %v8241_v50 = vpop.f32.mrf.mxu0 }
 0x51d   : > { %5954 = vmatmul.msk.f32.vlgmr.msra.gmra.mxu1 %vm992_vm1, %v3466_v45 }
 0x520   : > { %v3438_v10 = vpop.permute.xlu1 %3437  ;;  %v8231_v14 = vpop.permute.xlu2 %6201 }
 0x521   : > { %v6204_v26 = vunpack.i.h.bf16 %v8231_v14 }
 0x522   : > { %5936 = vmatmul.msk.f32.vlgmr.msrb.gmra.mxu0 %vm992_vm1, %v9397_v35  ;;  %5942 = vmatmul.msk.f32.vlgmr.msrb.gmra.mxu3 %vm992_vm1, %v9398_v17 }
 0x523   : > { %5948 = vmatmul.msk.f32.vlgmr.msrb.gmra.mxu2 %vm992_vm1, %v9399_v16  ;;  %5951 = vmatpush.xpose.msk.msrb.mxu0 %vm992_vm1, %v3440_v6 }
 0x524   : > { %3828 = vmatpush.msrb.mxu2 %v6208_v39  ;;  %v8247_v27 = vpop.f32.mrf.mxu0 }
 0x525   : > { %9402 = vst [vmem:[#allocation45_spill] sm:$0xff] %v8247_v27 }
 0x528   : > { %v6197_v33 = vpop.permute.xlu1 %6196 }
 0x529   : > { %v6199_v9 = vunpack.i.h.bf16 %v6197_v33  ;;  %v6198_v55 = vunpack.i.l.bf16 %v6197_v33 }
 0x52a   : > { %5944 = vmatmul.msk.f32.vlgmr.msra.gmra.mxu0 %vm992_vm1, %v3326_v28  ;;  %5950 = vmatmul.msk.f32.vlgmr.msra.gmra.mxu3 %vm992_vm1, %v9400_v34 }
 0x52b   : > { %5956 = vmatmul.msk.f32.vlgmr.msra.gmra.mxu2 %vm992_vm1, %v3494_v29  ;;  %3776 = vmatpush.msra.mxu0 %v6204_v26 }
 0x52c   : > { %3932 = vmatpush.msra.mxu2 %v6218_v15  ;;  %3750 = vmatpush.msrb.mxu3 %v6198_v55 }
 0x52e   : > { %3854 = vmatpush.msra.mxu3 %v6199_v9 }
 0x530   : > { %v6212_v12 = vpop.permute.xlu1 %6211 }
 0x531   : > { %v6214_v23 = vunpack.i.h.bf16 %v6212_v12  ;;  %v6213_v58 = vunpack.i.l.bf16 %v6212_v12 }
 0x532   : > { %5952 = vmatmul.msk.f32.vlgmr.msrb.gmra.mxu0 %vm992_vm1, %v3438_v10 }
 0x533   : > { %3802 = vmatpush.msrb.mxu1 %v6213_v58  ;;  %3880 = vmatpush.msrb.mxu0 %v6214_v23 }
 0x535   : > { %3906 = vmatpush.msra.mxu1 %v6219_v60 }
 0x536   : > { %v8243_v28 = vpop.f32.mrf.mxu1 }
 0x53e   : > { %v8249_v30 = vpop.f32.mrf.mxu1 }
 0x53f   : > { %9403 = vst [vmem:[#allocation42_spill] sm:$0xff] %v8249_v30 }
 0x546   : > { %v8253_v19 = vpop.f32.mrf.mxu0 }
 0x547   : > { %9405 = vst [vmem:[#allocation43_spill] sm:$0xff] %v8253_v19 }
 0x54a   : > { %v8263_v1 = vpop.f32.mrf.mxu2 }
 0x54b   : > { %9410 = vst [vmem:[#allocation67_spill] sm:$0xff] %v8263_v1 }
 0x54e   : > { %v8255_v13 = vpop.f32.mrf.mxu1 }
 0x54f   : > { %9406 = vst [vmem:[#allocation44_spill] sm:$0xff] %v8255_v13 }
 0x55c   : > { %v8270_v41 = vpop.f32.mrf.mxu2 }
 0x55d   : > { %9412 = vst [vmem:[#allocation70_spill] sm:$0xff] %v8270_v41 }
 0x55e   : > { %v8261_v61 = vpop.f32.mrf.mxu1 }
 0x55f   : > { %9409 = vst [vmem:[#allocation25_spill] sm:$0xff] %v8261_v61 }
 0x566   : > { %v3154_v7 = vpop.f32.mrf.mxu1 }
 0x567   : > { %v3523_v57 = vmul.f32 0.35355338, %v3154_v7 }
 0x569   : > { %v8291_v55 = vadd.f32 %v9411_v53, %v3523_v57 }
 0x56b   : > { %v3559_v23 = vsel %vm992_vm1, %v8291_v55, -inf }
 0x56c   : > { %v8282_v17 = vpop.f32.mrf.mxu2 }
 0x56d   : > { %9413 = vst [vmem:[#allocation64_spill] sm:$0xff] %v8282_v17 }
 0x56e   : > { %v3266_v47 = vpop.f32.mrf.mxu1 }
 0x56f   : > { %v3527_v34 = vmul.f32 0.35355338, %v3266_v47 }
 0x576   : > { %v3378_v7 = vpop.f32.mrf.mxu1 }
 0x58d   : > { %v8257_v11 = vpop.f32.mrf.mxu3 }
 0x58e   : > { %9407 = vst [vmem:[#allocation66_spill] sm:$0xff] %v8257_v11 }
 0x58f   : > { %v8259_v42 = vpop.f32.mrf.mxu0 }
 0x590   : > { %9408 = vst [vmem:[#allocation81_spill] sm:$0xff] %v8259_v42 }
 0x595   : > { %v3098_v22 = vpop.f32.mrf.mxu3 }
 0x596   : > { %v3521_v20 = vmul.f32 0.35355338, %v3098_v22 }
 0x597   : > { %v3126_v18 = vpop.f32.mrf.mxu0 }
 0x598   : > { %v3522_v29 = vmul.f32 0.35355338, %v3126_v18  ;;  %v8273_v48 = vadd.f32 %v9411_v53, %v3521_v20  ;;  %v8299_v18 = vpop.f32.mrf.mxu2 }
 0x599   : > { %9414 = vst [vmem:[#allocation47_spill] sm:$0xff] %v8299_v18 }
 0x59a   : > { %v8266_v45 = vadd.f32 %v9411_v53, %v3522_v29  ;;  %v3553_v39 = vsel %vm992_vm1, %v8273_v48, -inf  ;;  %v8302_v29 = vadd.f32 %v9411_v53, %v3527_v34  ;;  %v3490_v47 = vpop.f32.mrf.mxu1 }
 0x59c   : > { %v3556_v59 = vsel %vm992_vm1, %v8266_v45, -inf }
 0x59d   : > { %3557 = vmax.xlane.f32.xlu1 %v3556_v59  ;;  %v3210_v31 = vpop.f32.mrf.mxu3 }
 0x59e   : > { %v3525_v40 = vmul.f32 0.35355338, %v3210_v31 }
 0x59f   : > { %v3238_v6 = vpop.f32.mrf.mxu0 }
 0x5a0   : > { %v3526_v25 = vmul.f32 0.35355338, %v3238_v6  ;;  %v8285_v26 = vadd.f32 %v9411_v53, %v3525_v40  ;;  %v3571_v40 = vsel %vm992_vm1, %v8302_v29, -inf }
 0x5a2   : > { %v8276_v51 = vadd.f32 %v9411_v53, %v3526_v25  ;;  %v3565_v58 = vsel %vm992_vm1, %v8285_v26, -inf  ;;  %v3531_v25 = vmul.f32 0.35355338, %v3378_v7  ;;  %v9415_v7 = vld [vmem:[#allocation36_spill] sm:$0xff] }
 0x5a4   : > { %v3568_v10 = vsel %vm992_vm1, %v8276_v51, -inf }
 0x5a5   : > { %3569 = vmax.xlane.f32.xlu2 %v3568_v10  ;;  %3554 = vmax.xlane.f32.xlu1 %v3553_v39  ;;  %v3322_v35 = vpop.f32.mrf.mxu3  ;;  %v8317_v39 = vadd.f32 %v9411_v53, %v3531_v25  ;;  %v9418_v25 = vld [vmem:[#allocation23_spill] sm:$0xff] }
 0x5a6   : > { %v3529_v16 = vmul.f32 0.35355338, %v3322_v35 }
 0x5a7   : > { %v3350_v33 = vpop.f32.mrf.mxu0  ;;  %v3583_v34 = vsel %vm992_vm1, %v8317_v39, -inf }
 0x5a8   : > { %v8288_v9 = vadd.f32 %v9411_v53, %v3529_v16  ;;  %v3530_v12 = vmul.f32 0.35355338, %v3350_v33  ;;  %v3182_v16 = vpop.f32.mrf.mxu2 }
 0x5a9   : > { %v3524_v33 = vmul.f32 0.35355338, %v3182_v16  ;;  %v9420_v16 = vld [vmem:[#allocation37_spill] sm:$0xff] }
 0x5aa   : > { %v3577_v15 = vsel %vm992_vm1, %v8288_v9, -inf  ;;  %v8308_v59 = vadd.f32 %v9411_v53, %v3530_v12 }
 0x5ab   : > { %3578 = vmax.xlane.f32.xlu0 %v3577_v15  ;;  %v3535_v15 = vmul.f32 0.35355338, %v3490_v47 }
 0x5ac   : > { %v3580_v10 = vsel %vm992_vm1, %v8308_v59, -inf }
 0x5ad   : > { %3560 = vmax.xlane.f32.xlu1 %v3559_v23  ;;  %3566 = vmax.xlane.f32.xlu2 %v3565_v58  ;;  %v3434_v60 = vpop.f32.mrf.mxu3  ;;  %v8327_v23 = vadd.f32 %v9411_v53, %v3524_v33  ;;  %v8330_v58 = vadd.f32 %v9411_v53, %v3535_v15 }
 0x5ae   : > { %v3533_v22 = vmul.f32 0.35355338, %v3434_v60 }
 0x5af   : > { %v3462_v31 = vpop.f32.mrf.mxu0  ;;  %v3595_v60 = vsel %vm992_vm1, %v8330_v58, -inf }
 0x5b0   : > { %v8305_v20 = vadd.f32 %v9411_v53, %v3533_v22  ;;  %v3534_v57 = vmul.f32 0.35355338, %v3462_v31  ;;  %v3562_v22 = vsel %vm992_vm1, %v8327_v23, -inf  ;;  %v9416_v31 = vld [vmem:[#allocation32_spill] sm:$0xff] }
 0x5b2   : > { %v3589_v6 = vsel %vm992_vm1, %v8305_v20, -inf  ;;  %v8320_v35 = vadd.f32 %v9411_v53, %v3534_v57  ;;  %v9419_v57 = vld [vmem:[#allocation27_spill] sm:$0xff] }
 0x5b3   : > { %3590 = vmax.xlane.f32.xlu0 %v3589_v6  ;;  %v9417_v6 = vld [vmem:[#allocation33_spill] sm:$0xff] }
 0x5b4   : > { %v3592_v12 = vsel %vm992_vm1, %v8320_v35, -inf }
 0x5b5   : > { %3572 = vmax.xlane.f32.xlu1 %v3571_v40  ;;  %3581 = vmax.xlane.f32.xlu2 %v3580_v10  ;;  %v8346_v40 = vpop.permute.xlu2 %4147  ;;  %v3294_v10 = vpop.f32.mrf.mxu2 }
 0x5b6   : > { %v3528_v47 = vmul.f32 0.35355338, %v3294_v10 }
 0x5bd   : > { %3584 = vmax.xlane.f32.xlu1 %v3583_v34  ;;  %3593 = vmax.xlane.f32.xlu2 %v3592_v12  ;;  %v8350_v33 = vpop.permute.xlu2 %4145  ;;  %v3406_v15 = vpop.f32.mrf.mxu2  ;;  %v8353_v34 = vadd.f32 %v9411_v53, %v3528_v47 }
 0x5be   : > { %v3532_v12 = vmul.f32 0.35355338, %v3406_v15  ;;  %v8371_v47 = vpop.permute.xlu1 %6221 }
 0x5c5   : > { %3596 = vmax.xlane.f32.xlu1 %v3595_v60  ;;  %3563 = vmax.xlane.f32.xlu2 %v3562_v22  ;;  %v3574_v60 = vsel %vm992_vm1, %v8353_v34, -inf  ;;  %v8357_v22 = vpop.permute.xlu2 %6231 }
 0x5c7   : > { %4343 = vrot.lane.b32.xlu0 %v9415_v7, %s6719_s16  ;;  %v8360_v7 = vadd.f32 %v9411_v53, %v3532_v12 }
 0x5cf   : > { %4341 = vrot.lane.b32.xlu0 %v9416_v31, %s6719_s16  ;;  %v3518_v31 = vpop.f32.mrf.mxu2 }
 0x5dd   : > { %4259 = vrot.lane.b32.xlu2 %v9417_v6, %s6719_s16  ;;  %v3536_v6 = vmul.f32 0.35355338, %v3518_v31 }
 0x5de   : > { %4201 = vrot.lane.b32.xlu1 %v9418_v25, %s6719_s16  ;;  %v3586_v25 = vsel %vm992_vm1, %v8360_v7, -inf }
 0x5df   : > { %v8367_v10 = vadd.f32 %v9411_v53, %v3536_v6 }
 0x5e1   : > { %v3598_v15 = vsel %vm992_vm1, %v8367_v10, -inf }
 0x5e5   : > { %4257 = vrot.lane.b32.xlu2 %v9419_v57, %s6719_s16  ;;  %v8364_v57 = vpop.permute.xlu0 %6226 }
 0x5ed   : > { %4371 = vrot.lane.b32.xlu2 %v9420_v16, %s6719_s16  ;;  %v8369_v16 = vpop.permute.xlu2 %4173  ;;  %v8375_v12 = vpop.permute.xlu0 %4175 }
 0x5f9   : > { %3575 = vmax.xlane.f32.xlu0 %v3574_v60  ;;  %v8377_v60 = vpop.permute.xlu2 %4229 }
 0x601   : > { %3587 = vmax.xlane.f32.xlu0 %v3586_v25  ;;  %v8380_v25 = vpop.permute.xlu0 %4231 }
 0x609   : > { %3599 = vmax.xlane.f32.xlu0 %v3598_v15 }
 0x610   : > { %v3558_v31 = vpop.xlane.xlu1 %3557 }
 0x611   : > { %v3602_v18 = vsub.f32 %v8266_v45, %v3558_v31  ;;  %v8388_v45 = vpop.permute.xlu0 %4203 }
 0x613   : > { %v3619_v61 = vmul.f32 1.442695, %v3602_v18 }
 0x615   : > { %6407 = vpow2.f32 %v3619_v61 }
 0x618   : > { %v3570_v53 = vpop.xlane.xlu2 %3569  ;;  %v3555_v6 = vpop.xlane.xlu1 %3554 }
 0x619   : > { %v3606_v13 = vsub.f32 %v8276_v51, %v3570_v53  ;;  %v3601_v19 = vsub.f32 %v8273_v48, %v3555_v6 }
 0x61b   : > { %v8384_v3 = vpop.eup %6407  ;;  %v3627_v15 = vmul.f32 1.442695, %v3606_v13  ;;  %v3617_v41 = vmul.f32 1.442695, %v3601_v19 }
 0x61c   : > { %v3652_v30 = vsel %vm992_vm1, %v8384_v3, 0.0 }
 0x61d   : > { %6409 = vpow2.f32 %v3627_v15  ;;  %3653 = vadd.xlane.f32.xlu0 %v3652_v30 }
 0x61e   : > { %6411 = vpow2.f32 %v3617_v41  ;;  %v3579_v13 = vpop.xlane.xlu0 %3578 }
 0x620   : > { %v3561_v18 = vpop.xlane.xlu1 %3560  ;;  %v3567_v61 = vpop.xlane.xlu2 %3566 }
 0x621   : > { %v3603_v31 = vsub.f32 %v8291_v55, %v3561_v18  ;;  %v3605_v48 = vsub.f32 %v8285_v26, %v3567_v61  ;;  %v3609_v18 = vsub.f32 %v8288_v9, %v3579_v13 }
 0x623   : > { %v8391_v42 = vpop.eup %6409  ;;  %v3621_v51 = vmul.f32 1.442695, %v3603_v31  ;;  %v3625_v41 = vmul.f32 1.442695, %v3605_v48 }
 0x624   : > { %v8394_v53 = vpop.eup %6411  ;;  %v3664_v19 = vsel %vm992_vm1, %v8391_v42, 0.0 }
 0x625   : > { %6413 = vpow2.f32 %v3621_v51  ;;  %3665 = vadd.xlane.f32.xlu1 %v3664_v19  ;;  %v3649_v30 = vsel %vm992_vm1, %v8394_v53, 0.0  ;;  %v3633_v19 = vmul.f32 1.442695, %v3609_v18 }
 0x626   : > { %3650 = vadd.xlane.f32.xlu2 %v3649_v30  ;;  %6415 = vpow2.f32 %v3625_v41 }
 0x628   : > { %v3573_v6 = vpop.xlane.xlu1 %3572  ;;  %v3582_v55 = vpop.xlane.xlu2 %3581 }
 0x629   : > { %v3607_v15 = vsub.f32 %v8302_v29, %v3573_v6  ;;  %v3610_v31 = vsub.f32 %v8308_v59, %v3582_v55 }
 0x62b   : > { %v8402_v26 = vpop.eup %6413  ;;  %v3629_v61 = vmul.f32 1.442695, %v3607_v15  ;;  %v3635_v30 = vmul.f32 1.442695, %v3610_v31 }
 0x62c   : > { %v3655_v51 = vsel %vm992_vm1, %v8402_v26, 0.0  ;;  %v8407_v27 = vpop.eup %6415 }
 0x62d   : > { %6417 = vpow2.f32 %v3629_v61  ;;  %3656 = vadd.xlane.f32.xlu0 %v3655_v51  ;;  %v3661_v41 = vsel %vm992_vm1, %v8407_v27, 0.0  ;;  %v3591_v51 = vpop.xlane.xlu0 %3590 }
 0x62e   : > { %6419 = vpow2.f32 %v3633_v19  ;;  %v3613_v19 = vsub.f32 %v8305_v20, %v3591_v51 }
 0x62f   : > { %6421 = vpow2.f32 %v3635_v30 }
 0x630   : > { %v3585_v48 = vpop.xlane.xlu1 %3584  ;;  %v3594_v11 = vpop.xlane.xlu2 %3593 }
 0x631   : > { %v3611_v9 = vsub.f32 %v8317_v39, %v3585_v48  ;;  %v3614_v13 = vsub.f32 %v8320_v35, %v3594_v11 }
 0x633   : > { %v8409_v29 = vpop.eup %6417  ;;  %v3637_v6 = vmul.f32 1.442695, %v3611_v9  ;;  %v3643_v15 = vmul.f32 1.442695, %v3614_v13  ;;  %v3641_v13 = vmul.f32 1.442695, %v3613_v19 }
 0x634   : > { %v3667_v59 = vsel %vm992_vm1, %v8409_v29, 0.0  ;;  %v8417_v55 = vpop.eup %6419 }
 0x635   : > { %3668 = vadd.xlane.f32.xlu2 %v3667_v59  ;;  %3662 = vadd.xlane.f32.xlu0 %v3661_v41  ;;  %v8419_v31 = vpop.eup %6421  ;;  %6423 = vpow2.f32 %v3637_v6  ;;  %v3673_v30 = vsel %vm992_vm1, %v8417_v55, 0.0 }
 0x636   : > { %6425 = vpow2.f32 %v3643_v15  ;;  %v3676_v48 = vsel %vm992_vm1, %v8419_v31, 0.0 }
 0x638   : > { %v3597_v18 = vpop.xlane.xlu1 %3596  ;;  %v3564_v61 = vpop.xlane.xlu2 %3563 }
 0x639   : > { %v3615_v39 = vsub.f32 %v8330_v58, %v3597_v18  ;;  %v3604_v35 = vsub.f32 %v8327_v23, %v3564_v61 }
 0x63b   : > { %v3645_v11 = vmul.f32 1.442695, %v3615_v39  ;;  %v3623_v9 = vmul.f32 1.442695, %v3604_v35  ;;  %v8428_v59 = vpop.eup %6423  ;;  %v8448_v39 = vpop.permute.xlu0 %4343  ;;  %v9421_v35 = vld [vmem:[#allocation24_spill] sm:$0xff] }
 0x63c   : > { %v8430_v58 = vpop.eup %6425  ;;  %v3679_v23 = vsel %vm992_vm1, %v8428_v59, 0.0 }
 0x63d   : > { %6427 = vpow2.f32 %v3645_v11  ;;  %3674 = vadd.xlane.f32.xlu2 %v3673_v30  ;;  %3677 = vadd.xlane.f32.xlu0 %v3676_v48  ;;  %v3688_v6 = vsel %vm992_vm1, %v8430_v58, 0.0 }
 0x63e   : > { %6429 = vpow2.f32 %v3623_v9 }
 0x63f   : > { %6431 = vpow2.f32 %v3641_v13 }
 0x643   : > { %v8432_v41 = vpop.eup %6427  ;;  %v8450_v11 = vpop.permute.xlu0 %4341 }
 0x644   : > { %v3691_v20 = vsel %vm992_vm1, %v8432_v41, 0.0  ;;  %v8440_v15 = vpop.eup %6429 }
 0x645   : > { %3692 = vadd.xlane.f32.xlu1 %v3691_v20  ;;  %3680 = vadd.xlane.f32.xlu2 %v3679_v23  ;;  %v8442_v18 = vpop.eup %6431  ;;  %v3658_v61 = vsel %vm992_vm1, %v8440_v15, 0.0 }
 0x646   : > { %3689 = vadd.xlane.f32.xlu0 %v3688_v6  ;;  %v3685_v51 = vsel %vm992_vm1, %v8442_v18, 0.0 }
 0x64d   : > { %3659 = vadd.xlane.f32.xlu2 %v3658_v61 }
 0x64e   : > { %3686 = vadd.xlane.f32.xlu0 %v3685_v51  ;;  %v8460_v51 = vpop.permute.xlu2 %4259 }
 0x665   : > { %4453 = vrot.lane.b32.xlu2 %v9421_v35, %s6719_s16 }
 0x66c   : > { %v3576_v19 = vpop.xlane.xlu0 %3575 }
 0x66d   : > { %v3608_v30 = vsub.f32 %v8353_v34, %v3576_v19 }
 0x66f   : > { %v3631_v48 = vmul.f32 1.442695, %v3608_v30 }
 0x671   : > { %6433 = vpow2.f32 %v3631_v48  ;;  %v9422_v48 = vld [vmem:[#allocation40_spill] sm:$0xff] }
 0x674   : > { %v3588_v9 = vpop.xlane.xlu0 %3587 }
 0x675   : > { %v3612_v13 = vsub.f32 %v8360_v7, %v3588_v9  ;;  %v8467_v7 = vpop.permute.xlu2 %4257 }
 0x677   : > { %v8456_v20 = vpop.eup %6433  ;;  %v3639_v23 = vmul.f32 1.442695, %v3612_v13 }
 0x678   : > { %v3670_v6 = vsel %vm992_vm1, %v8456_v20, 0.0 }
 0x679   : > { %6435 = vpow2.f32 %v3639_v23  ;;  %3671 = vadd.xlane.f32.xlu0 %v3670_v6  ;;  %v9423_v6 = vld [vmem:[#allocation41_spill] sm:$0xff] }
 0x67c   : > { %v3600_v61 = vpop.xlane.xlu0 %3599 }
 0x67d   : > { %v3616_v35 = vsub.f32 %v8367_v10, %v3600_v61  ;;  %v8475_v10 = vpop.permute.xlu1 %4201  ;;  %v8477_v23 = vpop.permute.xlu2 %4371 }
 0x67f   : > { %v8463_v32 = vpop.eup %6435  ;;  %v3647_v34 = vmul.f32 1.442695, %v3616_v35 }
 0x680   : > { %v3682_v19 = vsel %vm992_vm1, %v8463_v32, 0.0 }
 0x681   : > { %3683 = vadd.xlane.f32.xlu1 %v3682_v19  ;;  %6437 = vpow2.f32 %v3647_v34  ;;  %v6223_v19 = vunpack.i.l.bf16 %v8371_v47 }
 0x687   : > { %v8469_v30 = vpop.eup %6437 }
 0x688   : > { %v3694_v9 = vsel %vm992_vm1, %v8469_v30, 0.0 }
 0x68d   : > { %4455 = vrot.lane.b32.xlu0 %v9422_v48, %s6719_s16 }
 0x68e   : > { %3695 = vadd.xlane.f32.xlu2 %v3694_v9  ;;  %v9424_v9 = vld [vmem:[#allocation31_spill] sm:$0xff] }
 0x690   : > { %v3654_v13 = vpop.xlane.xlu0 %3653 }
 0x691   : > { %6439 = vrcp.f32 %v3654_v13  ;;  %v9425_v13 = vld [vmem:[#allocation29_spill] sm:$0xff] }
 0x695   : > { %4483 = vrot.lane.b32.xlu0 %v9423_v6, %s6719_s16 }
 0x697   : > { %v6440_v61 = vpop.eup %6439 }
 0x698   : > { %v3714_v35 = vmul.f32 %v6440_v61, %v8384_v3  ;;  %v3666_v34 = vpop.xlane.xlu1 %3665  ;;  %v6229_v61 = vunpack.i.h.bf16 %v8364_v57 }
 0x699   : > { %6441 = vrcp.f32 %v3666_v34  ;;  %v3651_v48 = vpop.xlane.xlu2 %3650 }
 0x69a   : > { %6443 = vrcp.f32 %v3651_v48  ;;  %4369 = vrot.lane.b32.xlu1 %v9424_v9, %s6719_s16  ;;  %5958 = vmatmul.msk.f32.vlgmr.msra.gmra.mxu0 %vm992_vm1, %v3714_v35  ;;  %v6203_v48 = vunpack.i.l.bf16 %v8231_v14  ;;  %v9426_v9 = vld [vmem:[#allocation34_spill] sm:$0xff] }
 0x69b   : > { %3984 = vmatpush.msra.mxu0 %v6223_v19  ;;  %v9427_v35 = vld [vmem:[#allocation30_spill] sm:$0xff] }
 0x69d   : > { %4285 = vrot.lane.b32.xlu0 %v9425_v13, %s6719_s16  ;;  %v6228_v13 = vunpack.i.l.bf16 %v8364_v57 }
 0x69f   : > { %v6442_v17 = vpop.eup %6441 }
 0x6a0   : > { %v6444_v6 = vpop.eup %6443  ;;  %v3718_v1 = vmul.f32 %v6442_v17, %v8391_v42  ;;  %v3657_v3 = vpop.xlane.xlu0 %3656  ;;  %v9428_v42 = vld [vmem:[#allocation28_spill] sm:$0xff] }
 0x6a1   : > { %v3713_v34 = vmul.f32 %v6444_v6, %v8394_v53  ;;  %6445 = vrcp.f32 %v3657_v3  ;;  %v9430_v6 = vld [vmem:[#allocation38_spill] sm:$0xff] }
 0x6a2   : > { %4287 = vrot.lane.b32.xlu1 %v9426_v9, %s6719_s16  ;;  %5962 = vmatmul.msk.f32.vlgmr.msrb.gmra.mxu0 %vm992_vm1, %v3718_v1  ;;  %v9429_v1 = vld [vmem:[#allocation35_spill] sm:$0xff] }
 0x6a3   : > { %5957 = vmatmul.msk.f32.vlgmr.msrb.gmra.mxu3 %vm992_vm1, %v3713_v34  ;;  %4088 = vmatpush.msrb.mxu0 %v6229_v61 }
 0x6a4   : > { %3958 = vmatpush.msrb.mxu3 %v6203_v48  ;;  %v6234_v48 = vunpack.i.h.bf16 %v8357_v22 }
 0x6a5   : > { %4313 = vrot.lane.b32.xlu0 %v9427_v35, %s6719_s16  ;;  %v6209_v35 = vunpack.i.h.bf16 %v8220_v24 }
 0x6a6   : > { %4481 = vrot.lane.b32.xlu2 %v9428_v42, %s6719_s16  ;;  %v9431_v42 = vld [vmem:[#allocation21_spill] sm:$0xff] }
 0x6a7   : > { %v6446_v17 = vpop.eup %6445 }
 0x6a8   : > { %v3715_v53 = vmul.f32 %v6446_v17, %v8402_v26  ;;  %v3669_v19 = vpop.xlane.xlu2 %3668  ;;  %v3663_v14 = vpop.xlane.xlu0 %3662 }
 0x6a9   : > { %6447 = vrcp.f32 %v3669_v19 }
 0x6aa   : > { %6449 = vrcp.f32 %v3663_v14  ;;  %4315 = vrot.lane.b32.xlu1 %v9429_v1, %s6719_s16  ;;  %5959 = vmatmul.msk.f32.vlgmr.msrb.gmra.mxu1 %vm992_vm1, %v3715_v53 }
 0x6ab   : > { %4010 = vmatpush.msrb.mxu1 %v6228_v13 }
 0x6ad   : > { %4511 = vrot.lane.b32.xlu0 %v9379_v43, %s6719_s16  ;;  %v9432_v43 = vld [vmem:[#allocation46_spill] sm:$0xff] }
 0x6ae   : > { %4399 = vrot.lane.b32.xlu2 %v9430_v6, %s6719_s16 }
 0x6af   : > { %v6448_v3 = vpop.eup %6447 }
 0x6b0   : > { %v6450_v26 = vpop.eup %6449  ;;  %v3719_v61 = vmul.f32 %v6448_v3, %v8409_v29  ;;  %v3675_v34 = vpop.xlane.xlu2 %3674  ;;  %v9433_v29 = vld [vmem:[#allocation39_spill] sm:$0xff] }
 0x6b1   : > { %v3678_v57 = vpop.xlane.xlu0 %3677  ;;  %v3717_v9 = vmul.f32 %v6450_v26, %v8407_v27  ;;  %6451 = vrcp.f32 %v3675_v34 }
 0x6b2   : > { %6453 = vrcp.f32 %v3678_v57  ;;  %4397 = vrot.lane.b32.xlu1 %v9431_v42, %s6719_s16  ;;  %5963 = vmatmul.msk.f32.vlgmr.msra.gmra.mxu1 %vm992_vm1, %v3719_v61 }
 0x6b3   : > { %5961 = vmatmul.msk.f32.vlgmr.msra.gmra.mxu3 %vm992_vm1, %v3717_v9  ;;  %4114 = vmatpush.msra.mxu1 %v6234_v48 }
 0x6b4   : > { %4062 = vmatpush.msra.mxu3 %v6209_v35 }
 0x6b5   : > { %4567 = vrot.lane.b32.xlu0 %v9432_v43, %s6719_s16 }
 0x6b6   : > { %4427 = vrot.lane.b32.xlu2 %v9433_v29, %s6719_s16 }
 0x6b7   : > { %v6452_v27 = vpop.eup %6451 }
 0x6b8   : > { %v6454_v17 = vpop.eup %6453  ;;  %v3721_v24 = vmul.f32 %v6452_v27, %v8417_v55  ;;  %v3681_v53 = vpop.xlane.xlu2 %3680 }
 0x6b9   : > { %v3722_v19 = vmul.f32 %v6454_v17, %v8419_v31  ;;  %v3690_v14 = vpop.xlane.xlu0 %3689  ;;  %6455 = vrcp.f32 %v3681_v53  ;;  %v3693_v55 = vpop.xlane.xlu1 %3692 }
 0x6ba   : > { %4425 = vrot.lane.b32.xlu1 %v9377_v4, %s6719_s16  ;;  %6457 = vrcp.f32 %v3690_v14 }
 0x6bb   : > { %5965 = vmatmul.msk.f32.vlgmr.msrb.gmra.mxu3 %vm992_vm1, %v3721_v24  ;;  %5966 = vmatmul.msk.f32.vlgmr.msra.gmra.mxu0 %vm992_vm1, %v3722_v19  ;;  %6459 = vrcp.f32 %v3693_v55 }
 0x6bc   : > { %5973 = vmatpush.xpose.msk.msrb.mxu3 %vm992_vm1, %v8346_v40  ;;  %5975 = vmatpush.xpose.msk.msra.mxu0 %vm992_vm1, %v8375_v12 }
 0x6bd   : > { %4537 = vrot.lane.b32.xlu0 %v9378_v44, %s6719_s16  ;;  %v6240_v44 = vpack.i.bf16 %v7456_v62, %v7443_v49  ;;  %v6224_v49 = vunpack.i.h.bf16 %v8371_v47 }
 0x6be   : > { %4509 = vrot.lane.b32.xlu2 %v9381_v8, %s6719_s16 }
 0x6bf   : > { %v6456_v31 = vpop.eup %6455 }
 0x6c0   : > { %v3660_v4 = vpop.xlane.xlu2 %3659  ;;  %v6458_v13 = vpop.eup %6457  ;;  %v3723_v1 = vmul.f32 %v6456_v31, %v8428_v59 }
 0x6c1   : > { %6461 = vrcp.f32 %v3660_v4  ;;  %v3687_v6 = vpop.xlane.xlu0 %3686  ;;  %v3726_v40 = vmul.f32 %v6458_v13, %v8430_v58  ;;  %v6460_v8 = vpop.eup %6459  ;;  %v9434_v58 = vld [vmem:[#allocation76_spill] sm:$0xff] }
 0x6c2   : > { %6463 = vrcp.f32 %v3687_v6  ;;  %4565 = vrot.lane.b32.xlu1 %v9380_v2, %s6719_s16  ;;  %5967 = vmatmul.msk.f32.vlgmr.msrb.gmra.mxu1 %vm992_vm1, %v3723_v1  ;;  %v6245_v3 = vpack.i.bf16 %v7636_v63, %v9434_v58  ;;  %v3727_v26 = vmul.f32 %v6460_v8, %v8432_v41  ;;  %v6233_v41 = vunpack.i.l.bf16 %v8357_v22 }
 0x6c3   : > { %5970 = vmatmul.msk.f32.vlgmr.msrb.gmra.mxu0 %vm992_vm1, %v3726_v40  ;;  %5977 = vmatpush.xpose.msk.msrb.mxu1 %vm992_vm1, %v8388_v45 }
 0x6c5   : > { %6241 = vrot.lane.b32.xlu0 %v6240_v44, %s6719_s16 }
 0x6c6   : > { %4539 = vrot.lane.b32.xlu2 %v9382_v46, %s6719_s16  ;;  %v9435_v46 = vld [vmem:[#allocation58_spill] sm:$0xff] }
 0x6c7   : > { %v6462_v12 = vpop.eup %6461  ;;  %v6235_v63 = vpack.i.bf16 %v7428_v0, %v9435_v46 }
 0x6c8   : > { %v6464_v59 = vpop.eup %6463  ;;  %v3716_v2 = vmul.f32 %v6462_v12, %v8440_v15 }
 0x6c9   : > { %v3725_v62 = vmul.f32 %v6464_v59, %v8442_v18 }
 0x6ca   : > { %5960 = vmatmul.msk.f32.vlgmr.msrb.gmra.mxu2 %vm992_vm1, %v3716_v2  ;;  %6246 = vrot.lane.b32.xlu1 %v6245_v3, %s6719_s16 }
 0x6cb   : > { %4036 = vmatpush.msrb.mxu2 %v6224_v49  ;;  %5969 = vmatmul.msk.f32.vlgmr.msra.gmra.mxu3 %vm992_vm1, %v3725_v62 }
 0x6cc   : > { %5971 = vmatmul.msk.f32.vlgmr.msra.gmra.mxu1 %vm992_vm1, %v3727_v26  ;;  %5976 = vmatmul.msk.f32.vlgmr.msra.gmra.mxu0 %vm992_vm1, %v8369_v16  ;;  %v8630_v26 = vld [vmem:[%s7320_s17] sm:$0xff]  ;;  %s9456_s17 = sld [smem:[#allocation88_spill]] }
 0x6cd   : > { %5981 = vmatpush.xpose.msk.msra.mxu3 %vm992_vm1, %v8460_v51 }
 0x6ce   : > { %6236 = vrot.lane.b32.xlu2 %v6235_v63, %s6719_s16 }
 0x6d3   : > { %5974 = vmatmul.msk.f32.vlgmr.msrb.gmra.mxu3 %vm992_vm1, %v8350_v33  ;;  %v4454_v33 = vpop.permute.xlu2 %4453 }
 0x6d4   : > { %5978 = vmatmul.msk.f32.vlgmr.msrb.gmra.mxu1 %vm992_vm1, %v8475_v10  ;;  %5989 = vmatpush.xpose.msk.msrb.mxu3 %vm992_vm1, %v8477_v23 }
 0x6db   : > { %5982 = vmatmul.msk.f32.vlgmr.msra.gmra.mxu3 %vm992_vm1, %v8467_v7 }
 0x6ec   : > { %v3672_v16 = vpop.xlane.xlu0 %3671 }
 0x6ed   : > { %6465 = vrcp.f32 %v3672_v16 }
 0x6f3   : > { %v6466_v0 = vpop.eup %6465 }
 0x6f4   : > { %v3720_v47 = vmul.f32 %v6466_v0, %v8456_v20  ;;  %v3684_v45 = vpop.xlane.xlu1 %3683 }
 0x6f5   : > { %6467 = vrcp.f32 %v3684_v45 }
 0x6f6   : > { %5964 = vmatmul.msk.f32.vlgmr.msra.gmra.mxu2 %vm992_vm1, %v3720_v47 }
 0x6f7   : > { %4140 = vmatpush.msra.mxu2 %v6233_v41 }
 0x6fb   : > { %v6468_v15 = vpop.eup %6467 }
 0x6fc   : > { %v3724_v18 = vmul.f32 %v6468_v15, %v8463_v32 }
 0x6fe   : > { %5968 = vmatmul.msk.f32.vlgmr.msrb.gmra.mxu2 %vm992_vm1, %v3724_v18 }
 0x6ff   : > { %5979 = vmatpush.xpose.msk.msrb.mxu2 %vm992_vm1, %v8380_v25  ;;  %v4456_v51 = vpop.permute.xlu0 %4455 }
 0x701   : > { %v3696_v7 = vpop.xlane.xlu2 %3695 }
 0x702   : > { %6469 = vrcp.f32 %v3696_v7  ;;  %v6250_v7 = vpack.i.bf16 %v7650_v21, %v7613_v52 }
 0x707   : > { %v4484_v20 = vpop.permute.xlu0 %4483 }
 0x708   : > { %v6470_v10 = vpop.eup %6469  ;;  %5997 = vmatpush.xpose.msk.msra.mxu3 %vm992_vm1, %v4484_v20 }
 0x709   : > { %v3728_v22 = vmul.f32 %v6470_v10, %v8469_v30  ;;  %v4482_v23 = vpop.permute.xlu2 %4481 }
 0x70b   : > { %5972 = vmatmul.msk.f32.vlgmr.msra.gmra.mxu2 %vm992_vm1, %v3728_v22 }
 0x70c   : > { %5987 = vmatpush.xpose.msk.msra.mxu2 %vm992_vm1, %v8448_v39  ;;  %v4370_v32 = vpop.permute.xlu1 %4369 }
 0x70d   : > { %5990 = vmatmul.msk.f32.vlgmr.msrb.gmra.mxu3 %vm992_vm1, %v4370_v32 }
 0x70f   : > { %v4286_v61 = vpop.permute.xlu0 %4285 }
 0x711   : > { %v4400_v25 = vpop.permute.xlu2 %4399 }
 0x713   : > { %5980 = vmatmul.msk.f32.vlgmr.msrb.gmra.mxu2 %vm992_vm1, %v8377_v60 }
 0x714   : > { %5995 = vmatpush.xpose.msk.msrb.mxu2 %vm992_vm1, %v4456_v51  ;;  %v4288_v34 = vpop.permute.xlu1 %4287 }
 0x715   : > { %5983 = vmatpush.xpose.msk.msrb.mxu0 %vm992_vm1, %v4288_v34  ;;  %5998 = vmatmul.msk.f32.vlgmr.msra.gmra.mxu3 %vm992_vm1, %v4482_v23 }
 0x717   : > { %v4314_v30 = vpop.permute.xlu0 %4313  ;;  %v8601_v35 = vpop.f32.mrf.mxu0 }
 0x718   : > { %5984 = vmatmul.msk.f32.vlgmr.msrb.gmra.mxu0 %vm992_vm1, %v4286_v61 }
 0x719   : > { %5991 = vmatpush.xpose.msk.msra.mxu0 %vm992_vm1, %v4400_v25  ;;  %v4428_v39 = vpop.permute.xlu2 %4427 }
 0x71b   : > { %5988 = vmatmul.msk.f32.vlgmr.msra.gmra.mxu2 %vm992_vm1, %v8450_v11 }
 0x71c   : > { %v4316_v57 = vpop.permute.xlu1 %4315 }
 0x71d   : > { %5985 = vmatpush.xpose.msk.msra.mxu1 %vm992_vm1, %v4316_v57 }
 0x71f   : > { %v4512_v60 = vpop.permute.xlu0 %4511  ;;  %v8609_v17 = vpop.f32.mrf.mxu0 }
 0x720   : > { %5986 = vmatmul.msk.f32.vlgmr.msra.gmra.mxu1 %vm992_vm1, %v4314_v30  ;;  %5999 = vmatpush.xpose.msk.msrb.mxu0 %vm992_vm1, %v4512_v60 }
 0x721   : > { %5993 = vmatpush.xpose.msk.msrb.mxu1 %vm992_vm1, %v4428_v39  ;;  %v4510_v48 = vpop.permute.xlu2 %4509 }
 0x723   : > { %5996 = vmatmul.msk.f32.vlgmr.msrb.gmra.mxu2 %vm992_vm1, %v4454_v33 }
 0x724   : > { %v4398_v9 = vpop.permute.xlu1 %4397 }
 0x725   : > { %5992 = vmatmul.msk.f32.vlgmr.msra.gmra.mxu0 %vm992_vm1, %v4398_v9 }
 0x726   : > { %v8611_v14 = vpop.f32.mrf.mxu3 }
 0x727   : > { %v4568_v42 = vpop.permute.xlu0 %4567  ;;  %v8607_v29 = vpop.f32.mrf.mxu1 }
 0x728   : > { %6003 = vmatpush.xpose.msk.msra.mxu2 %vm992_vm1, %v4568_v42 }
 0x729   : > { %v4540_v11 = vpop.permute.xlu2 %4539 }
 0x72a   : > { %6001 = vmatpush.xpose.msk.msra.mxu1 %vm992_vm1, %v4540_v11 }
 0x72c   : > { %v4426_v43 = vpop.permute.xlu1 %4425 }
 0x72d   : > { %5994 = vmatmul.msk.f32.vlgmr.msrb.gmra.mxu1 %vm992_vm1, %v4426_v43  ;;  %6000 = vmatmul.msk.f32.vlgmr.msrb.gmra.mxu0 %vm992_vm1, %v4510_v48 }
 0x72f   : > { %v4538_v27 = vpop.permute.xlu0 %4537  ;;  %v8615_v4 = vpop.f32.mrf.mxu1 }
 0x731   : > { %v6237_v24 = vpop.permute.xlu2 %6236 }
 0x732   : > { %v6239_v53 = vunpack.i.h.bf16 %v6237_v24  ;;  %v6238_v19 = vunpack.i.l.bf16 %v6237_v24 }
 0x734   : > { %v4566_v55 = vpop.permute.xlu1 %4565  ;;  %4822 = vmatpush.msrb.mxu3 %v6238_v19  ;;  %4848 = vmatpush.msra.mxu0 %v6239_v53 }
 0x735   : > { %6002 = vmatmul.msk.f32.vlgmr.msra.gmra.mxu1 %vm992_vm1, %v4538_v27  ;;  %6004 = vmatmul.msk.f32.vlgmr.msra.gmra.mxu2 %vm992_vm1, %v4566_v55 }
 0x736   : > { %v8619_v40 = vpop.f32.mrf.mxu3 }
 0x737   : > { %v6242_v31 = vpop.permute.xlu0 %6241 }
 0x738   : > { %v8617_v13 = vpop.f32.mrf.mxu0  ;;  %v6244_v1 = vunpack.i.h.bf16 %v6242_v31  ;;  %v6243_v6 = vunpack.i.l.bf16 %v6242_v31 }
 0x73a   : > { %4874 = vmatpush.msrb.mxu1 %v6243_v6  ;;  %4900 = vmatpush.msrb.mxu2 %v6244_v1 }
 0x73c   : > { %v6247_v44 = vpop.permute.xlu1 %6246 }
 0x73d   : > { %v6249_v8 = vunpack.i.h.bf16 %v6247_v44  ;;  %v6248_v12 = vunpack.i.l.bf16 %v6247_v44 }
 0x73e   : > { %v8625_v58 = vpop.f32.mrf.mxu3 }
 0x73f   : > { %4926 = vmatpush.msra.mxu3 %v6248_v12  ;;  %5004 = vmatpush.msra.mxu2 %v6249_v8  ;;  %v8621_v59 = vpop.f32.mrf.mxu1 }
 0x740   : > { %v8623_v2 = vpop.f32.mrf.mxu0 }
 0x749   : > { %v8627_v3 = vpop.f32.mrf.mxu1  ;;  %v4198_v49 = vpop.f32.mrf.mxu0 }
 0x74a   : > { %v4594_v62 = vmul.f32 0.35355338, %v4198_v49 }
 0x74c   : > { %v8633_v46 = vadd.f32 %v8630_v26, %v4594_v62 }
 0x74d   : > { %v8652_v20 = vpop.f32.mrf.mxu2 }
 0x74e   : > { %v4628_v63 = vsel %vm992_vm1, %v8633_v46, -inf  ;;  %v8637_v16 = vpop.f32.mrf.mxu3 }
 0x74f   : > { %4629 = vmax.xlane.f32.xlu2 %v4628_v63 }
 0x751   : > { %v4226_v0 = vpop.f32.mrf.mxu1 }
 0x752   : > { %v4595_v47 = vmul.f32 0.35355338, %v4226_v0 }
 0x754   : > { %v8640_v45 = vadd.f32 %v8630_v26, %v4595_v47 }
 0x756   : > { %v4631_v41 = vsel %vm992_vm1, %v8640_v45, -inf  ;;  %v4170_v33 = vpop.f32.mrf.mxu3 }
 0x757   : > { %4632 = vmax.xlane.f32.xlu0 %v4631_v41  ;;  %v4593_v15 = vmul.f32 0.35355338, %v4170_v33 }
 0x759   : > { %v8645_v18 = vadd.f32 %v8630_v26, %v4593_v15 }
 0x75b   : > { %v4625_v51 = vsel %vm992_vm1, %v8645_v18, -inf }
 0x75c   : > { %4626 = vmax.xlane.f32.xlu1 %v4625_v51 }
 0x75e   : > { %v4282_v22 = vpop.f32.mrf.mxu3 }
 0x75f   : > { %v4597_v32 = vmul.f32 0.35355338, %v4282_v22 }
 0x761   : > { %v8659_v61 = vadd.f32 %v8630_v26, %v4597_v32 }
 0x763   : > { %v4637_v34 = vsel %vm992_vm1, %v8659_v61, -inf }
 0x767   : > { %6251 = vrot.lane.b32.xlu2 %v6250_v7, %s6719_s16 }
 0x779   : > { %v8654_v10 = vpop.f32.mrf.mxu2 }
 0x781   : > { %v8656_v23 = vpop.f32.mrf.mxu2 }
 0x78e   : > { %v8661_v25 = vpop.f32.mrf.mxu2 }
 0x790   : > { %4638 = vmax.xlane.f32.xlu2 %v4637_v34  ;;  %v4394_v49 = vpop.f32.mrf.mxu3 }
 0x791   : > { %v4601_v0 = vmul.f32 0.35355338, %v4394_v49 }
 0x793   : > { %v8696_v15 = vadd.f32 %v8630_v26, %v4601_v0 }
 0x795   : > { %v4310_v52 = vpop.f32.mrf.mxu0  ;;  %v4649_v34 = vsel %vm992_vm1, %v8696_v15, -inf }
 0x796   : > { %v4598_v21 = vmul.f32 0.35355338, %v4310_v52  ;;  %v4254_v30 = vpop.f32.mrf.mxu2 }
 0x798   : > { %v8666_v39 = vadd.f32 %v8630_v26, %v4598_v21  ;;  %v4596_v21 = vmul.f32 0.35355338, %v4254_v30 }
 0x79a   : > { %v4640_v57 = vsel %vm992_vm1, %v8666_v39, -inf }
 0x79b   : > { %4641 = vmax.xlane.f32.xlu0 %v4640_v57 }
 0x79d   : > { %v4338_v60 = vpop.f32.mrf.mxu1 }
 0x79e   : > { %v4599_v48 = vmul.f32 0.35355338, %v4338_v60  ;;  %v4366_v9 = vpop.f32.mrf.mxu2  ;;  %v8711_v60 = vadd.f32 %v8630_v26, %v4596_v21 }
 0x79f   : > { %v4600_v47 = vmul.f32 0.35355338, %v4366_v9 }
 0x7a0   : > { %v8671_v42 = vadd.f32 %v8630_v26, %v4599_v48  ;;  %v4506_v48 = vpop.f32.mrf.mxu3 }
 0x7a1   : > { %v8699_v51 = vadd.f32 %v8630_v26, %v4600_v47  ;;  %v4605_v9 = vmul.f32 0.35355338, %v4506_v48 }
 0x7a2   : > { %v4422_v11 = vpop.f32.mrf.mxu0  ;;  %v4643_v43 = vsel %vm992_vm1, %v8671_v42, -inf }
 0x7a3   : > { %v4602_v27 = vmul.f32 0.35355338, %v4422_v11  ;;  %4644 = vmax.xlane.f32.xlu0 %v4643_v43  ;;  %v4646_v32 = vsel %vm992_vm1, %v8699_v51, -inf  ;;  %v4634_v11 = vsel %vm992_vm1, %v8711_v60, -inf }
 0x7a5   : > { %v8676_v24 = vadd.f32 %v8630_v26, %v4602_v27  ;;  %v6255_v27 = vpack.i.bf16 %v7621_v38, %v7484_v54 }
 0x7a6   : > { %v4478_v53 = vpop.f32.mrf.mxu2 }
 0x7a7   : > { %v4604_v19 = vmul.f32 0.35355338, %v4478_v53  ;;  %v4652_v55 = vsel %vm992_vm1, %v8676_v24, -inf  ;;  %v8718_v53 = vadd.f32 %v8630_v26, %v4605_v9 }
 0x7a8   : > { %4653 = vmax.xlane.f32.xlu1 %v4652_v55 }
 0x7a9   : > { %v8681_v31 = vadd.f32 %v8630_v26, %v4604_v19 }
 0x7aa   : > { %v4450_v1 = vpop.f32.mrf.mxu1  ;;  %v4534_v6 = vpop.f32.mrf.mxu0 }
 0x7ab   : > { %v4603_v44 = vmul.f32 0.35355338, %v4450_v1  ;;  %v4606_v8 = vmul.f32 0.35355338, %v4534_v6  ;;  %v4658_v12 = vsel %vm992_vm1, %v8681_v31, -inf  ;;  %v4661_v1 = vsel %vm992_vm1, %v8718_v53, -inf }
 0x7ac   : > { %4659 = vmax.xlane.f32.xlu2 %v4658_v12 }
 0x7ad   : > { %v8686_v62 = vadd.f32 %v8630_v26, %v4603_v44  ;;  %v8689_v63 = vadd.f32 %v8630_v26, %v4606_v8 }
 0x7af   : > { %v4655_v41 = vsel %vm992_vm1, %v8686_v62, -inf  ;;  %v4664_v33 = vsel %vm992_vm1, %v8689_v63, -inf }
 0x7b0   : > { %4656 = vmax.xlane.f32.xlu0 %v4655_v41  ;;  %4665 = vmax.xlane.f32.xlu1 %v4664_v33 }
 0x7b2   : > { %v4562_v7 = vpop.f32.mrf.mxu1 }
 0x7b3   : > { %v4607_v22 = vmul.f32 0.35355338, %v4562_v7 }
 0x7b5   : > { %v8706_v52 = vadd.f32 %v8630_v26, %v4607_v22 }
 0x7b7   : > { %v4667_v57 = vsel %vm992_vm1, %v8706_v52, -inf }
 0x7b8   : > { %4647 = vmax.xlane.f32.xlu0 %v4646_v32  ;;  %4650 = vmax.xlane.f32.xlu1 %v4649_v34  ;;  %v4590_v49 = vpop.f32.mrf.mxu2 }
 0x7c0   : > { %4668 = vmax.xlane.f32.xlu1 %v4667_v57 }
 0x7c2   : > { %v4630_v12 = vpop.xlane.xlu2 %4629 }
 0x7c3   : > { %v4674_v0 = vsub.f32 %v8633_v46, %v4630_v12 }
 0x7c5   : > { %v4691_v47 = vmul.f32 1.442695, %v4674_v0 }
 0x7c8   : > { %4635 = vmax.xlane.f32.xlu1 %v4634_v11 }
 0x7ca   : > { %v4633_v43 = vpop.xlane.xlu0 %4632  ;;  %v8743_v32 = vpop.permute.xlu2 %6251 }
 0x7cb   : > { %v4675_v30 = vsub.f32 %v8640_v45, %v4633_v43 }
 0x7cc   : > { %6256 = vrot.lane.b32.xlu0 %v6255_v27, %s6719_s16 }
 0x7cd   : > { %v4693_v19 = vmul.f32 1.442695, %v4675_v30 }
 0x7cf   : > { %6471 = vpow2.f32 %v4693_v19  ;;  %v4627_v55 = vpop.xlane.xlu1 %4626 }
 0x7d0   : > { %v4673_v6 = vsub.f32 %v8645_v18, %v4627_v55  ;;  %4662 = vmax.xlane.f32.xlu1 %v4661_v1  ;;  %v4608_v18 = vmul.f32 0.35355338, %v4590_v49 }
 0x7d2   : > { %v4689_v44 = vmul.f32 1.442695, %v4673_v6  ;;  %v8735_v41 = vadd.f32 %v8630_v26, %v4608_v18 }
 0x7d4   : > { %6473 = vpow2.f32 %v4689_v44  ;;  %v4670_v33 = vsel %vm992_vm1, %v8735_v41, -inf }
 0x7d5   : > { %v8725_v8 = vpop.eup %6471  ;;  %6475 = vpow2.f32 %v4691_v47 }
 0x7d6   : > { %v4727_v54 = vsel %vm992_vm1, %v8725_v8, 0.0 }
 0x7d8   : > { %4728 = vadd.xlane.f32.xlu1 %v4727_v54 }
 0x7da   : > { %v8729_v38 = vpop.eup %6473 }
 0x7db   : > { %v4721_v45 = vsel %vm992_vm1, %v8729_v38, 0.0  ;;  %v8739_v7 = vpop.eup %6475 }
 0x7dc   : > { %4722 = vadd.xlane.f32.xlu2 %v4721_v45  ;;  %v4724_v22 = vsel %vm992_vm1, %v8739_v7, 0.0 }
 0x7f6   : > { %4671 = vmax.xlane.f32.xlu0 %v4670_v33 }
 0x7fe   : > { %4725 = vadd.xlane.f32.xlu0 %v4724_v22 }
 0x803   : > { %v4639_v34 = vpop.xlane.xlu2 %4638 }
 0x804   : > { %v4677_v26 = vsub.f32 %v8659_v61, %v4639_v34 }
 0x806   : > { %v4697_v48 = vmul.f32 1.442695, %v4677_v26 }
 0x80e   : > { %v4642_v46 = vpop.xlane.xlu0 %4641 }
 0x80f   : > { %v4678_v21 = vsub.f32 %v8666_v39, %v4642_v46 }
 0x811   : > { %v4699_v57 = vmul.f32 1.442695, %v4678_v21 }
 0x813   : > { %6477 = vpow2.f32 %v4699_v57 }
 0x814   : > { %6479 = vpow2.f32 %v4697_v48 }
 0x816   : > { %v4645_v9 = vpop.xlane.xlu0 %4644 }
 0x817   : > { %v4679_v11 = vsub.f32 %v8671_v42, %v4645_v9 }
 0x819   : > { %v8748_v43 = vpop.eup %6477  ;;  %v4701_v27 = vmul.f32 1.442695, %v4679_v11 }
 0x81a   : > { %v4736_v30 = vsel %vm992_vm1, %v8748_v43, 0.0  ;;  %v8753_v61 = vpop.eup %6479 }
 0x81b   : > { %6481 = vpow2.f32 %v4701_v27  ;;  %v4654_v19 = vpop.xlane.xlu1 %4653  ;;  %4737 = vadd.xlane.f32.xlu1 %v4736_v30  ;;  %v4733_v42 = vsel %vm992_vm1, %v8753_v61, 0.0 }
 0x81c   : > { %v4682_v39 = vsub.f32 %v8676_v24, %v4654_v19 }
 0x81e   : > { %v4707_v55 = vmul.f32 1.442695, %v4682_v39 }
 0x820   : > { %6483 = vpow2.f32 %v4707_v55 }
 0x821   : > { %v8755_v1 = vpop.eup %6481 }
 0x822   : > { %v4739_v6 = vsel %vm992_vm1, %v8755_v1, 0.0 }
 0x823   : > { %v8761_v44 = vpop.xlane.xlu1 %4665  ;;  %4734 = vadd.xlane.f32.xlu1 %v4733_v42  ;;  %4740 = vadd.xlane.f32.xlu0 %v4739_v6  ;;  %v4657_v54 = vpop.xlane.xlu0 %4656 }
 0x824   : > { %v4683_v47 = vsub.f32 %v8686_v62, %v4657_v54 }
 0x826   : > { %v8763_v45 = vpop.eup %6483  ;;  %v4709_v34 = vmul.f32 1.442695, %v4683_v47 }
 0x827   : > { %v4748_v24 = vsel %vm992_vm1, %v8763_v45, 0.0 }
 0x828   : > { %4749 = vadd.xlane.f32.xlu2 %v4748_v24 }
 0x82b   : > { %v4651_v12 = vpop.xlane.xlu1 %4650  ;;  %v4648_v49 = vpop.xlane.xlu0 %4647 }
 0x82c   : > { %v4681_v0 = vsub.f32 %v8696_v15, %v4651_v12  ;;  %v4680_v18 = vsub.f32 %v8699_v51, %v4648_v49 }
 0x82e   : > { %v4705_v33 = vmul.f32 1.442695, %v4681_v0  ;;  %v4703_v22 = vmul.f32 1.442695, %v4680_v18 }
 0x830   : > { %6485 = vpow2.f32 %v4705_v33  ;;  %v9436_v33 = vld [vmem:[#allocation77_spill] sm:$0xff] }
 0x831   : > { %6487 = vpow2.f32 %v4703_v22 }
 0x832   : > { %6489 = vpow2.f32 %v4709_v34 }
 0x833   : > { %v4669_v46 = vpop.xlane.xlu1 %4668 }
 0x834   : > { %v4687_v42 = vsub.f32 %v8706_v52, %v4669_v46 }
 0x836   : > { %v8770_v21 = vpop.eup %6485  ;;  %v4717_v24 = vmul.f32 1.442695, %v4687_v42 }
 0x837   : > { %v8772_v26 = vpop.eup %6487  ;;  %v4745_v57 = vsel %vm992_vm1, %v8770_v21, 0.0 }
 0x838   : > { %4746 = vadd.xlane.f32.xlu0 %v4745_v57  ;;  %v4742_v15 = vsel %vm992_vm1, %v8772_v26, 0.0  ;;  %v8778_v51 = vpop.eup %6489 }
 0x839   : > { %4743 = vadd.xlane.f32.xlu1 %v4742_v15  ;;  %v4751_v30 = vsel %vm992_vm1, %v8778_v51, 0.0  ;;  %v6253_v15 = vunpack.i.l.bf16 %v8743_v32 }
 0x83b   : > { %v4636_v62 = vpop.xlane.xlu1 %4635 }
 0x83c   : > { %v4676_v48 = vsub.f32 %v8711_v60, %v4636_v62  ;;  %v4660_v60 = vpop.xlane.xlu2 %4659 }
 0x83d   : > { %v4684_v0 = vsub.f32 %v8681_v31, %v4660_v60 }
 0x83e   : > { %v4695_v9 = vmul.f32 1.442695, %v4676_v48  ;;  %v8781_v11 = vpop.permute.xlu0 %6256  ;;  %v4686_v48 = vsub.f32 %v8689_v63, %v8761_v44  ;;  %v6270_v44 = vpack.i.bf16 %v7718_v56, %v7701_v5  ;;  %v9437_v5 = vld [vmem:[#allocation67_spill] sm:$0xff] }
 0x83f   : > { %v6258_v27 = vunpack.i.l.bf16 %v8781_v11  ;;  %v4711_v47 = vmul.f32 1.442695, %v4684_v0 }
 0x840   : > { %6491 = vpow2.f32 %v4695_v9  ;;  %4752 = vadd.xlane.f32.xlu0 %v4751_v30  ;;  %v4715_v30 = vmul.f32 1.442695, %v4686_v48 }
 0x841   : > { %4952 = vmatpush.msrb.mxu0 %v6258_v27 }
 0x843   : > { %v4663_v19 = vpop.xlane.xlu1 %4662 }
 0x844   : > { %v4685_v39 = vsub.f32 %v8718_v53, %v4663_v19 }
 0x846   : > { %v8787_v55 = vpop.eup %6491  ;;  %v4713_v6 = vmul.f32 1.442695, %v4685_v39 }
 0x847   : > { %v4730_v54 = vsel %vm992_vm1, %v8787_v55, 0.0 }
 0x848   : > { %6493 = vpow2.f32 %v4713_v6  ;;  %4731 = vadd.xlane.f32.xlu2 %v4730_v54 }
 0x84b   : > { %v4729_v12 = vpop.xlane.xlu1 %4728 }
 0x84c   : > { %6495 = vrcp.f32 %v4729_v12 }
 0x84d   : > { %6497 = vpow2.f32 %v4717_v24 }
 0x84e   : > { %v8792_v49 = vpop.eup %6493 }
 0x84f   : > { %v4723_v53 = vpop.xlane.xlu2 %4722  ;;  %v4757_v18 = vsel %vm992_vm1, %v8792_v49, 0.0 }
 0x850   : > { %6499 = vrcp.f32 %v4723_v53  ;;  %4758 = vadd.xlane.f32.xlu2 %v4757_v18 }
 0x851   : > { %6501 = vpow2.f32 %v4711_v47 }
 0x852   : > { %v6496_v52 = vpop.eup %6495  ;;  %6261 = vrot.lane.b32.xlu1 %v9436_v33, %s6719_s16  ;;  %v6254_v33 = vunpack.i.h.bf16 %v8743_v32 }
 0x853   : > { %v4787_v22 = vmul.f32 %v6496_v52, %v8725_v8  ;;  %v8800_v34 = vpop.eup %6497 }
 0x854   : > { %v4763_v57 = vsel %vm992_vm1, %v8800_v34, 0.0 }
 0x855   : > { %6007 = vmatmul.msk.f32.vlgmr.msrb.gmra.mxu1 %vm992_vm1, %v4787_v22 }
 0x856   : > { %v6500_v46 = vpop.eup %6499 }
 0x857   : > { %v4785_v31 = vmul.f32 %v6500_v46, %v8729_v38  ;;  %v8808_v62 = vpop.eup %6501 }
 0x858   : > { %4764 = vadd.xlane.f32.xlu2 %v4763_v57  ;;  %v4754_v8 = vsel %vm992_vm1, %v8808_v62, 0.0 }
 0x859   : > { %6005 = vmatmul.msk.f32.vlgmr.msrb.gmra.mxu3 %vm992_vm1, %v4785_v31 }
 0x85a   : > { %5030 = vmatpush.msrb.mxu3 %v6253_v15 }
 0x860   : > { %4755 = vadd.xlane.f32.xlu2 %v4754_v8 }
 0x869   : > { %v4672_v9 = vpop.xlane.xlu0 %4671 }
 0x86a   : > { %v4688_v38 = vsub.f32 %v8735_v41, %v4672_v9 }
 0x86c   : > { %v4719_v27 = vmul.f32 1.442695, %v4688_v38 }
 0x86e   : > { %6503 = vpow2.f32 %v4719_v27 }
 0x86f   : > { %6505 = vpow2.f32 %v4715_v30 }
 0x871   : > { %v4726_v19 = vpop.xlane.xlu0 %4725 }
 0x872   : > { %6507 = vrcp.f32 %v4726_v19 }
 0x874   : > { %v8815_v39 = vpop.eup %6503 }
 0x875   : > { %v4766_v42 = vsel %vm992_vm1, %v8815_v39, 0.0  ;;  %v8819_v6 = vpop.eup %6505 }
 0x876   : > { %4767 = vadd.xlane.f32.xlu0 %v4766_v42  ;;  %v4760_v41 = vsel %vm992_vm1, %v8819_v6, 0.0 }
 0x878   : > { %v6508_v60 = vpop.eup %6507  ;;  %6266 = vrot.lane.b32.xlu2 %v8114_v37, %s6719_s16 }
 0x879   : > { %v4786_v63 = vmul.f32 %v6508_v60, %v8739_v7 }
 0x87b   : > { %6006 = vmatmul.msk.f32.vlgmr.msra.gmra.mxu0 %vm992_vm1, %v4786_v63  ;;  %v9442_v63 = vld [vmem:[#allocation81_spill] sm:$0xff] }
 0x87c   : > { %4761 = vadd.xlane.f32.xlu1 %v4760_v41 }
 0x880   : > { %5233 = vrot.lane.b32.xlu2 %v8239_v36, %s6720_s11 }
 0x888   : > { %5299 = vrot.lane.b32.xlu2 %v8601_v35, %s6721_s21 }
 0x88a   : > { %6271 = vrot.lane.b32.xlu0 %v6270_v44, %s6719_s16  ;;  %s5610_s16 = scalar_lea.hbm %s9468_s28, %s6045_s10 }
 0x88b   : > { %s5613_s19 = sshll.u32 %s5610_s16, 4  ;;  %s5614_s19 = int_to_ptr.hbm [resolvable:$true] %s5613_s19 }
 0x88c   : > { %s6641_s3 = sshra.s32 %s5614_s19, 4  ;;  %s6642_s3 = int_to_ptr.hbm [resolvable:$true] %s6641_s3 }
 0x88d   : > { %s6643_s12 = scalar_lea.hbm %s6642_s3, 128  ;;  %p6648_p8 = scmp.lt.s32.totalorder %s6642_s3, %s9468_s28 }
 0x88e   : > { %v4738_v37 = vpop.xlane.xlu1 %4737  ;;  %p6644_p5 = scmp.ne.s32.totalorder %s6642_s3, %s6643_s12  ;;  %p6649_p10 = scmp.lt.s32.totalorder %s6647_s20, %s6643_s12 }
 0x88f   : > { %6509 = vrcp.f32 %v4738_v37 }
 0x890   : > { %5237 = vrot.lane.b32.xlu2 %v8243_v28, %s6720_s11  ;;  %v9438_v28 = vld [vmem:[#allocation64_spill] sm:$0xff]  ;;  %p6645_p6 = pnand %p6644_p5, %p6844_p9  ;;  %p6650_p13 = por %p6649_p10, %p6648_p8 }
 0x892   : > { %5235 = vrot.lane.b32.xlu0 %v8241_v50, %s6720_s11  ;;  %p6646_p7 = pneg %p6645_p6 }
 0x894   : > { %p6651_p0 = pnand %p6650_p13, %p6646_p7 }
 0x895   : > { %v6510_v7 = vpop.eup %6509  ;;  %5297 = vrot.lane.b32.xlu1 %v8611_v14, %s6721_s21  ;;  %v6259_v14 = vunpack.i.h.bf16 %v8781_v11 }
 0x896   : > { %v4790_v36 = vmul.f32 %v6510_v7, %v8748_v43  ;;  %v4735_v35 = vpop.xlane.xlu1 %4734  ;;  %v9439_v43 = vld [vmem:[#allocation22_spill] sm:$0xff]  ;;  %v4741_v54 = vpop.xlane.xlu0 %4740 }
 0x897   : > { %6511 = vrcp.f32 %v4735_v35 }
 0x898   : > { %5239 = vrot.lane.b32.xlu2 %v9437_v5, %s6720_s11  ;;  %6010 = vmatmul.msk.f32.vlgmr.msrb.gmra.mxu0 %vm992_vm1, %v4790_v36 }
 0x89a   : > { %5301 = vrot.lane.b32.xlu0 %v8607_v29, %s6721_s21  ;;  %v9440_v29 = vld [vmem:[#allocation45_spill] sm:$0xff] }
 0x89b   : > { %v4750_v11 = vpop.xlane.xlu2 %4749 }
 0x89d   : > { %v6512_v56 = vpop.eup %6511  ;;  %5255 = vrot.lane.b32.xlu1 %v9438_v28, %s6720_s11 }
 0x89e   : > { %v4789_v50 = vmul.f32 %v6512_v56, %v8753_v61 }
 0x8a0   : > { %5241 = vrot.lane.b32.xlu2 %v9439_v43, %s6720_s11  ;;  %6009 = vmatmul.msk.f32.vlgmr.msra.gmra.mxu3 %vm992_vm1, %v4789_v50 }
 0x8a1   : > { %5134 = vmatpush.msra.mxu3 %v6259_v14 }
 0x8a2   : > { %5303 = vrot.lane.b32.xlu0 %v8652_v20, %s6721_s21 }
 0x8a8   : > { %5243 = vrot.lane.b32.xlu2 %v9440_v29, %s6720_s11 }
 0x8aa   : > { %5305 = vrot.lane.b32.xlu0 %v8619_v40, %s6721_s21 }
 0x8ab   : > { %v4747_v24 = vpop.xlane.xlu0 %4746 }
 0x8ac   : > { %6513 = vrcp.f32 %v4747_v24  ;;  %v4744_v0 = vpop.xlane.xlu1 %4743  ;;  %v9444_v24 = vld [vmem:[#allocation75_spill] sm:$0xff] }
 0x8ad   : > { %6515 = vrcp.f32 %v4741_v54 }
 0x8b2   : > { %v6514_v61 = vpop.eup %6513  ;;  %5307 = vrot.lane.b32.xlu0 %v8609_v17, %s6721_s21 }
 0x8b3   : > { %v4793_v12 = vmul.f32 %v6514_v61, %v8770_v21  ;;  %v6516_v53 = vpop.eup %6515 }
 0x8b4   : > { %v4791_v46 = vmul.f32 %v6516_v53, %v8755_v1  ;;  %v4753_v1 = vpop.xlane.xlu0 %4752  ;;  %v9445_v53 = vld [vmem:[#allocation59_spill] sm:$0xff] }
 0x8b5   : > { %6013 = vmatmul.msk.f32.vlgmr.msrb.gmra.mxu3 %vm992_vm1, %v4793_v12 }
 0x8bb   : > { %v4732_v20 = vpop.xlane.xlu2 %4731 }
 0x8bc   : > { %6517 = vrcp.f32 %v4732_v20  ;;  %v5459_v20 = vld [vmem:[%s9443_s9] sm:$0xff] }
 0x8bd   : > { %6519 = vrcp.f32 %v4750_v11 }
 0x8be   : > { %6521 = vrcp.f32 %v4744_v0 }
 0x8c2   : > { %v6518_v18 = vpop.eup %6517 }
 0x8c3   : > { %v6520_v40 = vpop.eup %6519  ;;  %v4788_v52 = vmul.f32 %v6518_v18, %v8787_v55  ;;  %v4759_v47 = vpop.xlane.xlu2 %4758 }
 0x8c4   : > { %6523 = vrcp.f32 %v4759_v47  ;;  %v6262_v17 = vpop.permute.xlu1 %6261  ;;  %v4794_v31 = vmul.f32 %v6520_v40, %v8763_v45  ;;  %v6522_v57 = vpop.eup %6521  ;;  %v9446_v47 = vld [vmem:[#allocation42_spill] sm:$0xff] }
 0x8c5   : > { %v6264_v22 = vunpack.i.h.bf16 %v6262_v17  ;;  %v6263_v21 = vunpack.i.l.bf16 %v6262_v17  ;;  %6008 = vmatmul.msk.f32.vlgmr.msrb.gmra.mxu2 %vm992_vm1, %v4788_v52  ;;  %v4792_v32 = vmul.f32 %v6522_v57, %v8772_v26  ;;  %6525 = vrcp.f32 %v4753_v1  ;;  %v9448_v17 = vld [vmem:[#allocation26_spill] sm:$0xff]  ;;  %v9451_v1 = vld [vmem:[#allocation73_spill] sm:$0xff] }
 0x8c6   : > { %5108 = vmatpush.msrb.mxu2 %v6254_v33 }
 0x8c7   : > { %4978 = vmatpush.msra.mxu1 %v6263_v21  ;;  %5056 = vmatpush.msra.mxu0 %v6264_v22 }
 0x8c8   : > { %6011 = vmatmul.msk.f32.vlgmr.msra.gmra.mxu1 %vm992_vm1, %v4791_v46  ;;  %6014 = vmatmul.msk.f32.vlgmr.msra.gmra.mxu0 %vm992_vm1, %v4794_v31 }
 0x8ca   : > { %v6524_v55 = vpop.eup %6523 }
 0x8cb   : > { %v4797_v15 = vmul.f32 %v6524_v55, %v8792_v49  ;;  %v4765_v8 = vpop.xlane.xlu2 %4764  ;;  %v6526_v9 = vpop.eup %6525  ;;  %v9441_v49 = vld [vmem:[#allocation66_spill] sm:$0xff] }
 0x8cc   : > { %v4795_v60 = vmul.f32 %v6526_v9, %v8778_v51 }
 0x8cd   : > { %6012 = vmatmul.msk.f32.vlgmr.msra.gmra.mxu2 %vm992_vm1, %v4792_v32  ;;  %6017 = vmatmul.msk.f32.vlgmr.msra.gmra.mxu3 %vm992_vm1, %v4797_v15 }
 0x8d2   : > { %v4876_v45 = vpop.f32.mrf.mxu1 }
 0x8d3   : > { %v4756_v48 = vpop.xlane.xlu2 %4755  ;;  %5365 = vrot.lane.b32.xlu1 %v4876_v45, %s6722_s23 }
 0x8d4   : > { %6527 = vrcp.f32 %v4756_v48 }
 0x8da   : > { %v6528_v38 = vpop.eup %6527 }
 0x8db   : > { %v4796_v27 = vmul.f32 %v6528_v38, %v8808_v62  ;;  %v6267_v26 = vpop.permute.xlu2 %6266  ;;  %5257 = vrot.lane.b32.xlu1 %v9441_v49, %s6720_s11  ;;  %v9453_v49 = vld [vmem:[#allocation61_spill] sm:$0xff] }
 0x8dc   : > { %v4824_v30 = vpop.f32.mrf.mxu3  ;;  %v6269_v19 = vunpack.i.h.bf16 %v6267_v26  ;;  %v6268_v42 = vunpack.i.l.bf16 %v6267_v26  ;;  %v9452_v26 = vld [vmem:[#allocation44_spill] sm:$0xff] }
 0x8dd   : > { %5361 = vrot.lane.b32.xlu2 %v4824_v30, %s6722_s23  ;;  %6016 = vmatmul.msk.f32.vlgmr.msrb.gmra.mxu2 %vm992_vm1, %v4796_v27 }
 0x8de   : > { %5082 = vmatpush.msrb.mxu1 %v6268_v42  ;;  %5160 = vmatpush.msrb.mxu0 %v6269_v19 }
 0x8df   : > { %6015 = vmatmul.msk.f32.vlgmr.msrb.gmra.mxu1 %vm992_vm1, %v4795_v60 }
 0x8e3   : > { %5259 = vrot.lane.b32.xlu1 %v9442_v63, %s6720_s11  ;;  %v8884_v41 = vpop.permute.xlu2 %5233 }
 0x8e9   : > { %v4768_v44 = vpop.xlane.xlu0 %4767 }
 0x8eb   : > { %v8889_v5 = vpop.permute.xlu2 %5299 }
 0x8ef   : > { %v4762_v62 = vpop.xlane.xlu1 %4761 }
 0x8f0   : > { %6529 = vrcp.f32 %v4762_v62 }
 0x8f1   : > { %6531 = vrcp.f32 %v4765_v8  ;;  %v9450_v8 = vld [vmem:[#allocation43_spill] sm:$0xff] }
 0x8f2   : > { %6533 = vrcp.f32 %v4768_v44  ;;  %v9454_v44 = vld [vmem:[#allocation25_spill] sm:$0xff] }
 0x8f3   : > { %v8897_v54 = vpop.permute.xlu2 %5237 }
 0x8f4   : > { %v5411_v30 = vsel %vm992_vm1, %v9453_v49, %v8897_v54 }
 0x8f6   : > { %v6530_v37 = vpop.eup %6529 }
 0x8f7   : > { %v4798_v51 = vmul.f32 %v6530_v37, %v8819_v6  ;;  %v6532_v36 = vpop.eup %6531 }
 0x8f8   : > { %v4850_v7 = vpop.f32.mrf.mxu0  ;;  %v6534_v35 = vpop.eup %6533  ;;  %v4799_v14 = vmul.f32 %v6532_v36, %v8800_v34  ;;  %v8993_v36 = vld [vmem:[%s9456_s17] ss:$0 sm:$0xff] }
 0x8f9   : > { %6018 = vmatmul.msk.f32.vlgmr.msrb.gmra.mxu0 %vm992_vm1, %v4798_v51  ;;  %5363 = vrot.lane.b32.xlu0 %v4850_v7, %s6722_s23  ;;  %v4800_v43 = vmul.f32 %v6534_v35, %v8815_v39  ;;  %v5462_v39 = vld [vmem:[%s9443_s9 + $0x18] sm:$0xff]  ;;  %v9455_v51 = vld [vmem:[#allocation47_spill] sm:$0xff] }
 0x8fa   : > { %5527 = vmatpush.msra.mxu0 %v5462_v39  ;;  %6070 = vmatpush.msrb.mxu3 %v5462_v39 }
 0x8fb   : > { %v5240_v34 = vpop.permute.xlu2 %5239 }
 0x8fc   : > { %v6272_v56 = vpop.permute.xlu0 %6271  ;;  %v5412_v61 = vsel %vm992_vm1, %v9444_v24, %v5240_v34 }
 0x8fd   : > { %v6274_v28 = vunpack.i.h.bf16 %v6272_v56  ;;  %v6273_v50 = vunpack.i.l.bf16 %v6272_v56 }
 0x8ff   : > { %5186 = vmatpush.msra.mxu1 %v6273_v50  ;;  %5212 = vmatpush.msra.mxu2 %v6274_v28 }
 0x900   : > { %6019 = vmatmul.msk.f32.vlgmr.msra.gmra.mxu1 %vm992_vm1, %v4799_v14  ;;  %6020 = vmatmul.msk.f32.vlgmr.msra.gmra.mxu2 %vm992_vm1, %v4800_v43 }
 0x901   : > { %5319 = vrot.lane.b32.xlu0 %v8656_v23, %s6721_s21  ;;  %v5461_v23 = vld [vmem:[%s9443_s9 + $0x10] sm:$0xff] }
 0x902   : > { %5528 = vmatpush.msra.mxu0 %v5461_v23  ;;  %6071 = vmatpush.msrb.mxu3 %v5461_v23 }
 0x903   : > { %v5242_v0 = vpop.permute.xlu2 %5241 }
 0x904   : > { %v5236_v6 = vpop.permute.xlu0 %5235  ;;  %v5413_v18 = vsel %vm992_vm1, %v9445_v53, %v5242_v0 }
 0x907   : > { %v5298_v21 = vpop.permute.xlu1 %5297 }
 0x909   : > { %5309 = vrot.lane.b32.xlu0 %v8615_v4, %s6721_s21  ;;  %v5460_v4 = vld [vmem:[%s9443_s9 + $0x8] sm:$0xff] }
 0x90a   : > { %5529 = vmatpush.msra.mxu0 %v5460_v4  ;;  %6072 = vmatpush.msrb.mxu3 %v5460_v4 }
 0x90b   : > { %v8941_v22 = vpop.permute.xlu2 %5243 }
 0x90c   : > { %v8901_v29 = vpop.permute.xlu0 %5301  ;;  %5530 = vmatpush.msra.mxu0 %v5459_v20  ;;  %6073 = vmatpush.msrb.mxu3 %v5459_v20 }
 0x90d   : > { %v5428_v19 = vsel %vm5425_vm3, %v5411_v30, %v8901_v29 }
 0x90f   : > { %v5256_v48 = vpop.permute.xlu1 %5255 }
 0x911   : > { %5321 = vrot.lane.b32.xlu0 %v8637_v16, %s6721_s21 }
 0x914   : > { %v5304_v11 = vpop.permute.xlu0 %5303 }
 0x915   : > { %v8917_v16 = vsel %vm5425_vm3, %v5412_v61, %v5304_v11  ;;  %v4954_v12 = vpop.f32.mrf.mxu0 }
 0x916   : > { %5371 = vrot.lane.b32.xlu2 %v4954_v12, %s6722_s23 }
 0x919   : > { %5311 = vrot.lane.b32.xlu0 %v8654_v10, %s6721_s21  ;;  %v9447_v10 = vld [vmem:[#allocation70_spill] sm:$0xff] }
 0x91c   : > { %v5306_v40 = vpop.permute.xlu0 %5305 }
 0x91d   : > { %v8928_v52 = vsel %vm5425_vm3, %v5413_v18, %v5306_v40 }
 0x91e   : > { %5245 = vrot.lane.b32.xlu2 %v9446_v47, %s6720_s11 }
 0x921   : > { %5323 = vrot.lane.b32.xlu0 %v8623_v2, %s6721_s21  ;;  %v9449_v2 = vld [vmem:[#allocation62_spill] sm:$0xff] }
 0x922   : > { %v5409_v46 = vsel %vm992_vm1, %v9449_v2, %v8884_v41 }
 0x923   : > { %v4928_v33 = vpop.f32.mrf.mxu3  ;;  %v5426_v31 = vsel %vm5425_vm3, %v5409_v46, %v5298_v21 }
 0x924   : > { %5369 = vrot.lane.b32.xlu1 %v4928_v33, %s6722_s23 }
 0x926   : > { %5247 = vrot.lane.b32.xlu2 %v9447_v10, %s6720_s11  ;;  %v9457_v10 = vld [vmem:[#allocation72_spill] sm:$0xff] }
 0x929   : > { %5313 = vrot.lane.b32.xlu0 %v8625_v58, %s6721_s21 }
 0x92e   : > { %5249 = vrot.lane.b32.xlu2 %v9448_v17, %s6720_s11  ;;  %v9458_v17 = vld [vmem:[#allocation65_spill] sm:$0xff] }
 0x92f   : > { %v5420_v21 = vsel %vm992_vm1, %v9458_v17, %v5256_v48 }
 0x931   : > { %5325 = vrot.lane.b32.xlu0 %v8627_v3, %s6721_s21 }
 0x937   : > { %v5362_v57 = vpop.permute.xlu2 %5361 }
 0x938   : > { %v5443_v55 = vsel %vm5442_vm4, %v5426_v31, %v5362_v57  ;;  %v5032_v15 = vpop.f32.mrf.mxu3 }
 0x939   : > { %6021 = vmatmul.msk.f32.vlgmr.msra.gmra.mxu0 %vm877_vm2, %v5443_v55  ;;  %5315 = vrot.lane.b32.xlu0 %v8617_v13, %s6721_s21  ;;  %v8962_v13 = vpop.permute.xlu0 %5307 }
 0x941   : > { %5327 = vrot.lane.b32.xlu0 %v8661_v25, %s6721_s21  ;;  %v5410_v25 = vsel %vm992_vm1, %v9451_v1, %v5236_v6 }
 0x945   : > { %v4980_v58 = vpop.f32.mrf.mxu1  ;;  %v5058_v45 = vpop.f32.mrf.mxu0 }
 0x946   : > { %5373 = vrot.lane.b32.xlu2 %v4980_v58, %s6722_s23  ;;  %v5366_v27 = vpop.permute.xlu1 %5365 }
 0x947   : > { %v5445_v42 = vsel %vm5442_vm4, %v5428_v19, %v5366_v27  ;;  %v9462_v27 = vld [vmem:[#allocation55_spill] sm:$0xff] }
 0x948   : > { %v4902_v3 = vpop.f32.mrf.mxu2 }
 0x949   : > { %5317 = vrot.lane.b32.xlu0 %v8621_v59, %s6721_s21  ;;  %v5427_v59 = vsel %vm5425_vm3, %v5410_v25, %v8889_v5 }
 0x94e   : > { %v5258_v50 = vpop.permute.xlu1 %5257 }
 0x950   : > { %v5006_v32 = vpop.f32.mrf.mxu2  ;;  %v5136_v63 = vpop.f32.mrf.mxu3 }
 0x951   : > { %5375 = vrot.lane.b32.xlu2 %v5006_v32, %s6722_s23  ;;  %v9460_v32 = vld [vmem:[#allocation54_spill] sm:$0xff] }
 0x956   : > { %v5260_v6 = vpop.permute.xlu1 %5259 }
 0x959   : > { %5377 = vrot.lane.b32.xlu2 %v5032_v15, %s6722_s23 }
 0x95c   : > { %v5084_v41 = vpop.f32.mrf.mxu1 }
 0x960   : > { %v5110_v62 = vpop.f32.mrf.mxu2 }
 0x961   : > { %5251 = vrot.lane.b32.xlu2 %v9450_v8, %s6720_s11 }
 0x969   : > { %5379 = vrot.lane.b32.xlu2 %v5058_v45, %s6722_s23 }
 0x96b   : > { %v5364_v9 = vpop.permute.xlu0 %5363 }
 0x96c   : > { %v5444_v38 = vsel %vm5442_vm4, %v5427_v59, %v5364_v9  ;;  %v9461_v9 = vld [vmem:[#allocation71_spill] sm:$0xff] }
 0x96d   : > { %6022 = vmatmul.msk.f32.gmra.mxu0 %vm877_vm2, %v5444_v38  ;;  %v5422_v38 = vsel %vm992_vm1, %v9461_v9, %v5260_v6  ;;  %v9466_v6 = vld [vmem:[#allocation69_spill] sm:$0xff] }
 0x970   : > { %v5372_v56 = vpop.permute.xlu2 %5371 }
 0x971   : > { %5253 = vrot.lane.b32.xlu2 %v9452_v26, %s6720_s11 }
 0x973   : > { %v5320_v28 = vpop.permute.xlu0 %5319 }
 0x974   : > { %v5437_v31 = vsel %vm5425_vm3, %v5420_v21, %v5320_v28 }
 0x975   : > { %6023 = vmatmul.msk.f32.gmra.mxu0 %vm877_vm2, %v5445_v42 }
 0x976   : > { %v5162_v60 = vpop.f32.mrf.mxu0 }
 0x977   : > { %5387 = vrot.lane.b32.xlu1 %v5162_v60, %s6722_s23 }
 0x978   : > { %v5246_v14 = vpop.permute.xlu2 %5245 }
 0x979   : > { %v5415_v15 = vsel %vm992_vm1, %v9460_v32, %v5246_v14  ;;  %v9465_v14 = vld [vmem:[#allocation49_spill] sm:$0xff] }
 0x97b   : > { %v5310_v43 = vpop.permute.xlu0 %5309 }
 0x97c   : > { %v5432_v8 = vsel %vm5425_vm3, %v5415_v15, %v5310_v43 }
 0x97d   : > { %v5188_v37 = vpop.f32.mrf.mxu1 }
 0x97f   : > { %5367 = vrot.lane.b32.xlu1 %v4902_v3, %s6722_s23 }
 0x980   : > { %v5248_v54 = vpop.permute.xlu2 %5247 }
 0x981   : > { %v5416_v26 = vsel %vm992_vm1, %v9462_v27, %v5248_v54 }
 0x983   : > { %v5214_v7 = vpop.f32.mrf.mxu2  ;;  %v5322_v34 = vpop.permute.xlu0 %5321 }
 0x987   : > { %5385 = vrot.lane.b32.xlu1 %v5136_v63, %s6722_s23 }
 0x988   : > { %v5250_v4 = vpop.permute.xlu2 %5249 }
 0x98b   : > { %v5312_v61 = vpop.permute.xlu0 %5311 }
 0x98c   : > { %v5433_v49 = vsel %vm5425_vm3, %v5416_v26, %v5312_v61  ;;  %v9467_v61 = vld [vmem:[#allocation48_spill] sm:$0xff] }
 0x98f   : > { %5383 = vrot.lane.b32.xlu1 %v5110_v62, %s6722_s23  ;;  %v9463_v62 = vld [vmem:[#allocation50_spill] sm:$0xff] }
 0x993   : > { %v5324_v18 = vpop.permute.xlu0 %5323 }
 0x994   : > { %v5439_v30 = vsel %vm5425_vm3, %v5422_v38, %v5324_v18 }
 0x996   : > { %v5370_v29 = vpop.permute.xlu1 %5369 }
 0x997   : > { %5261 = vrot.lane.b32.xlu1 %v9454_v44, %s6720_s11  ;;  %v5447_v47 = vsel %vm5442_vm4, %v8928_v52, %v5370_v29  ;;  %v9464_v44 = vld [vmem:[#allocation68_spill] sm:$0xff] }
 0x99b   : > { %v5314_v2 = vpop.permute.xlu0 %5313 }
 0x99f   : > { %5389 = vrot.lane.b32.xlu1 %v5188_v37, %s6722_s23  ;;  %v5417_v37 = vsel %vm992_vm1, %v9464_v44, %v5250_v4 }
 0x9a0   : > { %v5374_v0 = vpop.permute.xlu2 %5373 }
 0x9a1   : > { %v5449_v25 = vsel %vm5442_vm4, %v5432_v8, %v5374_v0 }
 0x9a3   : > { %v5326_v45 = vpop.permute.xlu0 %5325 }
 0x9a7   : > { %5263 = vrot.lane.b32.xlu1 %v9455_v51, %s6720_s11  ;;  %v5434_v51 = vsel %vm5425_vm3, %v5417_v37, %v5314_v2 }
 0x9ab   : > { %v5376_v33 = vpop.permute.xlu2 %5375  ;;  %v5316_v63 = vpop.permute.xlu0 %5315 }
 0x9ac   : > { %v5450_v42 = vsel %vm5442_vm4, %v5433_v49, %v5376_v33 }
 0x9af   : > { %5391 = vrot.lane.b32.xlu1 %v5214_v7, %s6722_s23 }
 0x9b3   : > { %v5378_v58 = vpop.permute.xlu2 %5377 }
 0x9b6   : > { %v5532_v35 = vpop.f32.mrf.mxu0 }
 0x9b7   : > { %v5533_v5 = vadd.f32 %v8993_v36, %v5532_v35  ;;  %5381 = vrot.lane.b32.xlu1 %v5084_v41, %s6722_s23  ;;  %s5611_s23 = sshll.u32 %s8998_s26, 4  ;;  %s5612_s23 = int_to_ptr.vmem [resolvable:$true] %s5611_s23 }
 0x9b9   : > { %5580 = vst.msk [vmem:[%s8998_s26] sm:$0xff] %vm877_vm2, %v5533_v5 }
 0x9bb   : > { %v5252_v59 = vpop.permute.xlu2 %5251 }
 0x9bc   : > { %v5418_v43 = vsel %vm992_vm1, %v9465_v14, %v5252_v59 }
 0x9bd   : > { %v5435_v29 = vsel %vm5425_vm3, %v5418_v43, %v5316_v63 }
 0x9c3   : > { %v5380_v7 = vpop.permute.xlu2 %5379 }
 0x9e9   : > { %v5388_v39 = vpop.permute.xlu1 %5387 }
 0x9ea   : > { %v5535_v23 = vpop.f32.mrf.mxu0  ;;  %v5456_v60 = vsel %vm5442_vm4, %v5439_v30, %v5388_v39 }
 0x9eb   : > { %v5536_v24 = vadd.f32 %v8993_v36, %v5535_v23  ;;  %v5452_v23 = vsel %vm5442_vm4, %v5435_v29, %v5380_v7 }
 0x9ed   : > { %5581 = vst.msk [vmem:[%s8998_s26 + $0x8] sm:$0xff] %vm877_vm2, %v5536_v24  ;;  %v5254_v24 = vpop.permute.xlu2 %5253 }
 0x9f1   : > { %v5368_v11 = vpop.permute.xlu1 %5367 }
 0x9f2   : > { %v5446_v12 = vsel %vm5442_vm4, %v8917_v16, %v5368_v11  ;;  %v5538_v20 = vpop.f32.mrf.mxu0  ;;  %v5414_v16 = vsel %vm992_vm1, %v9457_v10, %v8941_v22  ;;  %v9459_v22 = vld [vmem:[#allocation51_spill] sm:$0xff]  ;;  %v5419_v11 = vsel %vm992_vm1, %v9467_v61, %v5254_v24 }
 0x9f3   : > { %v5539_v53 = vadd.f32 %v8993_v36, %v5538_v20  ;;  %6024 = vmatmul.msk.f32.gmra.mxu0 %vm877_vm2, %v5446_v12  ;;  %v5431_v46 = vsel %vm5425_vm3, %v5414_v16, %v8962_v13  ;;  %v5421_v3 = vsel %vm992_vm1, %v9459_v22, %v5258_v50  ;;  %v5328_v50 = vpop.permute.xlu0 %5327 }
 0x9f4   : > { %v5448_v55 = vsel %vm5442_vm4, %v5431_v46, %v5372_v56  ;;  %v5438_v13 = vsel %vm5425_vm3, %v5421_v3, %v5322_v34  ;;  %v5451_v56 = vsel %vm5442_vm4, %v5434_v51, %v5378_v58 }
 0x9f5   : > { %5582 = vst.msk [vmem:[%s8998_s26 + $0x10] sm:$0xff] %vm877_vm2, %v5539_v53 }
 0x9f9   : > { %v5386_v40 = vpop.permute.xlu1 %5385 }
 0x9fa   : > { %v5455_v48 = vsel %vm5442_vm4, %v5438_v13, %v5386_v40 }
 0x9fb   : > { %6025 = vmatmul.msk.f32.gmra.mxu0 %vm877_vm2, %v5447_v47  ;;  %v5318_v12 = vpop.permute.xlu0 %5317 }
 0x9fc   : > { %v5436_v20 = vsel %vm5425_vm3, %v5419_v11, %v5318_v12 }
 0xa01   : > { %v5384_v57 = vpop.permute.xlu1 %5383 }
 0xa02   : > { %v5454_v52 = vsel %vm5442_vm4, %v5437_v31, %v5384_v57 }
 0xa03   : > { %6026 = vmatmul.msk.f32.gmra.mxu0 %vm877_vm2, %v5448_v55  ;;  %6032 = vmatmul.msk.f32.vlgmr.msrb.gmra.mxu3 %vm877_vm2, %v5454_v52 }
 0xa09   : > { %v5262_v1 = vpop.permute.xlu1 %5261 }
 0xa0a   : > { %v5423_v41 = vsel %vm992_vm1, %v9463_v62, %v5262_v1 }
 0xa0b   : > { %6027 = vmatmul.msk.f32.gmra.mxu0 %vm877_vm2, %v5449_v25  ;;  %6033 = vmatmul.msk.f32.gmra.mxu3 %vm877_vm2, %v5455_v48  ;;  %v5440_v35 = vsel %vm5425_vm3, %v5423_v41, %v5326_v45 }
 0xa11   : > { %v5390_v19 = vpop.permute.xlu1 %5389 }
 0xa12   : > { %v5457_v28 = vsel %vm5442_vm4, %v5440_v35, %v5390_v19 }
 0xa13   : > { %6028 = vmatmul.msk.f32.gmra.mxu0 %vm877_vm2, %v5450_v42  ;;  %6034 = vmatmul.msk.f32.gmra.mxu3 %vm877_vm2, %v5456_v60 }
 0xa19   : > { %v5264_v5 = vpop.permute.xlu1 %5263 }
 0xa1a   : > { %v5424_v54 = vsel %vm992_vm1, %v9466_v6, %v5264_v5 }
 0xa1b   : > { %6029 = vmatmul.msk.f32.gmra.mxu0 %vm877_vm2, %v5451_v56  ;;  %6035 = vmatmul.msk.f32.gmra.mxu3 %vm877_vm2, %v5457_v28  ;;  %v5441_v34 = vsel %vm5425_vm3, %v5424_v54, %v5328_v50 }
 0xa21   : > { %v5392_v39 = vpop.permute.xlu1 %5391 }
 0xa22   : > { %v5458_v4 = vsel %vm5442_vm4, %v5441_v34, %v5392_v39 }
 0xa23   : > { %6030 = vmatmul.msk.f32.gmra.mxu0 %vm877_vm2, %v5452_v23  ;;  %6036 = vmatmul.msk.f32.gmra.mxu3 %vm877_vm2, %v5458_v4 }
 0xa29   : > { %v5382_v0 = vpop.permute.xlu1 %5381 }
 0xa2a   : > { %v5453_v53 = vsel %vm5442_vm4, %v5436_v20, %v5382_v0 }
 0xa2b   : > { %6031 = vmatmul.msk.f32.gmra.mxu0 %vm877_vm2, %v5453_v53 }
 0xa70   : > { %v5541_v18 = vpop.f32.mrf.mxu0 }
 0xa71   : > { %v5542_v40 = vadd.f32 %v8993_v36, %v5541_v18 }
 0xa73   : > { %5583 = vst.msk [vmem:[%s8998_s26 + $0x18] sm:$0xff] %vm877_vm2, %v5542_v40 }
 0xa78   : > { %v5544_v47 = vpop.f32.mrf.mxu0 }
 0xa79   : > { %v5545_v33 = vadd.f32 %v8993_v36, %v5544_v47 }
 0xa7b   : > { %5584 = vst.msk [vmem:[%s8998_s26 + $0x20] sm:$0xff] %vm877_vm2, %v5545_v33 }
 0xa80   : > { %v5547_v10 = vpop.f32.mrf.mxu0 }
 0xa81   : > { %v5548_v16 = vadd.f32 %v8993_v36, %v5547_v10 }
 0xa83   : > { %5585 = vst.msk [vmem:[%s8998_s26 + $0x28] sm:$0xff] %vm877_vm2, %v5548_v16 }
 0xa86   : > { %v5565_v17 = vpop.f32.mrf.mxu3 }
 0xa87   : > { %v5566_v21 = vadd.f32 %v8993_v36, %v5565_v17 }
 0xa88   : > { %v5550_v2 = vpop.f32.mrf.mxu0 }
 0xa89   : > { %5591 = vst.msk [vmem:[%s8998_s26 + $0x58] sm:$0xff] %vm877_vm2, %v5566_v21  ;;  %v5551_v46 = vadd.f32 %v8993_v36, %v5550_v2 }
 0xa8b   : > { %5586 = vst.msk [vmem:[%s8998_s26 + $0x30] sm:$0xff] %vm877_vm2, %v5551_v46 }
 0xa8e   : > { %v5568_v31 = vpop.f32.mrf.mxu3 }
 0xa8f   : > { %v5569_v57 = vadd.f32 %v8993_v36, %v5568_v31 }
 0xa90   : > { %v5553_v55 = vpop.f32.mrf.mxu0 }
 0xa91   : > { %5592 = vst.msk [vmem:[%s8998_s26 + $0x60] sm:$0xff] %vm877_vm2, %v5569_v57  ;;  %v5554_v52 = vadd.f32 %v8993_v36, %v5553_v55 }
 0xa93   : > { %5587 = vst.msk [vmem:[%s8998_s26 + $0x38] sm:$0xff] %vm877_vm2, %v5554_v52 }
 0xa96   : > { %v5571_v58 = vpop.f32.mrf.mxu3 }
 0xa97   : > { %v5572_v22 = vadd.f32 %v8993_v36, %v5571_v58 }
 0xa98   : > { %v5556_v3 = vpop.f32.mrf.mxu0 }
 0xa99   : > { %5593 = vst.msk [vmem:[%s8998_s26 + $0x68] sm:$0xff] %vm877_vm2, %v5572_v22  ;;  %v5557_v32 = vadd.f32 %v8993_v36, %v5556_v3 }
 0xa9b   : > { %5588 = vst.msk [vmem:[%s8998_s26 + $0x40] sm:$0xff] %vm877_vm2, %v5557_v32 }
 0xa9e   : > { %v5574_v15 = vpop.f32.mrf.mxu3 }
 0xa9f   : > { %v5575_v8 = vadd.f32 %v8993_v36, %v5574_v15 }
 0xaa0   : > { %v5559_v13 = vpop.f32.mrf.mxu0 }
 0xaa1   : > { %5594 = vst.msk [vmem:[%s8998_s26 + $0x70] sm:$0xff] %vm877_vm2, %v5575_v8  ;;  %v5560_v1 = vadd.f32 %v8993_v36, %v5559_v13 }
 0xaa3   : > { %5589 = vst.msk [vmem:[%s8998_s26 + $0x48] sm:$0xff] %vm877_vm2, %v5560_v1 }
 0xaa6   : > { %v5577_v25 = vpop.f32.mrf.mxu3 }
 0xaa7   : > { %v5578_v45 = vadd.f32 %v8993_v36, %v5577_v25 }
 0xaa8   : > { %v5562_v48 = vpop.f32.mrf.mxu0 }
 0xaa9   : > { %5595 = vst.msk [vmem:[%s8998_s26 + $0x78] sm:$0xff] %vm877_vm2, %v5578_v45  ;;  %v5563_v59 = vadd.f32 %v8993_v36, %v5562_v48 }
 0xaab   : > { %5590 = vst.msk [vmem:[%s8998_s26 + $0x50] sm:$0xff] %vm877_vm2, %v5563_v59 }
 0xaac   : > { %6654 = shalt.err (!%p6651_p0)
}
 0xaad   : > { %s6723_s1 = smov 128  }
 0xaae   : > { %6080 = dma.vmem_to_hbm [thread:$0]  (%p6844_p9), %s5612_s23, 2048, %s5614_s19, %s5597_s29, %s6723_s1, %s6723_s1, %s6720_s11  }
 0xaaf PF: > { %s9470_s15 = sld [smem:[#allocation12_spill]]  ;;  %p6093_p1 = pnand %p5765_p12, %p6851_p11 }
 0xab0   : > { %s9472_s17 = sld [smem:[#allocation16_spill]] }
 0xab1   : > { %p6094_p2 = pneg %p6093_p1 }
 0xab5   : > { %s5628_s26 = sand.u32 1, %s9470_s15  }
 0xab6   : > { %s5629_s10 = scalar_lea.sflag [#allocation4], %s5628_s26 }
 0xab7   : > { %6688 = dma.done.wait (%p6094_p2), %s5629_s10, 2048  }
 0xab8   : > { %6690 = vsyncadd (%p6094_p2), %s5629_s10, 4294965248  ;;  %s31_s26 = sadd.s32 1, %s9472_s17   ;;  %s9473_s18 = sld [smem:[#allocation13_spill]] }
 0xab9   : > { %p28_p3 = scmp.ge.s32.totalorder %s31_s26, 4   ;;  %s9474_s23 = sld [smem:[#allocation19_spill]] }
 0xaba   : > { %s9475_s24 = sld [smem:[#allocation15_spill]]  ;;  %s9477_s21 = smov %s6697_s22 }
 0xabb   : > { %s9476_s25 = sld [smem:[#allocation17_spill]]  ;;  %30 = sbr.rel (!%p28_p3) target bundleno = 15 (0xf), region = 140 }
 0xabe   : > { %s9478_s22 = smov %s9473_s18 }
 0xac0   :  { %5635 = vsyncpa [#allocation3], 1 }
 0xac1   :  { %5637 = vsyncpa [#allocation3 + $0x1], 1 }
 0xac2   :  { %5638 = vsyncpa [#allocation6], 1 }
 0xac3   :  { %5640 = vsyncpa [#allocation6 + $0x1], 1 }
 0xac4   :  { %5641 = vsyncpa [#allocation4], 1 }
 0xac5   :  { %5643 = vsyncpa [#allocation4 + $0x1], 1 }

</bundles_post_ra>
